<compile_context>
chip_gen: v7x
topology: tpu7x:2x2x1
jax: 0.10.0
libtpu: 0.0.40
codegen_flags: <defaults>
</compile_context>

<pallas_src>
import math

import jax
import jax.numpy as jnp
from jax.experimental import pallas as pl

# ----- small config (same structure as BERT + MLP head, scaled down) -----
HIDDEN = 128
NUM_LAYERS = 2
NUM_HEADS = 4
HEAD_DIM = HIDDEN // NUM_HEADS
INTERMEDIATE = 4 * HIDDEN
VOCAB = 128
MAX_POS = 64
TYPE_VOCAB = 2
FC_HIDDEN = 64
FC_PAD = 128                   # fc1 output padded lane-dense
OUTPUT_NUMBERS = 13
HEAD_PAD = 128                 # fc2 output padded lane-dense
LN_EPS = 1e-12
SUBLANE = 8
MM_DTYPE = jnp.bfloat16        # MXU input dtype; accumulation & stats in f32


# --------------------------- in-kernel helpers ----------------------------

def _ln(x, g, b):
    """LayerNorm in f32 (x, g, b already f32)."""
    mu = jnp.mean(x, axis=-1, keepdims=True)
    var = jnp.mean(jnp.square(x - mu), axis=-1, keepdims=True)
    return (x - mu) * jax.lax.rsqrt(var + LN_EPS) * g + b


def _gelu(x):
    # TODO(synk): HF BERT uses exact erf-GELU; tanh approximation used here.
    c = jnp.float32(0.7978845608028654)  # sqrt(2/pi)
    return 0.5 * x * (1.0 + jnp.tanh(c * (x + 0.044715 * x * x * x)))


# ------------------------- fused BERT-stack kernel -------------------------

def _bert_stack_kernel(x_ref, bias_ref,
                       qw_ref, kw_ref, vw_ref, qb_ref, kb_ref, vb_ref,
                       ow_ref, ob_ref, ln1g_ref, ln1b_ref,
                       iw_ref, ib_ref, outw_ref, outb_ref,
                       ln2g_ref, ln2b_ref,
                       fc1w_ref, fc1b_ref, fc2w_ref, fc2b_ref,
                       o_ref):
    """All encoder layers + MLP head on the full (B*S1P, H) row slab."""
    m = x_ref.shape[0]
    batch = o_ref.shape[0]
    s1p = m // batch

    x = x_ref[...].astype(jnp.float32)      # residual stream, VMEM-resident
    bias = bias_ref[...]                     # (M, M) block-diag + pad mask

    for l in range(NUM_LAYERS):
        xb = x.astype(MM_DTYPE)
        attn = jnp.zeros((m, HIDDEN), jnp.float32)
        for h in range(NUM_HEADS):
            idx = l * NUM_HEADS + h
            # Per-head projections from pre-split weights (no lane slicing);
            # attention scale is folded into the Q weight/bias at prep time.
            qh = jnp.dot(xb, qw_ref[idx],
                         preferred_element_type=jnp.float32) + qb_ref[idx]
            kh = jnp.dot(xb, kw_ref[idx],
                         preferred_element_type=jnp.float32) + kb_ref[idx]
            vh = jnp.dot(xb, vw_ref[idx],
                         preferred_element_type=jnp.float32) + vb_ref[idx]
            s = jax.lax.dot_general(qh.astype(MM_DTYPE), kh.astype(MM_DTYPE),
                                    (((1,), (1,)), ((), ())),
                                    preferred_element_type=jnp.float32)
            s = s + bias
            s = s - jnp.max(s, axis=-1, keepdims=True)
            p = jnp.exp(s)
            inv = pl.reciprocal(jnp.sum(p, axis=-1, keepdims=True), approx=True)
            ctx = jnp.dot((p * inv).astype(MM_DTYPE), vh.astype(MM_DTYPE),
                          preferred_element_type=jnp.float32)     # (M, HD)
            # o-projection as per-head MXU partial sums (no lane concat).
            attn = attn + jnp.dot(ctx.astype(MM_DTYPE), ow_ref[idx],
                                  preferred_element_type=jnp.float32)
            # attention-prob dropout -> identity in eval mode.
        attn = attn + ob_ref[l] + x
        h1 = _ln(attn, ln1g_ref[l], ln1b_ref[l])

        # Fused FFN: the (M, INTERMEDIATE) intermediate never touches HBM.
        inter = jnp.dot(h1.astype(MM_DTYPE), iw_ref[l],
                        preferred_element_type=jnp.float32) + ib_ref[l]
        inter = _gelu(inter)
        ffn = jnp.dot(inter.astype(MM_DTYPE), outw_ref[l],
                      preferred_element_type=jnp.float32) + outb_ref[l] + h1
        x = _ln(ffn, ln2g_ref[l], ln2b_ref[l])

    # CLS rows (row 0 of every example), then the fused lane-dense MLP head.
    cls = jnp.concatenate(
        [x[b * s1p:b * s1p + 1, :] for b in range(batch)], axis=0)   # (B, H)
    hfc = jnp.dot(cls.astype(MM_DTYPE), fc1w_ref[...],
                  preferred_element_type=jnp.float32) + fc1b_ref[...]
    hfc = jnp.maximum(hfc, 0.0)
    # head dropout (p=0.3) -> identity in eval mode.
    y = jnp.dot(hfc.astype(MM_DTYPE), fc2w_ref[...],
                preferred_element_type=jnp.float32) + fc2b_ref[...]
    o_ref[...] = y.astype(o_ref.dtype)


def bert_stack(x2d, bias, p, batch):
    """One pallas_call for the whole encoder stack + head (whole arrays in VMEM)."""
    return pl.pallas_call(
        _bert_stack_kernel,
        out_shape=jax.ShapeDtypeStruct((batch, HEAD_PAD), jnp.float32),
    )(x2d, bias,
      p["qw"], p["kw"], p["vw"], p["qb"], p["kb"], p["vb"],
      p["ow"], p["ob"], p["ln1_g"], p["ln1_b"],
      p["iw"], p["ib"], p["outw"], p["outb"], p["ln2_g"], p["ln2_b"],
      p["fc1_w"], p["fc1_b"], p["fc2_w"], p["fc2_b"])


# ------------------------------ parameters --------------------------------

def init_params(key):
    keys = iter(jax.random.split(key, 32))

    def nrm(shape, scale=0.02):
        return (scale * jax.random.normal(next(keys), shape)).astype(jnp.float32)

    ones = lambda s: jnp.ones(s, jnp.float32)
    zeros = lambda s: jnp.zeros(s, jnp.float32)

    params = {
        "word_emb": nrm((VOCAB, HIDDEN)),
        "pos_emb": nrm((MAX_POS, HIDDEN)),
        "tok_emb": nrm((TYPE_VOCAB, HIDDEN)),
        "emb_ln_g": ones((HIDDEN,)),
        "emb_ln_b": zeros((HIDDEN,)),
        "layers": [],
        "fc1_w": nrm((HIDDEN, FC_HIDDEN)),
        "fc1_b": zeros((FC_HIDDEN,)),
        "fc2_w": nrm((FC_HIDDEN, OUTPUT_NUMBERS)),
        "fc2_b": zeros((OUTPUT_NUMBERS,)),
    }
    for _ in range(NUM_LAYERS):
        params["layers"].append({
            "q_w": nrm((HIDDEN, HIDDEN)), "q_b": zeros((HIDDEN,)),
            "k_w": nrm((HIDDEN, HIDDEN)), "k_b": zeros((HIDDEN,)),
            "v_w": nrm((HIDDEN, HIDDEN)), "v_b": zeros((HIDDEN,)),
            "o_w": nrm((HIDDEN, HIDDEN)), "o_b": zeros((HIDDEN,)),
            "ln1_g": ones((HIDDEN,)), "ln1_b": zeros((HIDDEN,)),
            "i_w": nrm((HIDDEN, INTERMEDIATE)), "i_b": zeros((INTERMEDIATE,)),
            "out_w": nrm((INTERMEDIATE, HIDDEN)), "out_b": zeros((HIDDEN,)),
            "ln2_g": ones((HIDDEN,)), "ln2_b": zeros((HIDDEN,)),
        })
    return params


def prepare_params(raw):
    """Kernel-ready layout: per-head pre-split Q/K/V/O (scale folded into Q),
    per-layer weights stacked on a leading axis, bf16 matmul weights, (1,N)
    biases, lane-dense padded fc1/fc2."""
    scale = 1.0 / math.sqrt(HEAD_DIM)
    qw, kw, vw, qb, kb, vb, ow = [], [], [], [], [], [], []
    ob, ln1g, ln1b, iw, ib, outw, outb, ln2g, ln2b = ([] for _ in range(9))

    for L in raw["layers"]:
        qw.append((L["q_w"] * scale).reshape(HIDDEN, NUM_HEADS, HEAD_DIM)
                  .transpose(1, 0, 2))
        kw.append(L["k_w"].reshape(HIDDEN, NUM_HEADS, HEAD_DIM).transpose(1, 0, 2))
        vw.append(L["v_w"].reshape(HIDDEN, NUM_HEADS, HEAD_DIM).transpose(1, 0, 2))
        qb.append((L["q_b"] * scale).reshape(NUM_HEADS, 1, HEAD_DIM))
        kb.append(L["k_b"].reshape(NUM_HEADS, 1, HEAD_DIM))
        vb.append(L["v_b"].reshape(NUM_HEADS, 1, HEAD_DIM))
        ow.append(L["o_w"].reshape(NUM_HEADS, HEAD_DIM, HIDDEN))
        ob.append(L["o_b"].reshape(1, HIDDEN))
        ln1g.append(L["ln1_g"].reshape(1, HIDDEN))
        ln1b.append(L["ln1_b"].reshape(1, HIDDEN))
        iw.append(L["i_w"])
        ib.append(L["i_b"].reshape(1, INTERMEDIATE))
        outw.append(L["out_w"])
        outb.append(L["out_b"].reshape(1, HIDDEN))
        ln2g.append(L["ln2_g"].reshape(1, HIDDEN))
        ln2b.append(L["ln2_b"].reshape(1, HIDDEN))

    cat = lambda xs: jnp.concatenate(xs, axis=0)
    stk = lambda xs: jnp.stack(xs, axis=0)

    fc1_w = jnp.zeros((HIDDEN, FC_PAD), jnp.float32).at[:, :FC_HIDDEN].set(raw["fc1_w"])
    fc1_b = jnp.zeros((1, FC_PAD), jnp.float32).at[0, :FC_HIDDEN].set(raw["fc1_b"])
    fc2_w = jnp.zeros((FC_PAD, HEAD_PAD), jnp.float32) \
        .at[:FC_HIDDEN, :OUTPUT_NUMBERS].set(raw["fc2_w"])
    fc2_b = jnp.zeros((1, HEAD_PAD), jnp.float32) \
        .at[0, :OUTPUT_NUMBERS].set(raw["fc2_b"])

    return {
        "word_emb": raw["word_emb"], "pos_emb": raw["pos_emb"],
        "tok_emb": raw["tok_emb"],
        "emb_ln_g": raw["emb_ln_g"], "emb_ln_b": raw["emb_ln_b"],
        "qw": cat(qw).astype(MM_DTYPE), "kw": cat(kw).astype(MM_DTYPE),
        "vw": cat(vw).astype(MM_DTYPE),
        "qb": cat(qb), "kb": cat(kb), "vb": cat(vb),
        "ow": cat(ow).astype(MM_DTYPE),
        "ob": stk(ob), "ln1_g": stk(ln1g), "ln1_b": stk(ln1b),
        "iw": stk(iw).astype(MM_DTYPE), "ib": stk(ib),
        "outw": stk(outw).astype(MM_DTYPE), "outb": stk(outb),
        "ln2_g": stk(ln2g), "ln2_b": stk(ln2b),
        "fc1_w": fc1_w.astype(MM_DTYPE), "fc1_b": fc1_b,
        "fc2_w": fc2_w.astype(MM_DTYPE), "fc2_b": fc2_b,
    }


# -------------------------------- forward ---------------------------------

def mlp_feature_bert_forward(params, input_ids, attention_mask, token_type_ids,
                             tabular_data):
    B, S = input_ids.shape
    S1 = S + 1
    S1P = ((S1 + SUBLANE - 1) // SUBLANE) * SUBLANE      # pad seq to mult. of 8
    pad = S1P - S1

    # Word-embedding gather + tabular-row prepend (plain JAX glue).
    word = jnp.take(params["word_emb"], input_ids, axis=0)            # (B,S,H)
    mlp_features = tabular_data[:, None, :]                           # (B,1,H)
    ext_emb = jnp.concatenate([mlp_features, word], axis=1)           # (B,S1,H)
    ext_mask = jnp.concatenate(
        [jnp.ones((B, 1), jnp.float32), attention_mask.astype(jnp.float32)], axis=1)
    ext_tok = jnp.concatenate(
        [jnp.zeros((B, 1), token_type_ids.dtype), token_type_ids], axis=1)

    # Pad to S1P (pad keys are masked out via the additive bias below).
    ext_emb = jnp.pad(ext_emb, ((0, 0), (0, pad), (0, 0)))
    ext_mask = jnp.pad(ext_mask, ((0, 0), (0, pad)))
    ext_tok = jnp.pad(ext_tok, ((0, 0), (0, pad)))

    # BERT embeddings + LayerNorm in plain JAX (XLA fuses these elementwise ops).
    pos = params["pos_emb"][:S1P]
    tok = jnp.take(params["tok_emb"], ext_tok, axis=0)
    x = ext_emb + pos[None, :, :] + tok
    mu = jnp.mean(x, axis=-1, keepdims=True)
    var = jnp.mean(jnp.square(x - mu), axis=-1, keepdims=True)
    x = (x - mu) * jax.lax.rsqrt(var + LN_EPS) * params["emb_ln_g"] + params["emb_ln_b"]
    # embedding dropout (p=0.1) -> identity in eval mode.

    M = B * S1P
    x2d = x.reshape(M, HIDDEN).astype(jnp.float32)

    # Block-diagonal additive mask bias: query i may only attend to key j of
    # the same example with a valid (non-pad, unmasked) key.
    batch_id = jnp.repeat(jnp.arange(B), S1P)
    key_valid = ext_mask.reshape(M) > 0
    valid = (batch_id[:, None] == batch_id[None, :]) & key_valid[None, :]
    bias = jnp.where(valid, 0.0, -10000.0).astype(jnp.float32)        # (M, M)

    out = bert_stack(x2d, bias, params, B)                            # (B,128)
    return out[:, :OUTPUT_NUMBERS]                                    # (B,13)


# ---------------------------------- main -----------------------------------

if __name__ == "__main__":
    key = jax.random.PRNGKey(0)
    pkey, ikey, tkey = jax.random.split(key, 3)

    params = prepare_params(init_params(pkey))

    B, S = 2, 8
    input_ids = jax.random.randint(ikey, (B, S), 0, VOCAB, dtype=jnp.int32)
    attention_mask = jnp.ones((B, S), dtype=jnp.int32)
    token_type_ids = jnp.zeros((B, S), dtype=jnp.int32)
    tabular_data = jax.random.normal(tkey, (B, HIDDEN), dtype=jnp.float32)

    fwd = jax.jit(mlp_feature_bert_forward)
    out = fwd(params, input_ids, attention_mask, token_type_ids, tabular_data)
    jax.block_until_ready(out)
    assert out.shape == (B, OUTPUT_NUMBERS) and out.dtype == jnp.float32
    print("KERNEL_OK")
</pallas_src>

<mosaic_0001>
module attributes {stable_mosaic.version = 11 : i64} {
  func.func @_bert_stack_kernel(%arg0: memref<32x128xf32, #tpu.memory_space<vmem>>, %arg1: memref<32x32xf32, #tpu.memory_space<vmem>>, %arg2: memref<8x128x32xbf16, #tpu.memory_space<vmem>>, %arg3: memref<8x128x32xbf16, #tpu.memory_space<vmem>>, %arg4: memref<8x128x32xbf16, #tpu.memory_space<vmem>>, %arg5: memref<8x1x32xf32, #tpu.memory_space<vmem>>, %arg6: memref<8x1x32xf32, #tpu.memory_space<vmem>>, %arg7: memref<8x1x32xf32, #tpu.memory_space<vmem>>, %arg8: memref<8x32x128xbf16, #tpu.memory_space<vmem>>, %arg9: memref<2x1x128xf32, #tpu.memory_space<vmem>>, %arg10: memref<2x1x128xf32, #tpu.memory_space<vmem>>, %arg11: memref<2x1x128xf32, #tpu.memory_space<vmem>>, %arg12: memref<2x128x512xbf16, #tpu.memory_space<vmem>>, %arg13: memref<2x1x512xf32, #tpu.memory_space<vmem>>, %arg14: memref<2x512x128xbf16, #tpu.memory_space<vmem>>, %arg15: memref<2x1x128xf32, #tpu.memory_space<vmem>>, %arg16: memref<2x1x128xf32, #tpu.memory_space<vmem>>, %arg17: memref<2x1x128xf32, #tpu.memory_space<vmem>>, %arg18: memref<128x128xbf16, #tpu.memory_space<vmem>>, %arg19: memref<1x128xf32, #tpu.memory_space<vmem>>, %arg20: memref<128x128xbf16, #tpu.memory_space<vmem>>, %arg21: memref<1x128xf32, #tpu.memory_space<vmem>>, %arg22: memref<2x128xf32, #tpu.memory_space<vmem>>) attributes {dimension_semantics = [], scalar_prefetch = 0 : i64, scratch_operands = 0 : i64, tpu.core_type = #tpu.core_type<tc>} {
    %c0 = arith.constant 0 : index
    %c0_0 = arith.constant 0 : index
    %0 = vector.load %arg0[%c0, %c0_0] : memref<32x128xf32, #tpu.memory_space<vmem>>, vector<32x128xf32>
    %c0_1 = arith.constant 0 : index
    %c0_2 = arith.constant 0 : index
    %1 = vector.load %arg1[%c0_1, %c0_2] : memref<32x32xf32, #tpu.memory_space<vmem>>, vector<32x32xf32>
    %2 = arith.truncf %0 : vector<32x128xf32> to vector<32x128xbf16>
    %cst = arith.constant 0.000000e+00 : f32
    %3 = vector.broadcast %cst : f32 to vector<32x128xf32>
    %c0_3 = arith.constant 0 : index
    %c0_4 = arith.constant 0 : index
    %c0_5 = arith.constant 0 : index
    %4 = vector.load %arg2[%c0_3, %c0_4, %c0_5] : memref<8x128x32xbf16, #tpu.memory_space<vmem>>, vector<1x128x32xbf16>
    %5 = vector.shape_cast %4 : vector<1x128x32xbf16> to vector<128x32xbf16>
    %cst_6 = arith.constant dense<0.000000e+00> : vector<32x32xf32>
    %6 = tpu.matmul %2, %5, %cst_6 {dimension_numbers = #tpu.dot_dimension_numbers<[1], [0], [0], [1], [0, 0, 1, 1], [], []>} : vector<32x128xbf16>, vector<128x32xbf16>, vector<32x32xf32> -> vector<32x32xf32>
    %c0_7 = arith.constant 0 : index
    %c0_8 = arith.constant 0 : index
    %c0_9 = arith.constant 0 : index
    %7 = vector.load %arg5[%c0_7, %c0_8, %c0_9] : memref<8x1x32xf32, #tpu.memory_space<vmem>>, vector<1x1x32xf32>
    %8 = vector.shape_cast %7 : vector<1x1x32xf32> to vector<1x32xf32>
    %9 = vector.broadcast %8 : vector<1x32xf32> to vector<32x32xf32>
    %10 = arith.addf %6, %9 : vector<32x32xf32>
    %c0_10 = arith.constant 0 : index
    %c0_11 = arith.constant 0 : index
    %c0_12 = arith.constant 0 : index
    %11 = vector.load %arg3[%c0_10, %c0_11, %c0_12] : memref<8x128x32xbf16, #tpu.memory_space<vmem>>, vector<1x128x32xbf16>
    %12 = vector.shape_cast %11 : vector<1x128x32xbf16> to vector<128x32xbf16>
    %cst_13 = arith.constant dense<0.000000e+00> : vector<32x32xf32>
    %13 = tpu.matmul %2, %12, %cst_13 {dimension_numbers = #tpu.dot_dimension_numbers<[1], [0], [0], [1], [0, 0, 1, 1], [], []>} : vector<32x128xbf16>, vector<128x32xbf16>, vector<32x32xf32> -> vector<32x32xf32>
    %c0_14 = arith.constant 0 : index
    %c0_15 = arith.constant 0 : index
    %c0_16 = arith.constant 0 : index
    %14 = vector.load %arg6[%c0_14, %c0_15, %c0_16] : memref<8x1x32xf32, #tpu.memory_space<vmem>>, vector<1x1x32xf32>
    %15 = vector.shape_cast %14 : vector<1x1x32xf32> to vector<1x32xf32>
    %16 = vector.broadcast %15 : vector<1x32xf32> to vector<32x32xf32>
    %17 = arith.addf %13, %16 : vector<32x32xf32>
    %c0_17 = arith.constant 0 : index
    %c0_18 = arith.constant 0 : index
    %c0_19 = arith.constant 0 : index
    %18 = vector.load %arg4[%c0_17, %c0_18, %c0_19] : memref<8x128x32xbf16, #tpu.memory_space<vmem>>, vector<1x128x32xbf16>
    %19 = vector.shape_cast %18 : vector<1x128x32xbf16> to vector<128x32xbf16>
    %cst_20 = arith.constant dense<0.000000e+00> : vector<32x32xf32>
    %20 = tpu.matmul %2, %19, %cst_20 {dimension_numbers = #tpu.dot_dimension_numbers<[1], [0], [0], [1], [0, 0, 1, 1], [], []>} : vector<32x128xbf16>, vector<128x32xbf16>, vector<32x32xf32> -> vector<32x32xf32>
    %c0_21 = arith.constant 0 : index
    %c0_22 = arith.constant 0 : index
    %c0_23 = arith.constant 0 : index
    %21 = vector.load %arg7[%c0_21, %c0_22, %c0_23] : memref<8x1x32xf32, #tpu.memory_space<vmem>>, vector<1x1x32xf32>
    %22 = vector.shape_cast %21 : vector<1x1x32xf32> to vector<1x32xf32>
    %23 = vector.broadcast %22 : vector<1x32xf32> to vector<32x32xf32>
    %24 = arith.addf %20, %23 : vector<32x32xf32>
    %25 = arith.truncf %10 : vector<32x32xf32> to vector<32x32xbf16>
    %26 = arith.truncf %17 : vector<32x32xf32> to vector<32x32xbf16>
    %cst_24 = arith.constant dense<0.000000e+00> : vector<32x32xf32>
    %27 = tpu.matmul %25, %26, %cst_24 {dimension_numbers = #tpu.dot_dimension_numbers<[1], [1], [0], [0], [0, 0, 1, 0], [], []>} : vector<32x32xbf16>, vector<32x32xbf16>, vector<32x32xf32> -> vector<32x32xf32>
    %28 = arith.addf %27, %1 : vector<32x32xf32>
    %cst_25 = arith.constant dense<0xFF800000> : vector<32xf32>
    %29 = vector.multi_reduction <maximumf>, %28, %cst_25 [1] : vector<32x32xf32> to vector<32xf32>
    %30 = vector.shape_cast %29 : vector<32xf32> to vector<32x1xf32>
    %31 = vector.broadcast %30 : vector<32x1xf32> to vector<32x32xf32>
    %32 = arith.subf %28, %31 : vector<32x32xf32>
    %33 = math.exp %32 : vector<32x32xf32>
    %cst_26 = arith.constant dense<0.000000e+00> : vector<32xf32>
    %34 = vector.multi_reduction <add>, %33, %cst_26 [1] : vector<32x32xf32> to vector<32xf32>
    %35 = vector.shape_cast %34 : vector<32xf32> to vector<32x1xf32>
    %36 = tpu.reciprocal %35 {approx = true} : vector<32x1xf32> -> vector<32x1xf32>
    %37 = vector.broadcast %36 : vector<32x1xf32> to vector<32x32xf32>
    %38 = arith.mulf %33, %37 : vector<32x32xf32>
    %39 = arith.truncf %38 : vector<32x32xf32> to vector<32x32xbf16>
    %40 = arith.truncf %24 : vector<32x32xf32> to vector<32x32xbf16>
    %cst_27 = arith.constant dense<0.000000e+00> : vector<32x32xf32>
    %41 = tpu.matmul %39, %40, %cst_27 {dimension_numbers = #tpu.dot_dimension_numbers<[1], [0], [0], [1], [0, 0, 1, 1], [], []>} : vector<32x32xbf16>, vector<32x32xbf16>, vector<32x32xf32> -> vector<32x32xf32>
    %42 = arith.truncf %41 : vector<32x32xf32> to vector<32x32xbf16>
    %c0_28 = arith.constant 0 : index
    %c0_29 = arith.constant 0 : index
    %c0_30 = arith.constant 0 : index
    %43 = vector.load %arg8[%c0_28, %c0_29, %c0_30] : memref<8x32x128xbf16, #tpu.memory_space<vmem>>, vector<1x32x128xbf16>
    %44 = vector.shape_cast %43 : vector<1x32x128xbf16> to vector<32x128xbf16>
    %cst_31 = arith.constant dense<0.000000e+00> : vector<32x128xf32>
    %45 = tpu.matmul %42, %44, %cst_31 {dimension_numbers = #tpu.dot_dimension_numbers<[1], [0], [0], [1], [0, 0, 1, 1], [], []>} : vector<32x32xbf16>, vector<32x128xbf16>, vector<32x128xf32> -> vector<32x128xf32>
    %46 = arith.addf %3, %45 : vector<32x128xf32>
    %c1 = arith.constant 1 : index
    %c0_32 = arith.constant 0 : index
    %c0_33 = arith.constant 0 : index
    %47 = vector.load %arg2[%c1, %c0_32, %c0_33] : memref<8x128x32xbf16, #tpu.memory_space<vmem>>, vector<1x128x32xbf16>
    %48 = vector.shape_cast %47 : vector<1x128x32xbf16> to vector<128x32xbf16>
    %cst_34 = arith.constant dense<0.000000e+00> : vector<32x32xf32>
    %49 = tpu.matmul %2, %48, %cst_34 {dimension_numbers = #tpu.dot_dimension_numbers<[1], [0], [0], [1], [0, 0, 1, 1], [], []>} : vector<32x128xbf16>, vector<128x32xbf16>, vector<32x32xf32> -> vector<32x32xf32>
    %c1_35 = arith.constant 1 : index
    %c0_36 = arith.constant 0 : index
    %c0_37 = arith.constant 0 : index
    %50 = vector.load %arg5[%c1_35, %c0_36, %c0_37] : memref<8x1x32xf32, #tpu.memory_space<vmem>>, vector<1x1x32xf32>
    %51 = vector.shape_cast %50 : vector<1x1x32xf32> to vector<1x32xf32>
    %52 = vector.broadcast %51 : vector<1x32xf32> to vector<32x32xf32>
    %53 = arith.addf %49, %52 : vector<32x32xf32>
    %c1_38 = arith.constant 1 : index
    %c0_39 = arith.constant 0 : index
    %c0_40 = arith.constant 0 : index
    %54 = vector.load %arg3[%c1_38, %c0_39, %c0_40] : memref<8x128x32xbf16, #tpu.memory_space<vmem>>, vector<1x128x32xbf16>
    %55 = vector.shape_cast %54 : vector<1x128x32xbf16> to vector<128x32xbf16>
    %cst_41 = arith.constant dense<0.000000e+00> : vector<32x32xf32>
    %56 = tpu.matmul %2, %55, %cst_41 {dimension_numbers = #tpu.dot_dimension_numbers<[1], [0], [0], [1], [0, 0, 1, 1], [], []>} : vector<32x128xbf16>, vector<128x32xbf16>, vector<32x32xf32> -> vector<32x32xf32>
    %c1_42 = arith.constant 1 : index
    %c0_43 = arith.constant 0 : index
    %c0_44 = arith.constant 0 : index
    %57 = vector.load %arg6[%c1_42, %c0_43, %c0_44] : memref<8x1x32xf32, #tpu.memory_space<vmem>>, vector<1x1x32xf32>
    %58 = vector.shape_cast %57 : vector<1x1x32xf32> to vector<1x32xf32>
    %59 = vector.broadcast %58 : vector<1x32xf32> to vector<32x32xf32>
    %60 = arith.addf %56, %59 : vector<32x32xf32>
    %c1_45 = arith.constant 1 : index
    %c0_46 = arith.constant 0 : index
    %c0_47 = arith.constant 0 : index
    %61 = vector.load %arg4[%c1_45, %c0_46, %c0_47] : memref<8x128x32xbf16, #tpu.memory_space<vmem>>, vector<1x128x32xbf16>
    %62 = vector.shape_cast %61 : vector<1x128x32xbf16> to vector<128x32xbf16>
    %cst_48 = arith.constant dense<0.000000e+00> : vector<32x32xf32>
    %63 = tpu.matmul %2, %62, %cst_48 {dimension_numbers = #tpu.dot_dimension_numbers<[1], [0], [0], [1], [0, 0, 1, 1], [], []>} : vector<32x128xbf16>, vector<128x32xbf16>, vector<32x32xf32> -> vector<32x32xf32>
    %c1_49 = arith.constant 1 : index
    %c0_50 = arith.constant 0 : index
    %c0_51 = arith.constant 0 : index
    %64 = vector.load %arg7[%c1_49, %c0_50, %c0_51] : memref<8x1x32xf32, #tpu.memory_space<vmem>>, vector<1x1x32xf32>
    %65 = vector.shape_cast %64 : vector<1x1x32xf32> to vector<1x32xf32>
    %66 = vector.broadcast %65 : vector<1x32xf32> to vector<32x32xf32>
    %67 = arith.addf %63, %66 : vector<32x32xf32>
    %68 = arith.truncf %53 : vector<32x32xf32> to vector<32x32xbf16>
    %69 = arith.truncf %60 : vector<32x32xf32> to vector<32x32xbf16>
    %cst_52 = arith.constant dense<0.000000e+00> : vector<32x32xf32>
    %70 = tpu.matmul %68, %69, %cst_52 {dimension_numbers = #tpu.dot_dimension_numbers<[1], [1], [0], [0], [0, 0, 1, 0], [], []>} : vector<32x32xbf16>, vector<32x32xbf16>, vector<32x32xf32> -> vector<32x32xf32>
    %71 = arith.addf %70, %1 : vector<32x32xf32>
    %cst_53 = arith.constant dense<0xFF800000> : vector<32xf32>
    %72 = vector.multi_reduction <maximumf>, %71, %cst_53 [1] : vector<32x32xf32> to vector<32xf32>
    %73 = vector.shape_cast %72 : vector<32xf32> to vector<32x1xf32>
    %74 = vector.broadcast %73 : vector<32x1xf32> to vector<32x32xf32>
    %75 = arith.subf %71, %74 : vector<32x32xf32>
    %76 = math.exp %75 : vector<32x32xf32>
    %cst_54 = arith.constant dense<0.000000e+00> : vector<32xf32>
    %77 = vector.multi_reduction <add>, %76, %cst_54 [1] : vector<32x32xf32> to vector<32xf32>
    %78 = vector.shape_cast %77 : vector<32xf32> to vector<32x1xf32>
    %79 = tpu.reciprocal %78 {approx = true} : vector<32x1xf32> -> vector<32x1xf32>
    %80 = vector.broadcast %79 : vector<32x1xf32> to vector<32x32xf32>
    %81 = arith.mulf %76, %80 : vector<32x32xf32>
    %82 = arith.truncf %81 : vector<32x32xf32> to vector<32x32xbf16>
    %83 = arith.truncf %67 : vector<32x32xf32> to vector<32x32xbf16>
    %cst_55 = arith.constant dense<0.000000e+00> : vector<32x32xf32>
    %84 = tpu.matmul %82, %83, %cst_55 {dimension_numbers = #tpu.dot_dimension_numbers<[1], [0], [0], [1], [0, 0, 1, 1], [], []>} : vector<32x32xbf16>, vector<32x32xbf16>, vector<32x32xf32> -> vector<32x32xf32>
    %85 = arith.truncf %84 : vector<32x32xf32> to vector<32x32xbf16>
    %c1_56 = arith.constant 1 : index
    %c0_57 = arith.constant 0 : index
    %c0_58 = arith.constant 0 : index
    %86 = vector.load %arg8[%c1_56, %c0_57, %c0_58] : memref<8x32x128xbf16, #tpu.memory_space<vmem>>, vector<1x32x128xbf16>
    %87 = vector.shape_cast %86 : vector<1x32x128xbf16> to vector<32x128xbf16>
    %cst_59 = arith.constant dense<0.000000e+00> : vector<32x128xf32>
    %88 = tpu.matmul %85, %87, %cst_59 {dimension_numbers = #tpu.dot_dimension_numbers<[1], [0], [0], [1], [0, 0, 1, 1], [], []>} : vector<32x32xbf16>, vector<32x128xbf16>, vector<32x128xf32> -> vector<32x128xf32>
    %89 = arith.addf %46, %88 : vector<32x128xf32>
    %c2 = arith.constant 2 : index
    %c0_60 = arith.constant 0 : index
    %c0_61 = arith.constant 0 : index
    %90 = vector.load %arg2[%c2, %c0_60, %c0_61] : memref<8x128x32xbf16, #tpu.memory_space<vmem>>, vector<1x128x32xbf16>
    %91 = vector.shape_cast %90 : vector<1x128x32xbf16> to vector<128x32xbf16>
    %cst_62 = arith.constant dense<0.000000e+00> : vector<32x32xf32>
    %92 = tpu.matmul %2, %91, %cst_62 {dimension_numbers = #tpu.dot_dimension_numbers<[1], [0], [0], [1], [0, 0, 1, 1], [], []>} : vector<32x128xbf16>, vector<128x32xbf16>, vector<32x32xf32> -> vector<32x32xf32>
    %c2_63 = arith.constant 2 : index
    %c0_64 = arith.constant 0 : index
    %c0_65 = arith.constant 0 : index
    %93 = vector.load %arg5[%c2_63, %c0_64, %c0_65] : memref<8x1x32xf32, #tpu.memory_space<vmem>>, vector<1x1x32xf32>
    %94 = vector.shape_cast %93 : vector<1x1x32xf32> to vector<1x32xf32>
    %95 = vector.broadcast %94 : vector<1x32xf32> to vector<32x32xf32>
    %96 = arith.addf %92, %95 : vector<32x32xf32>
    %c2_66 = arith.constant 2 : index
    %c0_67 = arith.constant 0 : index
    %c0_68 = arith.constant 0 : index
    %97 = vector.load %arg3[%c2_66, %c0_67, %c0_68] : memref<8x128x32xbf16, #tpu.memory_space<vmem>>, vector<1x128x32xbf16>
    %98 = vector.shape_cast %97 : vector<1x128x32xbf16> to vector<128x32xbf16>
    %cst_69 = arith.constant dense<0.000000e+00> : vector<32x32xf32>
    %99 = tpu.matmul %2, %98, %cst_69 {dimension_numbers = #tpu.dot_dimension_numbers<[1], [0], [0], [1], [0, 0, 1, 1], [], []>} : vector<32x128xbf16>, vector<128x32xbf16>, vector<32x32xf32> -> vector<32x32xf32>
    %c2_70 = arith.constant 2 : index
    %c0_71 = arith.constant 0 : index
    %c0_72 = arith.constant 0 : index
    %100 = vector.load %arg6[%c2_70, %c0_71, %c0_72] : memref<8x1x32xf32, #tpu.memory_space<vmem>>, vector<1x1x32xf32>
    %101 = vector.shape_cast %100 : vector<1x1x32xf32> to vector<1x32xf32>
    %102 = vector.broadcast %101 : vector<1x32xf32> to vector<32x32xf32>
    %103 = arith.addf %99, %102 : vector<32x32xf32>
    %c2_73 = arith.constant 2 : index
    %c0_74 = arith.constant 0 : index
    %c0_75 = arith.constant 0 : index
    %104 = vector.load %arg4[%c2_73, %c0_74, %c0_75] : memref<8x128x32xbf16, #tpu.memory_space<vmem>>, vector<1x128x32xbf16>
    %105 = vector.shape_cast %104 : vector<1x128x32xbf16> to vector<128x32xbf16>
    %cst_76 = arith.constant dense<0.000000e+00> : vector<32x32xf32>
    %106 = tpu.matmul %2, %105, %cst_76 {dimension_numbers = #tpu.dot_dimension_numbers<[1], [0], [0], [1], [0, 0, 1, 1], [], []>} : vector<32x128xbf16>, vector<128x32xbf16>, vector<32x32xf32> -> vector<32x32xf32>
    %c2_77 = arith.constant 2 : index
    %c0_78 = arith.constant 0 : index
    %c0_79 = arith.constant 0 : index
    %107 = vector.load %arg7[%c2_77, %c0_78, %c0_79] : memref<8x1x32xf32, #tpu.memory_space<vmem>>, vector<1x1x32xf32>
    %108 = vector.shape_cast %107 : vector<1x1x32xf32> to vector<1x32xf32>
    %109 = vector.broadcast %108 : vector<1x32xf32> to vector<32x32xf32>
    %110 = arith.addf %106, %109 : vector<32x32xf32>
    %111 = arith.truncf %96 : vector<32x32xf32> to vector<32x32xbf16>
    %112 = arith.truncf %103 : vector<32x32xf32> to vector<32x32xbf16>
    %cst_80 = arith.constant dense<0.000000e+00> : vector<32x32xf32>
    %113 = tpu.matmul %111, %112, %cst_80 {dimension_numbers = #tpu.dot_dimension_numbers<[1], [1], [0], [0], [0, 0, 1, 0], [], []>} : vector<32x32xbf16>, vector<32x32xbf16>, vector<32x32xf32> -> vector<32x32xf32>
    %114 = arith.addf %113, %1 : vector<32x32xf32>
    %cst_81 = arith.constant dense<0xFF800000> : vector<32xf32>
    %115 = vector.multi_reduction <maximumf>, %114, %cst_81 [1] : vector<32x32xf32> to vector<32xf32>
    %116 = vector.shape_cast %115 : vector<32xf32> to vector<32x1xf32>
    %117 = vector.broadcast %116 : vector<32x1xf32> to vector<32x32xf32>
    %118 = arith.subf %114, %117 : vector<32x32xf32>
    %119 = math.exp %118 : vector<32x32xf32>
    %cst_82 = arith.constant dense<0.000000e+00> : vector<32xf32>
    %120 = vector.multi_reduction <add>, %119, %cst_82 [1] : vector<32x32xf32> to vector<32xf32>
    %121 = vector.shape_cast %120 : vector<32xf32> to vector<32x1xf32>
    %122 = tpu.reciprocal %121 {approx = true} : vector<32x1xf32> -> vector<32x1xf32>
    %123 = vector.broadcast %122 : vector<32x1xf32> to vector<32x32xf32>
    %124 = arith.mulf %119, %123 : vector<32x32xf32>
    %125 = arith.truncf %124 : vector<32x32xf32> to vector<32x32xbf16>
    %126 = arith.truncf %110 : vector<32x32xf32> to vector<32x32xbf16>
    %cst_83 = arith.constant dense<0.000000e+00> : vector<32x32xf32>
    %127 = tpu.matmul %125, %126, %cst_83 {dimension_numbers = #tpu.dot_dimension_numbers<[1], [0], [0], [1], [0, 0, 1, 1], [], []>} : vector<32x32xbf16>, vector<32x32xbf16>, vector<32x32xf32> -> vector<32x32xf32>
    %128 = arith.truncf %127 : vector<32x32xf32> to vector<32x32xbf16>
    %c2_84 = arith.constant 2 : index
    %c0_85 = arith.constant 0 : index
    %c0_86 = arith.constant 0 : index
    %129 = vector.load %arg8[%c2_84, %c0_85, %c0_86] : memref<8x32x128xbf16, #tpu.memory_space<vmem>>, vector<1x32x128xbf16>
    %130 = vector.shape_cast %129 : vector<1x32x128xbf16> to vector<32x128xbf16>
    %cst_87 = arith.constant dense<0.000000e+00> : vector<32x128xf32>
    %131 = tpu.matmul %128, %130, %cst_87 {dimension_numbers = #tpu.dot_dimension_numbers<[1], [0], [0], [1], [0, 0, 1, 1], [], []>} : vector<32x32xbf16>, vector<32x128xbf16>, vector<32x128xf32> -> vector<32x128xf32>
    %132 = arith.addf %89, %131 : vector<32x128xf32>
    %c3 = arith.constant 3 : index
    %c0_88 = arith.constant 0 : index
    %c0_89 = arith.constant 0 : index
    %133 = vector.load %arg2[%c3, %c0_88, %c0_89] : memref<8x128x32xbf16, #tpu.memory_space<vmem>>, vector<1x128x32xbf16>
    %134 = vector.shape_cast %133 : vector<1x128x32xbf16> to vector<128x32xbf16>
    %cst_90 = arith.constant dense<0.000000e+00> : vector<32x32xf32>
    %135 = tpu.matmul %2, %134, %cst_90 {dimension_numbers = #tpu.dot_dimension_numbers<[1], [0], [0], [1], [0, 0, 1, 1], [], []>} : vector<32x128xbf16>, vector<128x32xbf16>, vector<32x32xf32> -> vector<32x32xf32>
    %c3_91 = arith.constant 3 : index
    %c0_92 = arith.constant 0 : index
    %c0_93 = arith.constant 0 : index
    %136 = vector.load %arg5[%c3_91, %c0_92, %c0_93] : memref<8x1x32xf32, #tpu.memory_space<vmem>>, vector<1x1x32xf32>
    %137 = vector.shape_cast %136 : vector<1x1x32xf32> to vector<1x32xf32>
    %138 = vector.broadcast %137 : vector<1x32xf32> to vector<32x32xf32>
    %139 = arith.addf %135, %138 : vector<32x32xf32>
    %c3_94 = arith.constant 3 : index
    %c0_95 = arith.constant 0 : index
    %c0_96 = arith.constant 0 : index
    %140 = vector.load %arg3[%c3_94, %c0_95, %c0_96] : memref<8x128x32xbf16, #tpu.memory_space<vmem>>, vector<1x128x32xbf16>
    %141 = vector.shape_cast %140 : vector<1x128x32xbf16> to vector<128x32xbf16>
    %cst_97 = arith.constant dense<0.000000e+00> : vector<32x32xf32>
    %142 = tpu.matmul %2, %141, %cst_97 {dimension_numbers = #tpu.dot_dimension_numbers<[1], [0], [0], [1], [0, 0, 1, 1], [], []>} : vector<32x128xbf16>, vector<128x32xbf16>, vector<32x32xf32> -> vector<32x32xf32>
    %c3_98 = arith.constant 3 : index
    %c0_99 = arith.constant 0 : index
    %c0_100 = arith.constant 0 : index
    %143 = vector.load %arg6[%c3_98, %c0_99, %c0_100] : memref<8x1x32xf32, #tpu.memory_space<vmem>>, vector<1x1x32xf32>
    %144 = vector.shape_cast %143 : vector<1x1x32xf32> to vector<1x32xf32>
    %145 = vector.broadcast %144 : vector<1x32xf32> to vector<32x32xf32>
    %146 = arith.addf %142, %145 : vector<32x32xf32>
    %c3_101 = arith.constant 3 : index
    %c0_102 = arith.constant 0 : index
    %c0_103 = arith.constant 0 : index
    %147 = vector.load %arg4[%c3_101, %c0_102, %c0_103] : memref<8x128x32xbf16, #tpu.memory_space<vmem>>, vector<1x128x32xbf16>
    %148 = vector.shape_cast %147 : vector<1x128x32xbf16> to vector<128x32xbf16>
    %cst_104 = arith.constant dense<0.000000e+00> : vector<32x32xf32>
    %149 = tpu.matmul %2, %148, %cst_104 {dimension_numbers = #tpu.dot_dimension_numbers<[1], [0], [0], [1], [0, 0, 1, 1], [], []>} : vector<32x128xbf16>, vector<128x32xbf16>, vector<32x32xf32> -> vector<32x32xf32>
    %c3_105 = arith.constant 3 : index
    %c0_106 = arith.constant 0 : index
    %c0_107 = arith.constant 0 : index
    %150 = vector.load %arg7[%c3_105, %c0_106, %c0_107] : memref<8x1x32xf32, #tpu.memory_space<vmem>>, vector<1x1x32xf32>
    %151 = vector.shape_cast %150 : vector<1x1x32xf32> to vector<1x32xf32>
    %152 = vector.broadcast %151 : vector<1x32xf32> to vector<32x32xf32>
    %153 = arith.addf %149, %152 : vector<32x32xf32>
    %154 = arith.truncf %139 : vector<32x32xf32> to vector<32x32xbf16>
    %155 = arith.truncf %146 : vector<32x32xf32> to vector<32x32xbf16>
    %cst_108 = arith.constant dense<0.000000e+00> : vector<32x32xf32>
    %156 = tpu.matmul %154, %155, %cst_108 {dimension_numbers = #tpu.dot_dimension_numbers<[1], [1], [0], [0], [0, 0, 1, 0], [], []>} : vector<32x32xbf16>, vector<32x32xbf16>, vector<32x32xf32> -> vector<32x32xf32>
    %157 = arith.addf %156, %1 : vector<32x32xf32>
    %cst_109 = arith.constant dense<0xFF800000> : vector<32xf32>
    %158 = vector.multi_reduction <maximumf>, %157, %cst_109 [1] : vector<32x32xf32> to vector<32xf32>
    %159 = vector.shape_cast %158 : vector<32xf32> to vector<32x1xf32>
    %160 = vector.broadcast %159 : vector<32x1xf32> to vector<32x32xf32>
    %161 = arith.subf %157, %160 : vector<32x32xf32>
    %162 = math.exp %161 : vector<32x32xf32>
    %cst_110 = arith.constant dense<0.000000e+00> : vector<32xf32>
    %163 = vector.multi_reduction <add>, %162, %cst_110 [1] : vector<32x32xf32> to vector<32xf32>
    %164 = vector.shape_cast %163 : vector<32xf32> to vector<32x1xf32>
    %165 = tpu.reciprocal %164 {approx = true} : vector<32x1xf32> -> vector<32x1xf32>
    %166 = vector.broadcast %165 : vector<32x1xf32> to vector<32x32xf32>
    %167 = arith.mulf %162, %166 : vector<32x32xf32>
    %168 = arith.truncf %167 : vector<32x32xf32> to vector<32x32xbf16>
    %169 = arith.truncf %153 : vector<32x32xf32> to vector<32x32xbf16>
    %cst_111 = arith.constant dense<0.000000e+00> : vector<32x32xf32>
    %170 = tpu.matmul %168, %169, %cst_111 {dimension_numbers = #tpu.dot_dimension_numbers<[1], [0], [0], [1], [0, 0, 1, 1], [], []>} : vector<32x32xbf16>, vector<32x32xbf16>, vector<32x32xf32> -> vector<32x32xf32>
    %171 = arith.truncf %170 : vector<32x32xf32> to vector<32x32xbf16>
    %c3_112 = arith.constant 3 : index
    %c0_113 = arith.constant 0 : index
    %c0_114 = arith.constant 0 : index
    %172 = vector.load %arg8[%c3_112, %c0_113, %c0_114] : memref<8x32x128xbf16, #tpu.memory_space<vmem>>, vector<1x32x128xbf16>
    %173 = vector.shape_cast %172 : vector<1x32x128xbf16> to vector<32x128xbf16>
    %cst_115 = arith.constant dense<0.000000e+00> : vector<32x128xf32>
    %174 = tpu.matmul %171, %173, %cst_115 {dimension_numbers = #tpu.dot_dimension_numbers<[1], [0], [0], [1], [0, 0, 1, 1], [], []>} : vector<32x32xbf16>, vector<32x128xbf16>, vector<32x128xf32> -> vector<32x128xf32>
    %175 = arith.addf %132, %174 : vector<32x128xf32>
    %c0_116 = arith.constant 0 : index
    %c0_117 = arith.constant 0 : index
    %c0_118 = arith.constant 0 : index
    %176 = vector.load %arg9[%c0_116, %c0_117, %c0_118] : memref<2x1x128xf32, #tpu.memory_space<vmem>>, vector<1x1x128xf32>
    %177 = vector.shape_cast %176 : vector<1x1x128xf32> to vector<1x128xf32>
    %178 = vector.broadcast %177 : vector<1x128xf32> to vector<32x128xf32>
    %179 = arith.addf %175, %178 : vector<32x128xf32>
    %180 = arith.addf %179, %0 : vector<32x128xf32>
    %c0_119 = arith.constant 0 : index
    %c0_120 = arith.constant 0 : index
    %c0_121 = arith.constant 0 : index
    %181 = vector.load %arg10[%c0_119, %c0_120, %c0_121] : memref<2x1x128xf32, #tpu.memory_space<vmem>>, vector<1x1x128xf32>
    %182 = vector.shape_cast %181 : vector<1x1x128xf32> to vector<1x128xf32>
    %c0_122 = arith.constant 0 : index
    %c0_123 = arith.constant 0 : index
    %c0_124 = arith.constant 0 : index
    %183 = vector.load %arg11[%c0_122, %c0_123, %c0_124] : memref<2x1x128xf32, #tpu.memory_space<vmem>>, vector<1x1x128xf32>
    %184 = vector.shape_cast %183 : vector<1x1x128xf32> to vector<1x128xf32>
    %cst_125 = arith.constant dense<0.000000e+00> : vector<32xf32>
    %185 = vector.multi_reduction <add>, %180, %cst_125 [1] : vector<32x128xf32> to vector<32xf32>
    %186 = vector.shape_cast %185 : vector<32xf32> to vector<32x1xf32>
    %cst_126 = arith.constant 1.280000e+02 : f32
    %187 = vector.broadcast %cst_126 : f32 to vector<32x1xf32>
    %188 = arith.divf %186, %187 : vector<32x1xf32>
    %189 = vector.broadcast %188 : vector<32x1xf32> to vector<32x128xf32>
    %190 = arith.subf %180, %189 : vector<32x128xf32>
    %191 = arith.mulf %190, %190 : vector<32x128xf32>
    %cst_127 = arith.constant dense<0.000000e+00> : vector<32xf32>
    %192 = vector.multi_reduction <add>, %191, %cst_127 [1] : vector<32x128xf32> to vector<32xf32>
    %193 = vector.shape_cast %192 : vector<32xf32> to vector<32x1xf32>
    %cst_128 = arith.constant 1.280000e+02 : f32
    %194 = vector.broadcast %cst_128 : f32 to vector<32x1xf32>
    %195 = arith.divf %193, %194 : vector<32x1xf32>
    %196 = vector.broadcast %188 : vector<32x1xf32> to vector<32x128xf32>
    %197 = arith.subf %180, %196 : vector<32x128xf32>
    %cst_129 = arith.constant 9.99999996E-13 : f32
    %198 = vector.broadcast %cst_129 : f32 to vector<32x1xf32>
    %199 = arith.addf %195, %198 : vector<32x1xf32>
    %200 = math.rsqrt %199 : vector<32x1xf32>
    %201 = vector.broadcast %200 : vector<32x1xf32> to vector<32x128xf32>
    %202 = arith.mulf %197, %201 : vector<32x128xf32>
    %203 = vector.broadcast %182 : vector<1x128xf32> to vector<32x128xf32>
    %204 = arith.mulf %202, %203 : vector<32x128xf32>
    %205 = vector.broadcast %184 : vector<1x128xf32> to vector<32x128xf32>
    %206 = arith.addf %204, %205 : vector<32x128xf32>
    %207 = arith.truncf %206 : vector<32x128xf32> to vector<32x128xbf16>
    %c0_130 = arith.constant 0 : index
    %c0_131 = arith.constant 0 : index
    %c0_132 = arith.constant 0 : index
    %208 = vector.load %arg12[%c0_130, %c0_131, %c0_132] : memref<2x128x512xbf16, #tpu.memory_space<vmem>>, vector<1x128x512xbf16>
    %209 = vector.shape_cast %208 : vector<1x128x512xbf16> to vector<128x512xbf16>
    %cst_133 = arith.constant dense<0.000000e+00> : vector<32x512xf32>
    %210 = tpu.matmul %207, %209, %cst_133 {dimension_numbers = #tpu.dot_dimension_numbers<[1], [0], [0], [1], [0, 0, 1, 1], [], []>} : vector<32x128xbf16>, vector<128x512xbf16>, vector<32x512xf32> -> vector<32x512xf32>
    %c0_134 = arith.constant 0 : index
    %c0_135 = arith.constant 0 : index
    %c0_136 = arith.constant 0 : index
    %211 = vector.load %arg13[%c0_134, %c0_135, %c0_136] : memref<2x1x512xf32, #tpu.memory_space<vmem>>, vector<1x1x512xf32>
    %212 = vector.shape_cast %211 : vector<1x1x512xf32> to vector<1x512xf32>
    %213 = vector.broadcast %212 : vector<1x512xf32> to vector<32x512xf32>
    %214 = arith.addf %210, %213 : vector<32x512xf32>
    %cst_137 = arith.constant 5.000000e-01 : f32
    %215 = vector.broadcast %cst_137 : f32 to vector<32x512xf32>
    %216 = arith.mulf %215, %214 : vector<32x512xf32>
    %cst_138 = arith.constant 4.471500e-02 : f32
    %217 = vector.broadcast %cst_138 : f32 to vector<32x512xf32>
    %218 = arith.mulf %217, %214 : vector<32x512xf32>
    %219 = arith.mulf %218, %214 : vector<32x512xf32>
    %220 = arith.mulf %219, %214 : vector<32x512xf32>
    %221 = arith.addf %214, %220 : vector<32x512xf32>
    %cst_139 = arith.constant 0.797884583 : f32
    %222 = vector.broadcast %cst_139 : f32 to vector<32x512xf32>
    %223 = arith.mulf %222, %221 : vector<32x512xf32>
    %224 = math.tanh %223 : vector<32x512xf32>
    %cst_140 = arith.constant 1.000000e+00 : f32
    %225 = vector.broadcast %cst_140 : f32 to vector<32x512xf32>
    %226 = arith.addf %225, %224 : vector<32x512xf32>
    %227 = arith.mulf %216, %226 : vector<32x512xf32>
    %228 = arith.truncf %227 : vector<32x512xf32> to vector<32x512xbf16>
    %c0_141 = arith.constant 0 : index
    %c0_142 = arith.constant 0 : index
    %c0_143 = arith.constant 0 : index
    %229 = vector.load %arg14[%c0_141, %c0_142, %c0_143] : memref<2x512x128xbf16, #tpu.memory_space<vmem>>, vector<1x512x128xbf16>
    %230 = vector.shape_cast %229 : vector<1x512x128xbf16> to vector<512x128xbf16>
    %cst_144 = arith.constant dense<0.000000e+00> : vector<32x128xf32>
    %231 = tpu.matmul %228, %230, %cst_144 {dimension_numbers = #tpu.dot_dimension_numbers<[1], [0], [0], [1], [0, 0, 1, 1], [], []>} : vector<32x512xbf16>, vector<512x128xbf16>, vector<32x128xf32> -> vector<32x128xf32>
    %c0_145 = arith.constant 0 : index
    %c0_146 = arith.constant 0 : index
    %c0_147 = arith.constant 0 : index
    %232 = vector.load %arg15[%c0_145, %c0_146, %c0_147] : memref<2x1x128xf32, #tpu.memory_space<vmem>>, vector<1x1x128xf32>
    %233 = vector.shape_cast %232 : vector<1x1x128xf32> to vector<1x128xf32>
    %234 = vector.broadcast %233 : vector<1x128xf32> to vector<32x128xf32>
    %235 = arith.addf %231, %234 : vector<32x128xf32>
    %236 = arith.addf %235, %206 : vector<32x128xf32>
    %c0_148 = arith.constant 0 : index
    %c0_149 = arith.constant 0 : index
    %c0_150 = arith.constant 0 : index
    %237 = vector.load %arg16[%c0_148, %c0_149, %c0_150] : memref<2x1x128xf32, #tpu.memory_space<vmem>>, vector<1x1x128xf32>
    %238 = vector.shape_cast %237 : vector<1x1x128xf32> to vector<1x128xf32>
    %c0_151 = arith.constant 0 : index
    %c0_152 = arith.constant 0 : index
    %c0_153 = arith.constant 0 : index
    %239 = vector.load %arg17[%c0_151, %c0_152, %c0_153] : memref<2x1x128xf32, #tpu.memory_space<vmem>>, vector<1x1x128xf32>
    %240 = vector.shape_cast %239 : vector<1x1x128xf32> to vector<1x128xf32>
    %cst_154 = arith.constant dense<0.000000e+00> : vector<32xf32>
    %241 = vector.multi_reduction <add>, %236, %cst_154 [1] : vector<32x128xf32> to vector<32xf32>
    %242 = vector.shape_cast %241 : vector<32xf32> to vector<32x1xf32>
    %cst_155 = arith.constant 1.280000e+02 : f32
    %243 = vector.broadcast %cst_155 : f32 to vector<32x1xf32>
    %244 = arith.divf %242, %243 : vector<32x1xf32>
    %245 = vector.broadcast %244 : vector<32x1xf32> to vector<32x128xf32>
    %246 = arith.subf %236, %245 : vector<32x128xf32>
    %247 = arith.mulf %246, %246 : vector<32x128xf32>
    %cst_156 = arith.constant dense<0.000000e+00> : vector<32xf32>
    %248 = vector.multi_reduction <add>, %247, %cst_156 [1] : vector<32x128xf32> to vector<32xf32>
    %249 = vector.shape_cast %248 : vector<32xf32> to vector<32x1xf32>
    %cst_157 = arith.constant 1.280000e+02 : f32
    %250 = vector.broadcast %cst_157 : f32 to vector<32x1xf32>
    %251 = arith.divf %249, %250 : vector<32x1xf32>
    %252 = vector.broadcast %244 : vector<32x1xf32> to vector<32x128xf32>
    %253 = arith.subf %236, %252 : vector<32x128xf32>
    %cst_158 = arith.constant 9.99999996E-13 : f32
    %254 = vector.broadcast %cst_158 : f32 to vector<32x1xf32>
    %255 = arith.addf %251, %254 : vector<32x1xf32>
    %256 = math.rsqrt %255 : vector<32x1xf32>
    %257 = vector.broadcast %256 : vector<32x1xf32> to vector<32x128xf32>
    %258 = arith.mulf %253, %257 : vector<32x128xf32>
    %259 = vector.broadcast %238 : vector<1x128xf32> to vector<32x128xf32>
    %260 = arith.mulf %258, %259 : vector<32x128xf32>
    %261 = vector.broadcast %240 : vector<1x128xf32> to vector<32x128xf32>
    %262 = arith.addf %260, %261 : vector<32x128xf32>
    %263 = arith.truncf %262 : vector<32x128xf32> to vector<32x128xbf16>
    %cst_159 = arith.constant 0.000000e+00 : f32
    %264 = vector.broadcast %cst_159 : f32 to vector<32x128xf32>
    %c4 = arith.constant 4 : index
    %c0_160 = arith.constant 0 : index
    %c0_161 = arith.constant 0 : index
    %265 = vector.load %arg2[%c4, %c0_160, %c0_161] : memref<8x128x32xbf16, #tpu.memory_space<vmem>>, vector<1x128x32xbf16>
    %266 = vector.shape_cast %265 : vector<1x128x32xbf16> to vector<128x32xbf16>
    %cst_162 = arith.constant dense<0.000000e+00> : vector<32x32xf32>
    %267 = tpu.matmul %263, %266, %cst_162 {dimension_numbers = #tpu.dot_dimension_numbers<[1], [0], [0], [1], [0, 0, 1, 1], [], []>} : vector<32x128xbf16>, vector<128x32xbf16>, vector<32x32xf32> -> vector<32x32xf32>
    %c4_163 = arith.constant 4 : index
    %c0_164 = arith.constant 0 : index
    %c0_165 = arith.constant 0 : index
    %268 = vector.load %arg5[%c4_163, %c0_164, %c0_165] : memref<8x1x32xf32, #tpu.memory_space<vmem>>, vector<1x1x32xf32>
    %269 = vector.shape_cast %268 : vector<1x1x32xf32> to vector<1x32xf32>
    %270 = vector.broadcast %269 : vector<1x32xf32> to vector<32x32xf32>
    %271 = arith.addf %267, %270 : vector<32x32xf32>
    %c4_166 = arith.constant 4 : index
    %c0_167 = arith.constant 0 : index
    %c0_168 = arith.constant 0 : index
    %272 = vector.load %arg3[%c4_166, %c0_167, %c0_168] : memref<8x128x32xbf16, #tpu.memory_space<vmem>>, vector<1x128x32xbf16>
    %273 = vector.shape_cast %272 : vector<1x128x32xbf16> to vector<128x32xbf16>
    %cst_169 = arith.constant dense<0.000000e+00> : vector<32x32xf32>
    %274 = tpu.matmul %263, %273, %cst_169 {dimension_numbers = #tpu.dot_dimension_numbers<[1], [0], [0], [1], [0, 0, 1, 1], [], []>} : vector<32x128xbf16>, vector<128x32xbf16>, vector<32x32xf32> -> vector<32x32xf32>
    %c4_170 = arith.constant 4 : index
    %c0_171 = arith.constant 0 : index
    %c0_172 = arith.constant 0 : index
    %275 = vector.load %arg6[%c4_170, %c0_171, %c0_172] : memref<8x1x32xf32, #tpu.memory_space<vmem>>, vector<1x1x32xf32>
    %276 = vector.shape_cast %275 : vector<1x1x32xf32> to vector<1x32xf32>
    %277 = vector.broadcast %276 : vector<1x32xf32> to vector<32x32xf32>
    %278 = arith.addf %274, %277 : vector<32x32xf32>
    %c4_173 = arith.constant 4 : index
    %c0_174 = arith.constant 0 : index
    %c0_175 = arith.constant 0 : index
    %279 = vector.load %arg4[%c4_173, %c0_174, %c0_175] : memref<8x128x32xbf16, #tpu.memory_space<vmem>>, vector<1x128x32xbf16>
    %280 = vector.shape_cast %279 : vector<1x128x32xbf16> to vector<128x32xbf16>
    %cst_176 = arith.constant dense<0.000000e+00> : vector<32x32xf32>
    %281 = tpu.matmul %263, %280, %cst_176 {dimension_numbers = #tpu.dot_dimension_numbers<[1], [0], [0], [1], [0, 0, 1, 1], [], []>} : vector<32x128xbf16>, vector<128x32xbf16>, vector<32x32xf32> -> vector<32x32xf32>
    %c4_177 = arith.constant 4 : index
    %c0_178 = arith.constant 0 : index
    %c0_179 = arith.constant 0 : index
    %282 = vector.load %arg7[%c4_177, %c0_178, %c0_179] : memref<8x1x32xf32, #tpu.memory_space<vmem>>, vector<1x1x32xf32>
    %283 = vector.shape_cast %282 : vector<1x1x32xf32> to vector<1x32xf32>
    %284 = vector.broadcast %283 : vector<1x32xf32> to vector<32x32xf32>
    %285 = arith.addf %281, %284 : vector<32x32xf32>
    %286 = arith.truncf %271 : vector<32x32xf32> to vector<32x32xbf16>
    %287 = arith.truncf %278 : vector<32x32xf32> to vector<32x32xbf16>
    %cst_180 = arith.constant dense<0.000000e+00> : vector<32x32xf32>
    %288 = tpu.matmul %286, %287, %cst_180 {dimension_numbers = #tpu.dot_dimension_numbers<[1], [1], [0], [0], [0, 0, 1, 0], [], []>} : vector<32x32xbf16>, vector<32x32xbf16>, vector<32x32xf32> -> vector<32x32xf32>
    %289 = arith.addf %288, %1 : vector<32x32xf32>
    %cst_181 = arith.constant dense<0xFF800000> : vector<32xf32>
    %290 = vector.multi_reduction <maximumf>, %289, %cst_181 [1] : vector<32x32xf32> to vector<32xf32>
    %291 = vector.shape_cast %290 : vector<32xf32> to vector<32x1xf32>
    %292 = vector.broadcast %291 : vector<32x1xf32> to vector<32x32xf32>
    %293 = arith.subf %289, %292 : vector<32x32xf32>
    %294 = math.exp %293 : vector<32x32xf32>
    %cst_182 = arith.constant dense<0.000000e+00> : vector<32xf32>
    %295 = vector.multi_reduction <add>, %294, %cst_182 [1] : vector<32x32xf32> to vector<32xf32>
    %296 = vector.shape_cast %295 : vector<32xf32> to vector<32x1xf32>
    %297 = tpu.reciprocal %296 {approx = true} : vector<32x1xf32> -> vector<32x1xf32>
    %298 = vector.broadcast %297 : vector<32x1xf32> to vector<32x32xf32>
    %299 = arith.mulf %294, %298 : vector<32x32xf32>
    %300 = arith.truncf %299 : vector<32x32xf32> to vector<32x32xbf16>
    %301 = arith.truncf %285 : vector<32x32xf32> to vector<32x32xbf16>
    %cst_183 = arith.constant dense<0.000000e+00> : vector<32x32xf32>
    %302 = tpu.matmul %300, %301, %cst_183 {dimension_numbers = #tpu.dot_dimension_numbers<[1], [0], [0], [1], [0, 0, 1, 1], [], []>} : vector<32x32xbf16>, vector<32x32xbf16>, vector<32x32xf32> -> vector<32x32xf32>
    %303 = arith.truncf %302 : vector<32x32xf32> to vector<32x32xbf16>
    %c4_184 = arith.constant 4 : index
    %c0_185 = arith.constant 0 : index
    %c0_186 = arith.constant 0 : index
    %304 = vector.load %arg8[%c4_184, %c0_185, %c0_186] : memref<8x32x128xbf16, #tpu.memory_space<vmem>>, vector<1x32x128xbf16>
    %305 = vector.shape_cast %304 : vector<1x32x128xbf16> to vector<32x128xbf16>
    %cst_187 = arith.constant dense<0.000000e+00> : vector<32x128xf32>
    %306 = tpu.matmul %303, %305, %cst_187 {dimension_numbers = #tpu.dot_dimension_numbers<[1], [0], [0], [1], [0, 0, 1, 1], [], []>} : vector<32x32xbf16>, vector<32x128xbf16>, vector<32x128xf32> -> vector<32x128xf32>
    %307 = arith.addf %264, %306 : vector<32x128xf32>
    %c5 = arith.constant 5 : index
    %c0_188 = arith.constant 0 : index
    %c0_189 = arith.constant 0 : index
    %308 = vector.load %arg2[%c5, %c0_188, %c0_189] : memref<8x128x32xbf16, #tpu.memory_space<vmem>>, vector<1x128x32xbf16>
    %309 = vector.shape_cast %308 : vector<1x128x32xbf16> to vector<128x32xbf16>
    %cst_190 = arith.constant dense<0.000000e+00> : vector<32x32xf32>
    %310 = tpu.matmul %263, %309, %cst_190 {dimension_numbers = #tpu.dot_dimension_numbers<[1], [0], [0], [1], [0, 0, 1, 1], [], []>} : vector<32x128xbf16>, vector<128x32xbf16>, vector<32x32xf32> -> vector<32x32xf32>
    %c5_191 = arith.constant 5 : index
    %c0_192 = arith.constant 0 : index
    %c0_193 = arith.constant 0 : index
    %311 = vector.load %arg5[%c5_191, %c0_192, %c0_193] : memref<8x1x32xf32, #tpu.memory_space<vmem>>, vector<1x1x32xf32>
    %312 = vector.shape_cast %311 : vector<1x1x32xf32> to vector<1x32xf32>
    %313 = vector.broadcast %312 : vector<1x32xf32> to vector<32x32xf32>
    %314 = arith.addf %310, %313 : vector<32x32xf32>
    %c5_194 = arith.constant 5 : index
    %c0_195 = arith.constant 0 : index
    %c0_196 = arith.constant 0 : index
    %315 = vector.load %arg3[%c5_194, %c0_195, %c0_196] : memref<8x128x32xbf16, #tpu.memory_space<vmem>>, vector<1x128x32xbf16>
    %316 = vector.shape_cast %315 : vector<1x128x32xbf16> to vector<128x32xbf16>
    %cst_197 = arith.constant dense<0.000000e+00> : vector<32x32xf32>
    %317 = tpu.matmul %263, %316, %cst_197 {dimension_numbers = #tpu.dot_dimension_numbers<[1], [0], [0], [1], [0, 0, 1, 1], [], []>} : vector<32x128xbf16>, vector<128x32xbf16>, vector<32x32xf32> -> vector<32x32xf32>
    %c5_198 = arith.constant 5 : index
    %c0_199 = arith.constant 0 : index
    %c0_200 = arith.constant 0 : index
    %318 = vector.load %arg6[%c5_198, %c0_199, %c0_200] : memref<8x1x32xf32, #tpu.memory_space<vmem>>, vector<1x1x32xf32>
    %319 = vector.shape_cast %318 : vector<1x1x32xf32> to vector<1x32xf32>
    %320 = vector.broadcast %319 : vector<1x32xf32> to vector<32x32xf32>
    %321 = arith.addf %317, %320 : vector<32x32xf32>
    %c5_201 = arith.constant 5 : index
    %c0_202 = arith.constant 0 : index
    %c0_203 = arith.constant 0 : index
    %322 = vector.load %arg4[%c5_201, %c0_202, %c0_203] : memref<8x128x32xbf16, #tpu.memory_space<vmem>>, vector<1x128x32xbf16>
    %323 = vector.shape_cast %322 : vector<1x128x32xbf16> to vector<128x32xbf16>
    %cst_204 = arith.constant dense<0.000000e+00> : vector<32x32xf32>
    %324 = tpu.matmul %263, %323, %cst_204 {dimension_numbers = #tpu.dot_dimension_numbers<[1], [0], [0], [1], [0, 0, 1, 1], [], []>} : vector<32x128xbf16>, vector<128x32xbf16>, vector<32x32xf32> -> vector<32x32xf32>
    %c5_205 = arith.constant 5 : index
    %c0_206 = arith.constant 0 : index
    %c0_207 = arith.constant 0 : index
    %325 = vector.load %arg7[%c5_205, %c0_206, %c0_207] : memref<8x1x32xf32, #tpu.memory_space<vmem>>, vector<1x1x32xf32>
    %326 = vector.shape_cast %325 : vector<1x1x32xf32> to vector<1x32xf32>
    %327 = vector.broadcast %326 : vector<1x32xf32> to vector<32x32xf32>
    %328 = arith.addf %324, %327 : vector<32x32xf32>
    %329 = arith.truncf %314 : vector<32x32xf32> to vector<32x32xbf16>
    %330 = arith.truncf %321 : vector<32x32xf32> to vector<32x32xbf16>
    %cst_208 = arith.constant dense<0.000000e+00> : vector<32x32xf32>
    %331 = tpu.matmul %329, %330, %cst_208 {dimension_numbers = #tpu.dot_dimension_numbers<[1], [1], [0], [0], [0, 0, 1, 0], [], []>} : vector<32x32xbf16>, vector<32x32xbf16>, vector<32x32xf32> -> vector<32x32xf32>
    %332 = arith.addf %331, %1 : vector<32x32xf32>
    %cst_209 = arith.constant dense<0xFF800000> : vector<32xf32>
    %333 = vector.multi_reduction <maximumf>, %332, %cst_209 [1] : vector<32x32xf32> to vector<32xf32>
    %334 = vector.shape_cast %333 : vector<32xf32> to vector<32x1xf32>
    %335 = vector.broadcast %334 : vector<32x1xf32> to vector<32x32xf32>
    %336 = arith.subf %332, %335 : vector<32x32xf32>
    %337 = math.exp %336 : vector<32x32xf32>
    %cst_210 = arith.constant dense<0.000000e+00> : vector<32xf32>
    %338 = vector.multi_reduction <add>, %337, %cst_210 [1] : vector<32x32xf32> to vector<32xf32>
    %339 = vector.shape_cast %338 : vector<32xf32> to vector<32x1xf32>
    %340 = tpu.reciprocal %339 {approx = true} : vector<32x1xf32> -> vector<32x1xf32>
    %341 = vector.broadcast %340 : vector<32x1xf32> to vector<32x32xf32>
    %342 = arith.mulf %337, %341 : vector<32x32xf32>
    %343 = arith.truncf %342 : vector<32x32xf32> to vector<32x32xbf16>
    %344 = arith.truncf %328 : vector<32x32xf32> to vector<32x32xbf16>
    %cst_211 = arith.constant dense<0.000000e+00> : vector<32x32xf32>
    %345 = tpu.matmul %343, %344, %cst_211 {dimension_numbers = #tpu.dot_dimension_numbers<[1], [0], [0], [1], [0, 0, 1, 1], [], []>} : vector<32x32xbf16>, vector<32x32xbf16>, vector<32x32xf32> -> vector<32x32xf32>
    %346 = arith.truncf %345 : vector<32x32xf32> to vector<32x32xbf16>
    %c5_212 = arith.constant 5 : index
    %c0_213 = arith.constant 0 : index
    %c0_214 = arith.constant 0 : index
    %347 = vector.load %arg8[%c5_212, %c0_213, %c0_214] : memref<8x32x128xbf16, #tpu.memory_space<vmem>>, vector<1x32x128xbf16>
    %348 = vector.shape_cast %347 : vector<1x32x128xbf16> to vector<32x128xbf16>
    %cst_215 = arith.constant dense<0.000000e+00> : vector<32x128xf32>
    %349 = tpu.matmul %346, %348, %cst_215 {dimension_numbers = #tpu.dot_dimension_numbers<[1], [0], [0], [1], [0, 0, 1, 1], [], []>} : vector<32x32xbf16>, vector<32x128xbf16>, vector<32x128xf32> -> vector<32x128xf32>
    %350 = arith.addf %307, %349 : vector<32x128xf32>
    %c6 = arith.constant 6 : index
    %c0_216 = arith.constant 0 : index
    %c0_217 = arith.constant 0 : index
    %351 = vector.load %arg2[%c6, %c0_216, %c0_217] : memref<8x128x32xbf16, #tpu.memory_space<vmem>>, vector<1x128x32xbf16>
    %352 = vector.shape_cast %351 : vector<1x128x32xbf16> to vector<128x32xbf16>
    %cst_218 = arith.constant dense<0.000000e+00> : vector<32x32xf32>
    %353 = tpu.matmul %263, %352, %cst_218 {dimension_numbers = #tpu.dot_dimension_numbers<[1], [0], [0], [1], [0, 0, 1, 1], [], []>} : vector<32x128xbf16>, vector<128x32xbf16>, vector<32x32xf32> -> vector<32x32xf32>
    %c6_219 = arith.constant 6 : index
    %c0_220 = arith.constant 0 : index
    %c0_221 = arith.constant 0 : index
    %354 = vector.load %arg5[%c6_219, %c0_220, %c0_221] : memref<8x1x32xf32, #tpu.memory_space<vmem>>, vector<1x1x32xf32>
    %355 = vector.shape_cast %354 : vector<1x1x32xf32> to vector<1x32xf32>
    %356 = vector.broadcast %355 : vector<1x32xf32> to vector<32x32xf32>
    %357 = arith.addf %353, %356 : vector<32x32xf32>
    %c6_222 = arith.constant 6 : index
    %c0_223 = arith.constant 0 : index
    %c0_224 = arith.constant 0 : index
    %358 = vector.load %arg3[%c6_222, %c0_223, %c0_224] : memref<8x128x32xbf16, #tpu.memory_space<vmem>>, vector<1x128x32xbf16>
    %359 = vector.shape_cast %358 : vector<1x128x32xbf16> to vector<128x32xbf16>
    %cst_225 = arith.constant dense<0.000000e+00> : vector<32x32xf32>
    %360 = tpu.matmul %263, %359, %cst_225 {dimension_numbers = #tpu.dot_dimension_numbers<[1], [0], [0], [1], [0, 0, 1, 1], [], []>} : vector<32x128xbf16>, vector<128x32xbf16>, vector<32x32xf32> -> vector<32x32xf32>
    %c6_226 = arith.constant 6 : index
    %c0_227 = arith.constant 0 : index
    %c0_228 = arith.constant 0 : index
    %361 = vector.load %arg6[%c6_226, %c0_227, %c0_228] : memref<8x1x32xf32, #tpu.memory_space<vmem>>, vector<1x1x32xf32>
    %362 = vector.shape_cast %361 : vector<1x1x32xf32> to vector<1x32xf32>
    %363 = vector.broadcast %362 : vector<1x32xf32> to vector<32x32xf32>
    %364 = arith.addf %360, %363 : vector<32x32xf32>
    %c6_229 = arith.constant 6 : index
    %c0_230 = arith.constant 0 : index
    %c0_231 = arith.constant 0 : index
    %365 = vector.load %arg4[%c6_229, %c0_230, %c0_231] : memref<8x128x32xbf16, #tpu.memory_space<vmem>>, vector<1x128x32xbf16>
    %366 = vector.shape_cast %365 : vector<1x128x32xbf16> to vector<128x32xbf16>
    %cst_232 = arith.constant dense<0.000000e+00> : vector<32x32xf32>
    %367 = tpu.matmul %263, %366, %cst_232 {dimension_numbers = #tpu.dot_dimension_numbers<[1], [0], [0], [1], [0, 0, 1, 1], [], []>} : vector<32x128xbf16>, vector<128x32xbf16>, vector<32x32xf32> -> vector<32x32xf32>
    %c6_233 = arith.constant 6 : index
    %c0_234 = arith.constant 0 : index
    %c0_235 = arith.constant 0 : index
    %368 = vector.load %arg7[%c6_233, %c0_234, %c0_235] : memref<8x1x32xf32, #tpu.memory_space<vmem>>, vector<1x1x32xf32>
    %369 = vector.shape_cast %368 : vector<1x1x32xf32> to vector<1x32xf32>
    %370 = vector.broadcast %369 : vector<1x32xf32> to vector<32x32xf32>
    %371 = arith.addf %367, %370 : vector<32x32xf32>
    %372 = arith.truncf %357 : vector<32x32xf32> to vector<32x32xbf16>
    %373 = arith.truncf %364 : vector<32x32xf32> to vector<32x32xbf16>
    %cst_236 = arith.constant dense<0.000000e+00> : vector<32x32xf32>
    %374 = tpu.matmul %372, %373, %cst_236 {dimension_numbers = #tpu.dot_dimension_numbers<[1], [1], [0], [0], [0, 0, 1, 0], [], []>} : vector<32x32xbf16>, vector<32x32xbf16>, vector<32x32xf32> -> vector<32x32xf32>
    %375 = arith.addf %374, %1 : vector<32x32xf32>
    %cst_237 = arith.constant dense<0xFF800000> : vector<32xf32>
    %376 = vector.multi_reduction <maximumf>, %375, %cst_237 [1] : vector<32x32xf32> to vector<32xf32>
    %377 = vector.shape_cast %376 : vector<32xf32> to vector<32x1xf32>
    %378 = vector.broadcast %377 : vector<32x1xf32> to vector<32x32xf32>
    %379 = arith.subf %375, %378 : vector<32x32xf32>
    %380 = math.exp %379 : vector<32x32xf32>
    %cst_238 = arith.constant dense<0.000000e+00> : vector<32xf32>
    %381 = vector.multi_reduction <add>, %380, %cst_238 [1] : vector<32x32xf32> to vector<32xf32>
    %382 = vector.shape_cast %381 : vector<32xf32> to vector<32x1xf32>
    %383 = tpu.reciprocal %382 {approx = true} : vector<32x1xf32> -> vector<32x1xf32>
    %384 = vector.broadcast %383 : vector<32x1xf32> to vector<32x32xf32>
    %385 = arith.mulf %380, %384 : vector<32x32xf32>
    %386 = arith.truncf %385 : vector<32x32xf32> to vector<32x32xbf16>
    %387 = arith.truncf %371 : vector<32x32xf32> to vector<32x32xbf16>
    %cst_239 = arith.constant dense<0.000000e+00> : vector<32x32xf32>
    %388 = tpu.matmul %386, %387, %cst_239 {dimension_numbers = #tpu.dot_dimension_numbers<[1], [0], [0], [1], [0, 0, 1, 1], [], []>} : vector<32x32xbf16>, vector<32x32xbf16>, vector<32x32xf32> -> vector<32x32xf32>
    %389 = arith.truncf %388 : vector<32x32xf32> to vector<32x32xbf16>
    %c6_240 = arith.constant 6 : index
    %c0_241 = arith.constant 0 : index
    %c0_242 = arith.constant 0 : index
    %390 = vector.load %arg8[%c6_240, %c0_241, %c0_242] : memref<8x32x128xbf16, #tpu.memory_space<vmem>>, vector<1x32x128xbf16>
    %391 = vector.shape_cast %390 : vector<1x32x128xbf16> to vector<32x128xbf16>
    %cst_243 = arith.constant dense<0.000000e+00> : vector<32x128xf32>
    %392 = tpu.matmul %389, %391, %cst_243 {dimension_numbers = #tpu.dot_dimension_numbers<[1], [0], [0], [1], [0, 0, 1, 1], [], []>} : vector<32x32xbf16>, vector<32x128xbf16>, vector<32x128xf32> -> vector<32x128xf32>
    %393 = arith.addf %350, %392 : vector<32x128xf32>
    %c7 = arith.constant 7 : index
    %c0_244 = arith.constant 0 : index
    %c0_245 = arith.constant 0 : index
    %394 = vector.load %arg2[%c7, %c0_244, %c0_245] : memref<8x128x32xbf16, #tpu.memory_space<vmem>>, vector<1x128x32xbf16>
    %395 = vector.shape_cast %394 : vector<1x128x32xbf16> to vector<128x32xbf16>
    %cst_246 = arith.constant dense<0.000000e+00> : vector<32x32xf32>
    %396 = tpu.matmul %263, %395, %cst_246 {dimension_numbers = #tpu.dot_dimension_numbers<[1], [0], [0], [1], [0, 0, 1, 1], [], []>} : vector<32x128xbf16>, vector<128x32xbf16>, vector<32x32xf32> -> vector<32x32xf32>
    %c7_247 = arith.constant 7 : index
    %c0_248 = arith.constant 0 : index
    %c0_249 = arith.constant 0 : index
    %397 = vector.load %arg5[%c7_247, %c0_248, %c0_249] : memref<8x1x32xf32, #tpu.memory_space<vmem>>, vector<1x1x32xf32>
    %398 = vector.shape_cast %397 : vector<1x1x32xf32> to vector<1x32xf32>
    %399 = vector.broadcast %398 : vector<1x32xf32> to vector<32x32xf32>
    %400 = arith.addf %396, %399 : vector<32x32xf32>
    %c7_250 = arith.constant 7 : index
    %c0_251 = arith.constant 0 : index
    %c0_252 = arith.constant 0 : index
    %401 = vector.load %arg3[%c7_250, %c0_251, %c0_252] : memref<8x128x32xbf16, #tpu.memory_space<vmem>>, vector<1x128x32xbf16>
    %402 = vector.shape_cast %401 : vector<1x128x32xbf16> to vector<128x32xbf16>
    %cst_253 = arith.constant dense<0.000000e+00> : vector<32x32xf32>
    %403 = tpu.matmul %263, %402, %cst_253 {dimension_numbers = #tpu.dot_dimension_numbers<[1], [0], [0], [1], [0, 0, 1, 1], [], []>} : vector<32x128xbf16>, vector<128x32xbf16>, vector<32x32xf32> -> vector<32x32xf32>
    %c7_254 = arith.constant 7 : index
    %c0_255 = arith.constant 0 : index
    %c0_256 = arith.constant 0 : index
    %404 = vector.load %arg6[%c7_254, %c0_255, %c0_256] : memref<8x1x32xf32, #tpu.memory_space<vmem>>, vector<1x1x32xf32>
    %405 = vector.shape_cast %404 : vector<1x1x32xf32> to vector<1x32xf32>
    %406 = vector.broadcast %405 : vector<1x32xf32> to vector<32x32xf32>
    %407 = arith.addf %403, %406 : vector<32x32xf32>
    %c7_257 = arith.constant 7 : index
    %c0_258 = arith.constant 0 : index
    %c0_259 = arith.constant 0 : index
    %408 = vector.load %arg4[%c7_257, %c0_258, %c0_259] : memref<8x128x32xbf16, #tpu.memory_space<vmem>>, vector<1x128x32xbf16>
    %409 = vector.shape_cast %408 : vector<1x128x32xbf16> to vector<128x32xbf16>
    %cst_260 = arith.constant dense<0.000000e+00> : vector<32x32xf32>
    %410 = tpu.matmul %263, %409, %cst_260 {dimension_numbers = #tpu.dot_dimension_numbers<[1], [0], [0], [1], [0, 0, 1, 1], [], []>} : vector<32x128xbf16>, vector<128x32xbf16>, vector<32x32xf32> -> vector<32x32xf32>
    %c7_261 = arith.constant 7 : index
    %c0_262 = arith.constant 0 : index
    %c0_263 = arith.constant 0 : index
    %411 = vector.load %arg7[%c7_261, %c0_262, %c0_263] : memref<8x1x32xf32, #tpu.memory_space<vmem>>, vector<1x1x32xf32>
    %412 = vector.shape_cast %411 : vector<1x1x32xf32> to vector<1x32xf32>
    %413 = vector.broadcast %412 : vector<1x32xf32> to vector<32x32xf32>
    %414 = arith.addf %410, %413 : vector<32x32xf32>
    %415 = arith.truncf %400 : vector<32x32xf32> to vector<32x32xbf16>
    %416 = arith.truncf %407 : vector<32x32xf32> to vector<32x32xbf16>
    %cst_264 = arith.constant dense<0.000000e+00> : vector<32x32xf32>
    %417 = tpu.matmul %415, %416, %cst_264 {dimension_numbers = #tpu.dot_dimension_numbers<[1], [1], [0], [0], [0, 0, 1, 0], [], []>} : vector<32x32xbf16>, vector<32x32xbf16>, vector<32x32xf32> -> vector<32x32xf32>
    %418 = arith.addf %417, %1 : vector<32x32xf32>
    %cst_265 = arith.constant dense<0xFF800000> : vector<32xf32>
    %419 = vector.multi_reduction <maximumf>, %418, %cst_265 [1] : vector<32x32xf32> to vector<32xf32>
    %420 = vector.shape_cast %419 : vector<32xf32> to vector<32x1xf32>
    %421 = vector.broadcast %420 : vector<32x1xf32> to vector<32x32xf32>
    %422 = arith.subf %418, %421 : vector<32x32xf32>
    %423 = math.exp %422 : vector<32x32xf32>
    %cst_266 = arith.constant dense<0.000000e+00> : vector<32xf32>
    %424 = vector.multi_reduction <add>, %423, %cst_266 [1] : vector<32x32xf32> to vector<32xf32>
    %425 = vector.shape_cast %424 : vector<32xf32> to vector<32x1xf32>
    %426 = tpu.reciprocal %425 {approx = true} : vector<32x1xf32> -> vector<32x1xf32>
    %427 = vector.broadcast %426 : vector<32x1xf32> to vector<32x32xf32>
    %428 = arith.mulf %423, %427 : vector<32x32xf32>
    %429 = arith.truncf %428 : vector<32x32xf32> to vector<32x32xbf16>
    %430 = arith.truncf %414 : vector<32x32xf32> to vector<32x32xbf16>
    %cst_267 = arith.constant dense<0.000000e+00> : vector<32x32xf32>
    %431 = tpu.matmul %429, %430, %cst_267 {dimension_numbers = #tpu.dot_dimension_numbers<[1], [0], [0], [1], [0, 0, 1, 1], [], []>} : vector<32x32xbf16>, vector<32x32xbf16>, vector<32x32xf32> -> vector<32x32xf32>
    %432 = arith.truncf %431 : vector<32x32xf32> to vector<32x32xbf16>
    %c7_268 = arith.constant 7 : index
    %c0_269 = arith.constant 0 : index
    %c0_270 = arith.constant 0 : index
    %433 = vector.load %arg8[%c7_268, %c0_269, %c0_270] : memref<8x32x128xbf16, #tpu.memory_space<vmem>>, vector<1x32x128xbf16>
    %434 = vector.shape_cast %433 : vector<1x32x128xbf16> to vector<32x128xbf16>
    %cst_271 = arith.constant dense<0.000000e+00> : vector<32x128xf32>
    %435 = tpu.matmul %432, %434, %cst_271 {dimension_numbers = #tpu.dot_dimension_numbers<[1], [0], [0], [1], [0, 0, 1, 1], [], []>} : vector<32x32xbf16>, vector<32x128xbf16>, vector<32x128xf32> -> vector<32x128xf32>
    %436 = arith.addf %393, %435 : vector<32x128xf32>
    %c1_272 = arith.constant 1 : index
    %c0_273 = arith.constant 0 : index
    %c0_274 = arith.constant 0 : index
    %437 = vector.load %arg9[%c1_272, %c0_273, %c0_274] : memref<2x1x128xf32, #tpu.memory_space<vmem>>, vector<1x1x128xf32>
    %438 = vector.shape_cast %437 : vector<1x1x128xf32> to vector<1x128xf32>
    %439 = vector.broadcast %438 : vector<1x128xf32> to vector<32x128xf32>
    %440 = arith.addf %436, %439 : vector<32x128xf32>
    %441 = arith.addf %440, %262 : vector<32x128xf32>
    %c1_275 = arith.constant 1 : index
    %c0_276 = arith.constant 0 : index
    %c0_277 = arith.constant 0 : index
    %442 = vector.load %arg10[%c1_275, %c0_276, %c0_277] : memref<2x1x128xf32, #tpu.memory_space<vmem>>, vector<1x1x128xf32>
    %443 = vector.shape_cast %442 : vector<1x1x128xf32> to vector<1x128xf32>
    %c1_278 = arith.constant 1 : index
    %c0_279 = arith.constant 0 : index
    %c0_280 = arith.constant 0 : index
    %444 = vector.load %arg11[%c1_278, %c0_279, %c0_280] : memref<2x1x128xf32, #tpu.memory_space<vmem>>, vector<1x1x128xf32>
    %445 = vector.shape_cast %444 : vector<1x1x128xf32> to vector<1x128xf32>
    %cst_281 = arith.constant dense<0.000000e+00> : vector<32xf32>
    %446 = vector.multi_reduction <add>, %441, %cst_281 [1] : vector<32x128xf32> to vector<32xf32>
    %447 = vector.shape_cast %446 : vector<32xf32> to vector<32x1xf32>
    %cst_282 = arith.constant 1.280000e+02 : f32
    %448 = vector.broadcast %cst_282 : f32 to vector<32x1xf32>
    %449 = arith.divf %447, %448 : vector<32x1xf32>
    %450 = vector.broadcast %449 : vector<32x1xf32> to vector<32x128xf32>
    %451 = arith.subf %441, %450 : vector<32x128xf32>
    %452 = arith.mulf %451, %451 : vector<32x128xf32>
    %cst_283 = arith.constant dense<0.000000e+00> : vector<32xf32>
    %453 = vector.multi_reduction <add>, %452, %cst_283 [1] : vector<32x128xf32> to vector<32xf32>
    %454 = vector.shape_cast %453 : vector<32xf32> to vector<32x1xf32>
    %cst_284 = arith.constant 1.280000e+02 : f32
    %455 = vector.broadcast %cst_284 : f32 to vector<32x1xf32>
    %456 = arith.divf %454, %455 : vector<32x1xf32>
    %457 = vector.broadcast %449 : vector<32x1xf32> to vector<32x128xf32>
    %458 = arith.subf %441, %457 : vector<32x128xf32>
    %cst_285 = arith.constant 9.99999996E-13 : f32
    %459 = vector.broadcast %cst_285 : f32 to vector<32x1xf32>
    %460 = arith.addf %456, %459 : vector<32x1xf32>
    %461 = math.rsqrt %460 : vector<32x1xf32>
    %462 = vector.broadcast %461 : vector<32x1xf32> to vector<32x128xf32>
    %463 = arith.mulf %458, %462 : vector<32x128xf32>
    %464 = vector.broadcast %443 : vector<1x128xf32> to vector<32x128xf32>
    %465 = arith.mulf %463, %464 : vector<32x128xf32>
    %466 = vector.broadcast %445 : vector<1x128xf32> to vector<32x128xf32>
    %467 = arith.addf %465, %466 : vector<32x128xf32>
    %468 = arith.truncf %467 : vector<32x128xf32> to vector<32x128xbf16>
    %c1_286 = arith.constant 1 : index
    %c0_287 = arith.constant 0 : index
    %c0_288 = arith.constant 0 : index
    %469 = vector.load %arg12[%c1_286, %c0_287, %c0_288] : memref<2x128x512xbf16, #tpu.memory_space<vmem>>, vector<1x128x512xbf16>
    %470 = vector.shape_cast %469 : vector<1x128x512xbf16> to vector<128x512xbf16>
    %cst_289 = arith.constant dense<0.000000e+00> : vector<32x512xf32>
    %471 = tpu.matmul %468, %470, %cst_289 {dimension_numbers = #tpu.dot_dimension_numbers<[1], [0], [0], [1], [0, 0, 1, 1], [], []>} : vector<32x128xbf16>, vector<128x512xbf16>, vector<32x512xf32> -> vector<32x512xf32>
    %c1_290 = arith.constant 1 : index
    %c0_291 = arith.constant 0 : index
    %c0_292 = arith.constant 0 : index
    %472 = vector.load %arg13[%c1_290, %c0_291, %c0_292] : memref<2x1x512xf32, #tpu.memory_space<vmem>>, vector<1x1x512xf32>
    %473 = vector.shape_cast %472 : vector<1x1x512xf32> to vector<1x512xf32>
    %474 = vector.broadcast %473 : vector<1x512xf32> to vector<32x512xf32>
    %475 = arith.addf %471, %474 : vector<32x512xf32>
    %cst_293 = arith.constant 5.000000e-01 : f32
    %476 = vector.broadcast %cst_293 : f32 to vector<32x512xf32>
    %477 = arith.mulf %476, %475 : vector<32x512xf32>
    %cst_294 = arith.constant 4.471500e-02 : f32
    %478 = vector.broadcast %cst_294 : f32 to vector<32x512xf32>
    %479 = arith.mulf %478, %475 : vector<32x512xf32>
    %480 = arith.mulf %479, %475 : vector<32x512xf32>
    %481 = arith.mulf %480, %475 : vector<32x512xf32>
    %482 = arith.addf %475, %481 : vector<32x512xf32>
    %cst_295 = arith.constant 0.797884583 : f32
    %483 = vector.broadcast %cst_295 : f32 to vector<32x512xf32>
    %484 = arith.mulf %483, %482 : vector<32x512xf32>
    %485 = math.tanh %484 : vector<32x512xf32>
    %cst_296 = arith.constant 1.000000e+00 : f32
    %486 = vector.broadcast %cst_296 : f32 to vector<32x512xf32>
    %487 = arith.addf %486, %485 : vector<32x512xf32>
    %488 = arith.mulf %477, %487 : vector<32x512xf32>
    %489 = arith.truncf %488 : vector<32x512xf32> to vector<32x512xbf16>
    %c1_297 = arith.constant 1 : index
    %c0_298 = arith.constant 0 : index
    %c0_299 = arith.constant 0 : index
    %490 = vector.load %arg14[%c1_297, %c0_298, %c0_299] : memref<2x512x128xbf16, #tpu.memory_space<vmem>>, vector<1x512x128xbf16>
    %491 = vector.shape_cast %490 : vector<1x512x128xbf16> to vector<512x128xbf16>
    %cst_300 = arith.constant dense<0.000000e+00> : vector<32x128xf32>
    %492 = tpu.matmul %489, %491, %cst_300 {dimension_numbers = #tpu.dot_dimension_numbers<[1], [0], [0], [1], [0, 0, 1, 1], [], []>} : vector<32x512xbf16>, vector<512x128xbf16>, vector<32x128xf32> -> vector<32x128xf32>
    %c1_301 = arith.constant 1 : index
    %c0_302 = arith.constant 0 : index
    %c0_303 = arith.constant 0 : index
    %493 = vector.load %arg15[%c1_301, %c0_302, %c0_303] : memref<2x1x128xf32, #tpu.memory_space<vmem>>, vector<1x1x128xf32>
    %494 = vector.shape_cast %493 : vector<1x1x128xf32> to vector<1x128xf32>
    %495 = vector.broadcast %494 : vector<1x128xf32> to vector<32x128xf32>
    %496 = arith.addf %492, %495 : vector<32x128xf32>
    %497 = arith.addf %496, %467 : vector<32x128xf32>
    %c1_304 = arith.constant 1 : index
    %c0_305 = arith.constant 0 : index
    %c0_306 = arith.constant 0 : index
    %498 = vector.load %arg16[%c1_304, %c0_305, %c0_306] : memref<2x1x128xf32, #tpu.memory_space<vmem>>, vector<1x1x128xf32>
    %499 = vector.shape_cast %498 : vector<1x1x128xf32> to vector<1x128xf32>
    %c1_307 = arith.constant 1 : index
    %c0_308 = arith.constant 0 : index
    %c0_309 = arith.constant 0 : index
    %500 = vector.load %arg17[%c1_307, %c0_308, %c0_309] : memref<2x1x128xf32, #tpu.memory_space<vmem>>, vector<1x1x128xf32>
    %501 = vector.shape_cast %500 : vector<1x1x128xf32> to vector<1x128xf32>
    %cst_310 = arith.constant dense<0.000000e+00> : vector<32xf32>
    %502 = vector.multi_reduction <add>, %497, %cst_310 [1] : vector<32x128xf32> to vector<32xf32>
    %503 = vector.shape_cast %502 : vector<32xf32> to vector<32x1xf32>
    %cst_311 = arith.constant 1.280000e+02 : f32
    %504 = vector.broadcast %cst_311 : f32 to vector<32x1xf32>
    %505 = arith.divf %503, %504 : vector<32x1xf32>
    %506 = vector.broadcast %505 : vector<32x1xf32> to vector<32x128xf32>
    %507 = arith.subf %497, %506 : vector<32x128xf32>
    %508 = arith.mulf %507, %507 : vector<32x128xf32>
    %cst_312 = arith.constant dense<0.000000e+00> : vector<32xf32>
    %509 = vector.multi_reduction <add>, %508, %cst_312 [1] : vector<32x128xf32> to vector<32xf32>
    %510 = vector.shape_cast %509 : vector<32xf32> to vector<32x1xf32>
    %cst_313 = arith.constant 1.280000e+02 : f32
    %511 = vector.broadcast %cst_313 : f32 to vector<32x1xf32>
    %512 = arith.divf %510, %511 : vector<32x1xf32>
    %513 = vector.broadcast %505 : vector<32x1xf32> to vector<32x128xf32>
    %514 = arith.subf %497, %513 : vector<32x128xf32>
    %cst_314 = arith.constant 9.99999996E-13 : f32
    %515 = vector.broadcast %cst_314 : f32 to vector<32x1xf32>
    %516 = arith.addf %512, %515 : vector<32x1xf32>
    %517 = math.rsqrt %516 : vector<32x1xf32>
    %518 = vector.broadcast %517 : vector<32x1xf32> to vector<32x128xf32>
    %519 = arith.mulf %514, %518 : vector<32x128xf32>
    %520 = vector.broadcast %499 : vector<1x128xf32> to vector<32x128xf32>
    %521 = arith.mulf %519, %520 : vector<32x128xf32>
    %522 = vector.broadcast %501 : vector<1x128xf32> to vector<32x128xf32>
    %523 = arith.addf %521, %522 : vector<32x128xf32>
    %524 = vector.extract_strided_slice %523 {offsets = [0, 0], sizes = [1, 128], strides = [1, 1]} : vector<32x128xf32> to vector<1x128xf32>
    %525 = vector.extract_strided_slice %523 {offsets = [16, 0], sizes = [1, 128], strides = [1, 1]} : vector<32x128xf32> to vector<1x128xf32>
    %526 = tpu.concatenate %524, %525 in 0 : vector<1x128xf32>, vector<1x128xf32> -> vector<2x128xf32>
    %527 = arith.truncf %526 : vector<2x128xf32> to vector<2x128xbf16>
    %c0_315 = arith.constant 0 : index
    %c0_316 = arith.constant 0 : index
    %528 = vector.load %arg18[%c0_315, %c0_316] : memref<128x128xbf16, #tpu.memory_space<vmem>>, vector<128x128xbf16>
    %cst_317 = arith.constant dense<0.000000e+00> : vector<2x128xf32>
    %529 = tpu.matmul %527, %528, %cst_317 {dimension_numbers = #tpu.dot_dimension_numbers<[1], [0], [0], [1], [0, 0, 1, 1], [], []>} : vector<2x128xbf16>, vector<128x128xbf16>, vector<2x128xf32> -> vector<2x128xf32>
    %c0_318 = arith.constant 0 : index
    %c0_319 = arith.constant 0 : index
    %530 = vector.load %arg19[%c0_318, %c0_319] : memref<1x128xf32, #tpu.memory_space<vmem>>, vector<1x128xf32>
    %531 = vector.broadcast %530 : vector<1x128xf32> to vector<2x128xf32>
    %532 = arith.addf %529, %531 : vector<2x128xf32>
    %cst_320 = arith.constant 0.000000e+00 : f32
    %533 = vector.broadcast %cst_320 : f32 to vector<2x128xf32>
    %534 = arith.maximumf %532, %533 : vector<2x128xf32>
    %535 = arith.truncf %534 : vector<2x128xf32> to vector<2x128xbf16>
    %c0_321 = arith.constant 0 : index
    %c0_322 = arith.constant 0 : index
    %536 = vector.load %arg20[%c0_321, %c0_322] : memref<128x128xbf16, #tpu.memory_space<vmem>>, vector<128x128xbf16>
    %cst_323 = arith.constant dense<0.000000e+00> : vector<2x128xf32>
    %537 = tpu.matmul %535, %536, %cst_323 {dimension_numbers = #tpu.dot_dimension_numbers<[1], [0], [0], [1], [0, 0, 1, 1], [], []>} : vector<2x128xbf16>, vector<128x128xbf16>, vector<2x128xf32> -> vector<2x128xf32>
    %c0_324 = arith.constant 0 : index
    %c0_325 = arith.constant 0 : index
    %538 = vector.load %arg21[%c0_324, %c0_325] : memref<1x128xf32, #tpu.memory_space<vmem>>, vector<1x128xf32>
    %539 = vector.broadcast %538 : vector<1x128xf32> to vector<2x128xf32>
    %540 = arith.addf %537, %539 : vector<2x128xf32>
    %c0_326 = arith.constant 0 : index
    %c0_327 = arith.constant 0 : index
    %541 = vector.load %arg22[%c0_326, %c0_327] : memref<2x128xf32, #tpu.memory_space<vmem>>, vector<2x128xf32>
    tpu.vector_store %arg22[%c0_326, %c0_327], %540 {strides = array<i32>} : memref<2x128xf32, #tpu.memory_space<vmem>>, vector<2x128xf32>,
    return
  }
}

</mosaic_0001>

<bundles_post_ra>
// kernel: mlp_feature_bert_forward.1
= control target key start
LH: loop header
LB: loop body
LE: loop exit
PB: predicated region body
PF: predicated region fallthrough
CT: control target
= control target key end

     0   :  { %s12062_s0 = inlined_call_operand.vmem [shape: f32[32,128], index: 0, kind: input, shape index: {}]   ;;  %s12063_s1 = inlined_call_operand.vmem [shape: f32[32,32], index: 1, kind: input, shape index: {}]   ;;  %s12064_s2 = inlined_call_operand.vmem [shape: bf16[8,128,32], index: 2, kind: input, shape index: {}]   ;;  %s12065_s3 = inlined_call_operand.vmem [shape: bf16[8,128,32], index: 3, kind: input, shape index: {}]   ;;  %s12066_s4 = inlined_call_operand.vmem [shape: bf16[8,128,32], index: 4, kind: input, shape index: {}]   ;;  %s12067_s5 = inlined_call_operand.vmem [shape: f32[8,1,32], index: 5, kind: input, shape index: {}]   ;;  %s12068_s6 = inlined_call_operand.vmem [shape: f32[8,1,32], index: 6, kind: input, shape index: {}]   ;;  %s12069_s7 = inlined_call_operand.vmem [shape: f32[8,1,32], index: 7, kind: input, shape index: {}]   ;;  %s12070_s8 = inlined_call_operand.vmem [shape: bf16[8,32,128], index: 8, kind: input, shape index: {}]   ;;  %s12071_s9 = inlined_call_operand.vmem [shape: f32[2,1,128], index: 9, kind: input, shape index: {}]   ;;  %s12072_s10 = inlined_call_operand.vmem [shape: f32[2,1,128], index: 10, kind: input, shape index: {}]   ;;  %s12073_s11 = inlined_call_operand.vmem [shape: f32[2,1,128], index: 11, kind: input, shape index: {}]   ;;  %s12074_s12 = inlined_call_operand.vmem [shape: bf16[2,128,512], index: 12, kind: input, shape index: {}]   ;;  %s12075_s13 = inlined_call_operand.vmem [shape: f32[2,1,512], index: 13, kind: input, shape index: {}]   ;;  %s12076_s14 = inlined_call_operand.vmem [shape: bf16[2,512,128], index: 14, kind: input, shape index: {}]   ;;  %s12077_s15 = inlined_call_operand.vmem [shape: f32[2,1,128], index: 15, kind: input, shape index: {}]   ;;  %s12078_s16 = inlined_call_operand.vmem [shape: f32[2,1,128], index: 16, kind: input, shape index: {}]   ;;  %s12079_s17 = inlined_call_operand.vmem [shape: f32[2,1,128], index: 17, kind: input, shape index: {}]   ;;  %s12080_s18 = inlined_call_operand.vmem [shape: bf16[128,128], index: 18, kind: input, shape index: {}]   ;;  %s12081_s19 = inlined_call_operand.vmem [shape: f32[1,128], index: 19, kind: input, shape index: {}]   ;;  %s12082_s20 = inlined_call_operand.vmem [shape: bf16[128,128], index: 20, kind: input, shape index: {}]   ;;  %s12083_s21 = inlined_call_operand.vmem [shape: f32[1,128], index: 21, kind: input, shape index: {}]   ;;  %s12084_s22 = inlined_call_operand.hbm [shape: f32[2,128], index: 22, kind: output, shape index: {}]  }
   0x1   :  { %12093 = sst [smem:[#allocation5_spill]] %s12062_s0 }
   0x2   :  { %12094 = sst [smem:[#allocation6_spill]] %s12063_s1 }
   0x3   :  { %12095 = sst [smem:[#allocation7_spill]] %s12064_s2 }
   0x4   :  { %12096 = sst [smem:[#allocation8_spill]] %s12065_s3 }
   0x5   :  { %12097 = sst [smem:[#allocation9_spill]] %s12066_s4 }
   0x6   :  { %12098 = sst [smem:[#allocation10_spill]] %s12067_s5 }
   0x7   :  { %12099 = sst [smem:[#allocation11_spill]] %s12068_s6 }
   0x8   :  { %12100 = sst [smem:[#allocation12_spill]] %s12083_s21 }
   0x9   :  { %12101 = sst [smem:[#allocation13_spill]] %s12084_s22 }
   0xa   :  { %s12102_s29 = sld [smem:[#allocation8_spill]]  ;;  %s12103_s1 = sld [smem:[#allocation7_spill]] }
   0xb   :  { %s12104_s24 = sld [smem:[#allocation5_spill]] }
  0x10   :  { %v9302_v0 = vld [vmem:[%s12102_s29] sm:$0xff]   ;;  %v9303_v1 = vld [vmem:[%s12102_s29 + $0x8] sm:$0xff]   ;;  %v9304_v3 = vld [vmem:[%s12102_s29 + $0x10] sm:$0xff]  }
  0x11   :  { %8566 = vmatprep.subr.bf16.mxu1 %v9302_v0  ;;  %v9305_v2 = vld [vmem:[%s12103_s1] sm:$0xff]   ;;  %v9307_v4 = vld [vmem:[%s12103_s1 + $0x8] sm:$0xff]   ;;  %v9309_v5 = vld [vmem:[%s12103_s1 + $0x10] sm:$0xff]  }
  0x12   :  { %8567 = vmatpush3.bf16.msra.mxu1 %v9302_v0  ;;  %8546 = vmatprep.subr.bf16.mxu0 %v9305_v2  ;;  %v9306_v6 = vld [vmem:[%s12102_s29 + $0x18] sm:$0xff]   ;;  %v9308_v8 = vld [vmem:[%s12102_s29 + $0x20] sm:$0xff]   ;;  %v74_v10 = vld [vmem:[%s12104_s24 + $0x8] sm:$0xff] }
  0x13   :  { %8568 = vmatprep.subr.bf16.mxu1 %v9303_v1  ;;  %8547 = vmatpush3.bf16.msra.mxu0 %v9305_v2  ;;  %v9311_v7 = vld [vmem:[%s12103_s1 + $0x18] sm:$0xff]   ;;  %v73_v9 = vld [vmem:[%s12104_s24] sm:$0xff]  ;;  %v9310_v13 = vld [vmem:[%s12102_s29 + $0x28] sm:$0xff]  }
  0x14   :  { %8548 = vmatprep.subr.bf16.mxu0 %v9307_v4  ;;  %v10094_v11 = vpack.c.bf16 %v74_v10, %v73_v9  ;;  %v9313_v12 = vld [vmem:[%s12103_s1 + $0x20] sm:$0xff]   ;;  %v9315_v14 = vld [vmem:[%s12103_s1 + $0x28] sm:$0xff]   ;;  %v9312_v15 = vld [vmem:[%s12102_s29 + $0x30] sm:$0xff]  }
  0x15   :  { %v9316_v16 = vld [vmem:[%s12103_s1 + $0x30] sm:$0xff]   ;;  %v9314_v17 = vld [vmem:[%s12102_s29 + $0x38] sm:$0xff]  }
  0x16   :  { %8569 = vmatpush3.bf16.msra.mxu1 %v9303_v1  ;;  %8582 = vmatprep.mubr.bf16.mxu1 %v10094_v11  ;;  %v75_v18 = vld [vmem:[%s12104_s24 + $0x10] sm:$0xff]  ;;  %v76_v19 = vld [vmem:[%s12104_s24 + $0x18] sm:$0xff] }
  0x17   :  { %8570 = vmatprep.subr.bf16.mxu1 %v9304_v3  ;;  %8549 = vmatpush3.bf16.msra.mxu0 %v9307_v4  ;;  %v9317_v20 = vld [vmem:[%s12103_s1 + $0x38] sm:$0xff]   ;;  %v10125_v21 = vpack.c.bf16 %v76_v19, %v75_v18 }
  0x18   :  { %8550 = vmatprep.subr.bf16.mxu0 %v9309_v5  ;;  %8562 = vmatprep.mubr.bf16.mxu0 %v10094_v11 }
  0x1a   :  { %8571 = vmatpush3.bf16.msra.mxu1 %v9304_v3 }
  0x1b   :  { %8572 = vmatprep.subr.bf16.mxu1 %v9306_v6  ;;  %8551 = vmatpush3.bf16.msra.mxu0 %v9309_v5 }
  0x1c   :  { %8552 = vmatprep.subr.bf16.mxu0 %v9311_v7 }
  0x1e   :  { %8573 = vmatpush3.bf16.msra.mxu1 %v9306_v6 }
  0x1f   :  { %8574 = vmatprep.subr.bf16.mxu1 %v9308_v8  ;;  %8553 = vmatpush3.bf16.msra.mxu0 %v9311_v7 }
  0x20   :  { %8554 = vmatprep.subr.bf16.mxu0 %v9313_v12 }
  0x22   :  { %8575 = vmatpush3.bf16.msra.mxu1 %v9308_v8 }
  0x23   :  { %8576 = vmatprep.subr.bf16.mxu1 %v9310_v13  ;;  %8555 = vmatpush3.bf16.msra.mxu0 %v9313_v12 }
  0x24   :  { %8556 = vmatprep.subr.bf16.mxu0 %v9315_v14 }
  0x26   :  { %8577 = vmatpush3.bf16.msra.mxu1 %v9310_v13 }
  0x27   :  { %8578 = vmatprep.subr.bf16.mxu1 %v9312_v15  ;;  %8557 = vmatpush3.bf16.msra.mxu0 %v9315_v14 }
  0x28   :  { %8558 = vmatprep.subr.bf16.mxu0 %v9316_v16 }
  0x2a   :  { %8579 = vmatpush3.bf16.msra.mxu1 %v9312_v15 }
  0x2b   :  { %8580 = vmatprep.subr.bf16.mxu1 %v9314_v17  ;;  %8559 = vmatpush3.bf16.msra.mxu0 %v9316_v16 }
  0x2c   :  { %8560 = vmatprep.subr.bf16.mxu0 %v9317_v20 }
  0x2e   :  { %8581 = vmatpush3.bf16.msra.mxu1 %v9314_v17 }
  0x2f   :  { %8561 = vmatpush3.bf16.msra.mxu0 %v9317_v20 }
  0x31   :  { %8583 = vmatmul.mubr.bf16.vlgmr.msra.gmra.mrb[0].mxu1 %v10125_v21 }
  0x32   :  { %8563 = vmatmul.mubr.bf16.vlgmr.msra.gmra.mrb[0].mxu0 %v10125_v21 }
  0x33   :  { %8602 = vmatprep.mubr.bf16.mxu0 %v10094_v11 }
  0x34   :  { %27 = vsyncpa [#allocation3], 0  ;;  %s12105_s23 = sld [smem:[#allocation11_spill]]  ;;  %s12106_s25 = sld [smem:[#allocation10_spill]]  ;;  %vm447_vm0 = vcmask 261120   ;;  %v9326_v6 = vld [vmem:[%s12102_s29 + $0x40] sm:$0xff]  }
  0x35   :  { %s12107_s27 = sld [smem:[#allocation9_spill]]  ;;  %s12108_s26 = sld [smem:[#allocation6_spill]]  ;;  %vm9944_vm1 = vmmov 0   ;;  %vm6912_vm2 = vcmask 1040384  }
  0x3a   :  { %v7163_v23 = vld [vmem:[%s12105_s23] ss:$0 sm:$0xff] }
  0x3b   :  { %v7154_v25 = vld [vmem:[%s12106_s25] ss:$0 sm:$0xff]  ;;  %v9319_v47 = vld [vmem:[%s12107_s27 + $0x8] sm:$0xff]   ;;  %v9320_v48 = vld [vmem:[%s12107_s27 + $0x10] sm:$0xff]  }
  0x3c   :  { %v9318_v46 = vld [vmem:[%s12107_s27] sm:$0xff]   ;;  %v9321_v49 = vld [vmem:[%s12107_s27 + $0x18] sm:$0xff]   ;;  %v9323_v51 = vld [vmem:[%s12107_s27 + $0x28] sm:$0xff]  }
  0x3d   :  { %8586 = vmatprep.subr.bf16.mxu0 %v9318_v46  ;;  %v9322_v50 = vld [vmem:[%s12107_s27 + $0x20] sm:$0xff]   ;;  %v9324_v52 = vld [vmem:[%s12107_s27 + $0x30] sm:$0xff]   ;;  %v9325_v53 = vld [vmem:[%s12107_s27 + $0x38] sm:$0xff]  }
  0x3e   :  { %8587 = vmatpush3.bf16.msra.mxu0 %v9318_v46  ;;  %v10171_v54 = vld [vmem:[%s12108_s26 + $0x10] sm:$0xff]  ;;  %v10176_v55 = vld [vmem:[%s12108_s26] sm:$0xff]  ;;  %v10181_v57 = vld [vmem:[%s12108_s26 + $0x18] sm:$0xff] }
  0x3f   :  { %8588 = vmatprep.subr.bf16.mxu0 %v9319_v47  ;;  %v10187_v60 = vld [vmem:[%s12108_s26 + $0x8] sm:$0xff]  ;;  %v9333_v46 = vld [vmem:[%s12103_s1 + $0x40] sm:$0xff]  }
  0x42   :  { %8589 = vmatpush3.bf16.msra.mxu0 %v9319_v47  ;;  %v9334_v47 = vld [vmem:[%s12102_s29 + $0x78] sm:$0xff]  }
  0x43   :  { %8590 = vmatprep.subr.bf16.mxu0 %v9320_v48 }
  0x46   :  { %8591 = vmatpush3.bf16.msra.mxu0 %v9320_v48 }
  0x47   :  { %8592 = vmatprep.subr.bf16.mxu0 %v9321_v49 }
  0x4a   :  { %8593 = vmatpush3.bf16.msra.mxu0 %v9321_v49 }
  0x4b   :  { %8594 = vmatprep.subr.bf16.mxu0 %v9322_v50 }
  0x4e   :  { %8595 = vmatpush3.bf16.msra.mxu0 %v9322_v50 }
  0x4f   :  { %8596 = vmatprep.subr.bf16.mxu0 %v9323_v51 }
  0x52   :  { %8597 = vmatpush3.bf16.msra.mxu0 %v9323_v51 }
  0x53   :  { %8598 = vmatprep.subr.bf16.mxu0 %v9324_v52 }
  0x56   :  { %8599 = vmatpush3.bf16.msra.mxu0 %v9324_v52 }
  0x57   :  { %8600 = vmatprep.subr.bf16.mxu0 %v9325_v53 }
  0x5a   :  { %8601 = vmatpush3.bf16.msra.mxu0 %v9325_v53 }
  0x5b   :  { %8642 = vmatprep.subr.bf16.mxu0 %v9326_v6 }
  0x5d   :  { %8603 = vmatmul.mubr.bf16.vlgmr.msra.gmra.mrb[4].mxu0 %v10125_v21 }
  0x5e   :  { %8658 = vmatprep.mubr.bf16.mxu0 %v10094_v11  ;;  %8643 = vmatpush3.bf16.msra.mxu0 %v9326_v6  ;;  %v9339_v6 = vld [vmem:[%s12103_s1 + $0x68] sm:$0xff]  }
 0x104   :  { %v8584_v22 = vpop.f32.mrb[0].mxu1 }
 0x105   :  { %v308_v24 = vpop.f32.mrb[1].mxu1  ;;  %v317_v27 = vadd.f32 %v8584_v22, %v7163_v23  ;;  %v8564_v30 = vpop.f32.mrb[0].mxu0 }
 0x106   :  { %v8585_v26 = vpop.f32.mrb[2].mxu1  ;;  %v309_v31 = vadd.f32 %v7163_v23, %v308_v24  ;;  %v197_v33 = vadd.f32 %v8564_v30, %v7154_v25  ;;  %v188_v34 = vpop.f32.mrb[1].mxu0 }
 0x107   :  { %v320_v28 = vadd.f32 %v8585_v26, %v7163_v23  ;;  %v311_v29 = vpop.f32.mrb[3].mxu1  ;;  %v189_v36 = vadd.f32 %v7154_v25, %v188_v34  ;;  %v8565_v37 = vpop.f32.mrb[2].mxu0 }
 0x108   :  { %v312_v32 = vadd.f32 %v7163_v23, %v311_v29  ;;  %v200_v39 = vadd.f32 %v8565_v37, %v7154_v25  ;;  %v191_v40 = vpop.f32.mrb[3].mxu0 }
 0x109   :  { %v446_v35 = vpack.c.bf16 %v320_v28, %v317_v27  ;;  %v192_v41 = vadd.f32 %v7154_v25, %v191_v40  ;;  %v9328_v40 = vld [vmem:[%s12102_s29 + $0x50] sm:$0xff]  }
 0x10a   :  { %v445_v38 = vpack.c.bf16 %v312_v32, %v309_v31  ;;  %v444_v43 = vpack.c.bf16 %v200_v39, %v197_v33  ;;  %v7172_v31 = vld [vmem:[%s12069_s7] ss:$0 sm:$0xff]  ;;  %v9327_v32 = vld [vmem:[%s12102_s29 + $0x48] sm:$0xff]  }
 0x10b   :  { %v443_v44 = vpack.c.bf16 %v192_v41, %v189_v36  ;;  %v458_v45 = vsel %vm447_vm0, %v446_v35, 0  ;;  %8644 = vmatprep.subr.bf16.mxu0 %v9327_v32 }
 0x10c   :  { %9282 = vmatprep.subr.msk.bf16.mxu1 %vm447_vm0, %v445_v38  ;;  %v455_v42 = vsel %vm447_vm0, %v445_v38, 0  ;;  %8645 = vmatpush3.bf16.msra.mxu0 %v9327_v32 }
 0x10d   :  { %8607 = vmatpush3.bf16.xpose.msra.mxu1 %v455_v42  ;;  %8610 = vmatprep.mubr.msk.bf16.mxu1 %vm447_vm0, %v443_v44  ;;  %v9329_v42 = vld [vmem:[%s12102_s29 + $0x58] sm:$0xff]   ;;  %v9331_v44 = vld [vmem:[%s12102_s29 + $0x68] sm:$0xff]  }
 0x10e   :  { %9283 = vmatprep.subr.msk.bf16.mxu1 %vm447_vm0, %v446_v35  ;;  %8646 = vmatprep.subr.bf16.mxu0 %v9328_v40 }
 0x110   :  { %8647 = vmatpush3.bf16.msra.mxu0 %v9328_v40 }
 0x111   :  { %8648 = vmatprep.subr.bf16.mxu0 %v9329_v42 }
 0x114   :  { %8649 = vmatpush3.bf16.msra.mxu0 %v9329_v42  ;;  %v9343_v42 = vld [vmem:[%s12107_s27 + $0x48] sm:$0xff]  }
 0x115   :  { %8609 = vmatpush3.bf16.xpose.msra.mxu1 %v458_v45  ;;  %v9332_v45 = vld [vmem:[%s12102_s29 + $0x70] sm:$0xff]  }
 0x11c   :  { %8611 = vmatmul.mubr.msk.bf16.vlgmr.msra.gmra.mrb[4].mxu1 %vm447_vm0, %v444_v43  ;;  %v9330_v43 = vld [vmem:[%s12102_s29 + $0x60] sm:$0xff]  }
 0x11d   :  { %8650 = vmatprep.subr.bf16.mxu0 %v9330_v43 }
 0x11e   :  { %8651 = vmatpush3.bf16.msra.mxu0 %v9330_v43  ;;  %v9344_v43 = vld [vmem:[%s12107_s27 + $0x50] sm:$0xff]  }
 0x11f   :  { %8652 = vmatprep.subr.bf16.mxu0 %v9331_v44 }
 0x122   :  { %8653 = vmatpush3.bf16.msra.mxu0 %v9331_v44  ;;  %v9345_v44 = vld [vmem:[%s12107_s27 + $0x58] sm:$0xff]  }
 0x123   :  { %8654 = vmatprep.subr.bf16.mxu0 %v9332_v45 }
 0x126   :  { %8655 = vmatpush3.bf16.msra.mxu0 %v9332_v45  ;;  %v9346_v45 = vld [vmem:[%s12107_s27 + $0x60] sm:$0xff]  }
 0x127   :  { %8656 = vmatprep.subr.bf16.mxu0 %v9334_v47 }
 0x12a   :  { %8657 = vmatpush3.bf16.msra.mxu0 %v9334_v47  ;;  %v9348_v47 = vld [vmem:[%s12107_s27 + $0x70] sm:$0xff]  }
 0x12d   :  { %8659 = vmatmul.mubr.bf16.vlgmr.msra.gmra.mrb[8].mxu0 %v10125_v21 }
 0x130   :  { %v8604_v7 = vpop.f32.mrb[4].mxu0 }
 0x131   :  { %v428_v8 = vpop.f32.mrb[5].mxu0  ;;  %v437_v33 = vadd.f32 %v8604_v7, %v7172_v31  ;;  %v9340_v7 = vld [vmem:[%s12103_s1 + $0x70] sm:$0xff]  }
 0x132   :  { %v429_v34 = vadd.f32 %v7172_v31, %v428_v8  ;;  %v8605_v35 = vpop.f32.mrb[6].mxu0  ;;  %v9341_v8 = vld [vmem:[%s12103_s1 + $0x78] sm:$0xff]  }
 0x133   :  { %v440_v36 = vadd.f32 %v8605_v35, %v7172_v31  ;;  %v431_v37 = vpop.f32.mrb[7].mxu0 }
 0x134   :  { %v432_v38 = vadd.f32 %v7172_v31, %v431_v37  ;;  %v7202_v31 = vld [vmem:[%s12106_s25 + $0x1] ss:$0 sm:$0xff] }
 0x135   :  { %v556_v39 = vpack.c.bf16 %v440_v36, %v437_v33 }
 0x136   :  { %v555_v41 = vpack.c.bf16 %v432_v38, %v429_v34 }
 0x138   :  { %8614 = vmatprep.subr.bf16.mxu1 %v555_v41 }
 0x139   :  { %8615 = vmatpush3.bf16.msra.mxu1 %v555_v41  ;;  %v9342_v41 = vld [vmem:[%s12107_s27 + $0x40] sm:$0xff]  }
 0x13a   :  { %8616 = vmatprep.subr.bf16.mxu1 %v556_v39 }
 0x13d   :  { %8617 = vmatpush3.bf16.msra.mxu1 %v556_v39 }
 0x13e   :  { %8622 = vmatprep.subr.bf16.mxu1 %v9333_v46 }
 0x1ef   :  { %v8612_v56 = vpop.f32.mrb[4].mxu1 }
 0x1f0   :  { %v503_v58 = vadd.f32 %v8612_v56, %v10171_v54  ;;  %v494_v59 = vpop.f32.mrb[5].mxu1 }
 0x1f1   :  { %v495_v61 = vadd.f32 %v494_v59, %v10176_v55  ;;  %v8613_v62 = vpop.f32.mrb[6].mxu1 }
 0x1f2   :  { %v506_v63 = vadd.f32 %v8613_v62, %v10181_v57  ;;  %v497_v0 = vpop.f32.mrb[7].mxu1  ;;  %v515_v1 = vsel %vm447_vm0, %v503_v58, -inf }
 0x1f3   :  { %v498_v2 = vadd.f32 %v497_v0, %v10187_v60  ;;  %516 = vmax.xlane.f32.xlu1 %v515_v1  ;;  %v509_v3 = vsel %vm447_vm0, %v495_v61, -inf }
 0x1f4   :  { %510 = vmax.xlane.f32.xlu0 %v509_v3  ;;  %v518_v4 = vsel %vm447_vm0, %v506_v63, -inf  ;;  %v9336_v3 = vld [vmem:[%s12103_s1 + $0x50] sm:$0xff]  }
 0x1f5   :  { %v512_v5 = vsel %vm447_vm0, %v498_v2, -inf }
 0x1f7   :  { %519 = vmax.xlane.f32.xlu1 %v518_v4  ;;  %v9337_v4 = vld [vmem:[%s12103_s1 + $0x58] sm:$0xff]  }
 0x1f8   :  { %513 = vmax.xlane.f32.xlu0 %v512_v5  ;;  %v9338_v5 = vld [vmem:[%s12103_s1 + $0x60] sm:$0xff]  }
 0x280   :  { %v517_v9 = vpop.xlane.xlu1 %516 }
 0x281   :  { %v523_v10 = vsub.f32 %v503_v58, %v517_v9  ;;  %v511_v12 = vpop.xlane.xlu0 %510  ;;  %v7228_v9 = vld [vmem:[%s12105_s23 + $0x1] ss:$0 sm:$0xff] }
 0x282   :  { %v521_v13 = vsub.f32 %v495_v61, %v511_v12 }
 0x283   :  { %v529_v14 = vmul.f32 1.442695, %v523_v10  ;;  %v8660_v10 = vpop.f32.mrb[8].mxu0 }
 0x284   :  { %v525_v15 = vmul.f32 1.442695, %v521_v13  ;;  %v520_v16 = vpop.xlane.xlu1 %519  ;;  %v856_v12 = vadd.f32 %v8660_v10, %v7228_v9  ;;  %v847_v13 = vpop.f32.mrb[9].mxu0 }
 0x285   :  { %v524_v17 = vsub.f32 %v506_v63, %v520_v16  ;;  %v514_v18 = vpop.xlane.xlu0 %513 }
 0x286   :  { %9686 = vpow2.f32 %v525_v15  ;;  %v522_v19 = vsub.f32 %v498_v2, %v514_v18  ;;  %v9335_v2 = vld [vmem:[%s12103_s1 + $0x48] sm:$0xff]   ;;  %v8661_v15 = vpop.f32.mrb[10].mxu0 }
 0x287   :  { %9688 = vpow2.f32 %v529_v14  ;;  %v531_v20 = vmul.f32 1.442695, %v524_v17  ;;  %v848_v14 = vadd.f32 %v7228_v9, %v847_v13  ;;  %v859_v16 = vadd.f32 %v8661_v15, %v7228_v9  ;;  %v850_v17 = vpop.f32.mrb[11].mxu0 }
 0x288   :  { %v527_v22 = vmul.f32 1.442695, %v522_v19  ;;  %v851_v18 = vadd.f32 %v7228_v9, %v850_v17 }
 0x289   :  { %v987_v19 = vpack.c.bf16 %v859_v16, %v856_v12 }
 0x28a   :  { %9690 = vpow2.f32 %v527_v22 }
 0x28b   :  { %9692 = vpow2.f32 %v531_v20  ;;  %v986_v20 = vpack.c.bf16 %v851_v18, %v848_v14 }
 0x28d   :  { %9284 = vmatprep.subr.msk.bf16.mxu0 %vm447_vm0, %v986_v20  ;;  %v995_v22 = vsel %vm447_vm0, %v986_v20, 0 }
 0x28e   :  { %8683 = vmatpush3.bf16.xpose.msra.mxu0 %v995_v22 }
 0x28f   :  { %9285 = vmatprep.subr.msk.bf16.mxu0 %vm447_vm0, %v987_v19 }
 0x290   :  { %v9687_v23 = vpop.eup %9686 }
 0x291   :  { %v533_v24 = vsel %vm447_vm0, %v9687_v23, 0.0  ;;  %v9689_v25 = vpop.eup %9688 }
 0x292   :  { %534 = vadd.xlane.f32.xlu0 %v533_v24  ;;  %v539_v27 = vsel %vm447_vm0, %v9689_v25, 0.0 }
 0x294   :  { %v9691_v26 = vpop.eup %9690 }
 0x295   :  { %v536_v28 = vsel %vm447_vm0, %v9691_v26, 0.0  ;;  %v9693_v29 = vpop.eup %9692 }
 0x296   :  { %540 = vadd.xlane.f32.xlu0 %v539_v27  ;;  %537 = vadd.xlane.f32.xlu1 %v536_v28  ;;  %v542_v30 = vsel %vm447_vm0, %v9693_v29, 0.0 }
 0x29a   :  { %543 = vadd.xlane.f32.xlu1 %v542_v30 }
 0x31f   :  { %v535_v48 = vpop.xlane.xlu0 %534 }
 0x320   :  { %9694 = vrcp.f32 %v535_v48  ;;  %v9349_v48 = vld [vmem:[%s12107_s27 + $0x78] sm:$0xff]  }
 0x323   :  { %v538_v49 = vpop.xlane.xlu1 %537  ;;  %v541_v50 = vpop.xlane.xlu0 %540 }
 0x324   :  { %9696 = vrcp.f32 %v538_v49 }
 0x325   :  { %9698 = vrcp.f32 %v541_v50 }
 0x327   :  { %v544_v51 = vpop.xlane.xlu1 %543 }
 0x328   :  { %9700 = vrcp.f32 %v544_v51 }
 0x32a   :  { %v9695_v52 = vpop.eup %9694 }
 0x32b   :  { %v549_v56 = vmul.f32 %v9695_v52, %v9687_v23  ;;  %v998_v23 = vsel %vm447_vm0, %v987_v19, 0 }
 0x32c   :  { %8685 = vmatpush3.bf16.xpose.msra.mxu0 %v998_v23 }
 0x32e   :  { %v9697_v53 = vpop.eup %9696 }
 0x32f   :  { %v550_v58 = vmul.f32 %v9697_v53, %v9691_v26  ;;  %v9699_v59 = vpop.eup %9698 }
 0x330   :  { %v551_v63 = vmul.f32 %v9699_v59, %v9689_v25 }
 0x331   :  { %v553_v61 = vpack.c.bf16 %v550_v58, %v549_v56 }
 0x332   :  { %v9701_v62 = vpop.eup %9700 }
 0x333   :  { %v552_v0 = vmul.f32 %v9701_v62, %v9693_v29  ;;  %8618 = vmatprep.mubr.msk.bf16.mxu1 %vm447_vm0, %v553_v61 }
 0x335   :  { %v554_v1 = vpack.c.bf16 %v552_v0, %v551_v63 }
 0x337   :  { %8619 = vmatmul.mubr.msk.bf16.vlgmr.msra.gmra.mrb[8].mxu1 %vm447_vm0, %v554_v1  ;;  %v7254_v1 = vld [vmem:[%s12069_s7 + $0x1] ss:$0 sm:$0xff] }
 0x338   :  { %8623 = vmatpush3.bf16.msra.mxu1 %v9333_v46  ;;  %8638 = vmatprep.mubr.bf16.mxu1 %v10094_v11  ;;  %v9347_v46 = vld [vmem:[%s12107_s27 + $0x68] sm:$0xff]  }
 0x339   :  { %8624 = vmatprep.subr.bf16.mxu1 %v9335_v2 }
 0x33c   :  { %8625 = vmatpush3.bf16.msra.mxu1 %v9335_v2 }
 0x33d   :  { %8626 = vmatprep.subr.bf16.mxu1 %v9336_v3 }
 0x340   :  { %8627 = vmatpush3.bf16.msra.mxu1 %v9336_v3 }
 0x341   :  { %8628 = vmatprep.subr.bf16.mxu1 %v9337_v4 }
 0x344   :  { %8629 = vmatpush3.bf16.msra.mxu1 %v9337_v4 }
 0x345   :  { %8630 = vmatprep.subr.bf16.mxu1 %v9338_v5 }
 0x348   :  { %8631 = vmatpush3.bf16.msra.mxu1 %v9338_v5 }
 0x349   :  { %8632 = vmatprep.subr.bf16.mxu1 %v9339_v6 }
 0x34c   :  { %8633 = vmatpush3.bf16.msra.mxu1 %v9339_v6 }
 0x34d   :  { %8634 = vmatprep.subr.bf16.mxu1 %v9340_v7 }
 0x350   :  { %8635 = vmatpush3.bf16.msra.mxu1 %v9340_v7 }
 0x351   :  { %8636 = vmatprep.subr.bf16.mxu1 %v9341_v8 }
 0x354   :  { %8637 = vmatpush3.bf16.msra.mxu1 %v9341_v8 }
 0x355   :  { %8662 = vmatprep.subr.bf16.mxu1 %v9342_v41 }
 0x357   :  { %8639 = vmatmul.mubr.bf16.vlgmr.msra.gmra.mrb[12].mxu1 %v10125_v21 }
 0x358   :  { %8678 = vmatprep.mubr.bf16.mxu1 %v10094_v11  ;;  %8663 = vmatpush3.bf16.msra.mxu1 %v9342_v41 }
 0x359   :  { %8664 = vmatprep.subr.bf16.mxu1 %v9343_v42 }
 0x35c   :  { %8665 = vmatpush3.bf16.msra.mxu1 %v9343_v42 }
 0x35d   :  { %8666 = vmatprep.subr.bf16.mxu1 %v9344_v43 }
 0x360   :  { %8667 = vmatpush3.bf16.msra.mxu1 %v9344_v43 }
 0x361   :  { %8668 = vmatprep.subr.bf16.mxu1 %v9345_v44 }
 0x364   :  { %8669 = vmatpush3.bf16.msra.mxu1 %v9345_v44 }
 0x365   :  { %8670 = vmatprep.subr.bf16.mxu1 %v9346_v45 }
 0x368   :  { %8671 = vmatpush3.bf16.msra.mxu1 %v9346_v45 }
 0x369   :  { %8672 = vmatprep.subr.bf16.mxu1 %v9347_v46 }
 0x36c   :  { %8673 = vmatpush3.bf16.msra.mxu1 %v9347_v46 }
 0x36d   :  { %8674 = vmatprep.subr.bf16.mxu1 %v9348_v47 }
 0x370   :  { %8675 = vmatpush3.bf16.msra.mxu1 %v9348_v47 }
 0x371   :  { %8676 = vmatprep.subr.bf16.mxu1 %v9349_v48 }
 0x374   :  { %8677 = vmatpush3.bf16.msra.mxu1 %v9349_v48 }
 0x377   :  { %8679 = vmatmul.mubr.bf16.vlgmr.msra.gmra.mrb[16].mxu1 %v10125_v21 }
 0x40a   :  { %v10264_v24 = vpop.f32.mrb[8].mxu1 }
 0x40b   :  { %v10266_v25 = vpop.f32.mrb[9].mxu1 }
 0x40c   :  { %v10268_v26 = vpop.f32.mrb[10].mxu1 }
 0x40d   :  { %v613_v27 = vpack.c.bf16 %v10268_v26, %v10264_v24  ;;  %v10272_v28 = vpop.f32.mrb[11].mxu1  ;;  %v9360_v24 = vld [vmem:[%s12102_s29 + $0xa0] sm:$0xff]   ;;  %v9362_v26 = vld [vmem:[%s12102_s29 + $0xa8] sm:$0xff]  }
 0x40e   :  { %v612_v29 = vpack.c.bf16 %v10272_v28, %v10266_v25  ;;  %v9356_v25 = vld [vmem:[%s12102_s29 + $0x90] sm:$0xff]   ;;  %v9358_v28 = vld [vmem:[%s12102_s29 + $0x98] sm:$0xff]  }
 0x42a   :  { %v8640_v30 = vpop.f32.mrb[12].mxu1 }
 0x42b   :  { %v725_v32 = vpop.f32.mrb[13].mxu1  ;;  %v734_v34 = vadd.f32 %v8640_v30, %v7202_v31 }
 0x42c   :  { %v8641_v33 = vpop.f32.mrb[14].mxu1  ;;  %v726_v37 = vadd.f32 %v7202_v31, %v725_v32 }
 0x42d   :  { %v737_v35 = vadd.f32 %v8641_v33, %v7202_v31  ;;  %v728_v36 = vpop.f32.mrb[15].mxu1 }
 0x42e   :  { %v729_v38 = vadd.f32 %v7202_v31, %v728_v36 }
 0x42f   :  { %v985_v39 = vpack.c.bf16 %v737_v35, %v734_v34 }
 0x430   :  { %v984_v40 = vpack.c.bf16 %v729_v38, %v726_v37 }
 0x432   :  { %8686 = vmatprep.mubr.msk.bf16.mxu0 %vm447_vm0, %v984_v40  ;;  %v9350_v40 = vld [vmem:[%s12070_s8 + $0x10] sm:$0xff]  }
 0x433   :  { %8687 = vmatmul.mubr.msk.bf16.vlgmr.msra.gmra.mrb[12].mxu0 %vm447_vm0, %v985_v39  ;;  %8698 = vmatprep.subr.bf16.mxu0 %v9350_v40 }
 0x434   :  { %8699 = vmatpush3.bf16.msra.mxu0 %v9350_v40 }
 0x44a   :  { %v8680_v2 = vpop.f32.mrb[16].mxu1 }
 0x44b   :  { %v978_v3 = vadd.f32 %v8680_v2, %v7254_v1  ;;  %v969_v4 = vpop.f32.mrb[17].mxu1  ;;  %v9367_v2 = vld [vmem:[%s12103_s1 + $0xa8] sm:$0xff]  }
 0x44c   :  { %v970_v5 = vadd.f32 %v7254_v1, %v969_v4  ;;  %v8681_v6 = vpop.f32.mrb[18].mxu1  ;;  %v9369_v4 = vld [vmem:[%s12103_s1 + $0xb8] sm:$0xff]  }
 0x44d   :  { %v981_v7 = vadd.f32 %v8681_v6, %v7254_v1  ;;  %v972_v8 = vpop.f32.mrb[19].mxu1 }
 0x44e   :  { %v973_v9 = vadd.f32 %v7254_v1, %v972_v8  ;;  %v9365_v1 = vld [vmem:[%s12103_s1 + $0xa0] sm:$0xff]  }
 0x44f   :  { %v1096_v10 = vpack.c.bf16 %v981_v7, %v978_v3  ;;  %v9368_v3 = vld [vmem:[%s12103_s1 + $0xb0] sm:$0xff]  }
 0x450   :  { %v1095_v12 = vpack.c.bf16 %v973_v9, %v970_v5 }
 0x452   :  { %8690 = vmatprep.subr.bf16.mxu1 %v1095_v12 }
 0x453   :  { %8691 = vmatpush3.bf16.msra.mxu1 %v1095_v12  ;;  %v9353_v12 = vld [vmem:[%s12070_s8 + $0x8] sm:$0xff]  }
 0x454   :  { %8692 = vmatprep.subr.bf16.mxu1 %v1096_v10 }
 0x457   :  { %8693 = vmatpush3.bf16.msra.mxu1 %v1096_v10 }
 0x506   :  { %v8688_v49 = vpop.f32.mrb[12].mxu0 }
 0x507   :  { %v1034_v50 = vpop.f32.mrb[13].mxu0  ;;  %v1043_v56 = vadd.f32 %v8688_v49, %v10171_v54 }
 0x508   :  { %v1035_v51 = vadd.f32 %v1034_v50, %v10176_v55  ;;  %v8689_v52 = vpop.f32.mrb[14].mxu0 }
 0x509   :  { %v1037_v53 = vpop.f32.mrb[15].mxu0  ;;  %v1046_v61 = vadd.f32 %v8689_v52, %v10181_v57  ;;  %v1055_v63 = vsel %vm447_vm0, %v1043_v56, -inf }
 0x50a   :  { %v1038_v58 = vadd.f32 %v1037_v53, %v10187_v60  ;;  %v1049_v59 = vsel %vm447_vm0, %v1035_v51, -inf }
 0x50b   :  { %1050 = vmax.xlane.f32.xlu0 %v1049_v59  ;;  %v1058_v0 = vsel %vm447_vm0, %v1046_v61, -inf  ;;  %v9352_v59 = vld [vmem:[%s12070_s8] sm:$0xff]  }
 0x50c   :  { %v1052_v62 = vsel %vm447_vm0, %v1038_v58, -inf }
 0x50d   :  { %1053 = vmax.xlane.f32.xlu1 %v1052_v62  ;;  %v9359_v62 = vld [vmem:[%s12103_s1 + $0x88] sm:$0xff]  }
 0x50f   :  { %1056 = vmax.xlane.f32.xlu0 %v1055_v63  ;;  %v9361_v63 = vld [vmem:[%s12103_s1 + $0x90] sm:$0xff]  }
 0x511   :  { %1059 = vmax.xlane.f32.xlu1 %v1058_v0  ;;  %v9363_v0 = vld [vmem:[%s12103_s1 + $0x98] sm:$0xff]  }
 0x598   :  { %v1051_v13 = vpop.xlane.xlu0 %1050 }
 0x599   :  { %v1061_v14 = vsub.f32 %v1035_v51, %v1051_v13  ;;  %v9354_v13 = vld [vmem:[%s12102_s29 + $0x80] sm:$0xff]  }
 0x59a   :  { %v1054_v15 = vpop.xlane.xlu1 %1053 }
 0x59b   :  { %v1065_v16 = vmul.f32 1.442695, %v1061_v14  ;;  %v1062_v17 = vsub.f32 %v1038_v58, %v1054_v15  ;;  %v9351_v58 = vld [vmem:[%s12070_s8 + $0x18] sm:$0xff]   ;;  %v9355_v14 = vld [vmem:[%s12102_s29 + $0x88] sm:$0xff]   ;;  %v7296_v15 = vld [vmem:[%s12106_s25 + $0x2] ss:$0 sm:$0xff] }
 0x59c   :  { %v1057_v18 = vpop.xlane.xlu0 %1056  ;;  %8700 = vmatprep.subr.bf16.mxu0 %v9351_v58 }
 0x59d   :  { %9702 = vpow2.f32 %v1065_v16  ;;  %v1067_v19 = vmul.f32 1.442695, %v1062_v17  ;;  %v1063_v20 = vsub.f32 %v1043_v56, %v1057_v18  ;;  %8701 = vmatpush3.bf16.msra.mxu0 %v9351_v58 }
 0x59e   :  { %v1060_v22 = vpop.xlane.xlu1 %1059  ;;  %8706 = vmatprep.subr.bf16.mxu0 %v9352_v59 }
 0x59f   :  { %9704 = vpow2.f32 %v1067_v19  ;;  %v1069_v23 = vmul.f32 1.442695, %v1063_v20  ;;  %v1064_v30 = vsub.f32 %v1046_v61, %v1060_v22  ;;  %v9357_v61 = vld [vmem:[%s12103_s1 + $0x80] sm:$0xff]  }
 0x5a0   :  { %8714 = vmatprep.subr.bf16.mxu1 %v9357_v61 }
 0x5a1   :  { %9706 = vpow2.f32 %v1069_v23  ;;  %v1071_v31 = vmul.f32 1.442695, %v1064_v30 }
 0x5a3   :  { %9708 = vpow2.f32 %v1071_v31 }
 0x5a7   :  { %v9703_v32 = vpop.eup %9702 }
 0x5a8   :  { %v1073_v33 = vsel %vm447_vm0, %v9703_v32, 0.0 }
 0x5a9   :  { %v9705_v34 = vpop.eup %9704  ;;  %1074 = vadd.xlane.f32.xlu0 %v1073_v33 }
 0x5aa   :  { %v1076_v35 = vsel %vm447_vm0, %v9705_v34, 0.0 }
 0x5ab   :  { %v9707_v36 = vpop.eup %9706  ;;  %1077 = vadd.xlane.f32.xlu1 %v1076_v35 }
 0x5ac   :  { %v1079_v37 = vsel %vm447_vm0, %v9707_v36, 0.0 }
 0x5ad   :  { %v9709_v38 = vpop.eup %9708  ;;  %1080 = vadd.xlane.f32.xlu0 %v1079_v37 }
 0x5ae   :  { %v1082_v39 = vsel %vm447_vm0, %v9709_v38, 0.0 }
 0x5af   :  { %1083 = vadd.xlane.f32.xlu1 %v1082_v39 }
 0x636   :  { %v1075_v41 = vpop.xlane.xlu0 %1074 }
 0x637   :  { %9710 = vrcp.f32 %v1075_v41 }
 0x638   :  { %v1078_v42 = vpop.xlane.xlu1 %1077 }
 0x639   :  { %9712 = vrcp.f32 %v1078_v42 }
 0x63a   :  { %v1081_v43 = vpop.xlane.xlu0 %1080 }
 0x63b   :  { %9714 = vrcp.f32 %v1081_v43 }
 0x63c   :  { %v1084_v44 = vpop.xlane.xlu1 %1083 }
 0x63d   :  { %9716 = vrcp.f32 %v1084_v44 }
 0x641   :  { %v9711_v45 = vpop.eup %9710 }
 0x642   :  { %v1089_v47 = vmul.f32 %v9711_v45, %v9703_v32 }
 0x643   :  { %v9713_v46 = vpop.eup %9712 }
 0x644   :  { %v1090_v48 = vmul.f32 %v9713_v46, %v9705_v34  ;;  %v7322_v34 = vld [vmem:[%s12105_s23 + $0x2] ss:$0 sm:$0xff] }
 0x645   :  { %v9715_v49 = vpop.eup %9714  ;;  %v9370_v46 = vld [vmem:[%s12107_s27 + $0x80] sm:$0xff]  }
 0x646   :  { %v1093_v50 = vpack.c.bf16 %v1090_v48, %v1089_v47  ;;  %v1091_v52 = vmul.f32 %v9715_v49, %v9707_v36  ;;  %v9371_v47 = vld [vmem:[%s12107_s27 + $0x88] sm:$0xff]   ;;  %v9372_v48 = vld [vmem:[%s12107_s27 + $0x90] sm:$0xff]   ;;  %v9373_v49 = vld [vmem:[%s12107_s27 + $0x98] sm:$0xff]  }
 0x647   :  { %v9717_v51 = vpop.eup %9716 }
 0x648   :  { %v1092_v53 = vmul.f32 %v9717_v51, %v9709_v38  ;;  %8694 = vmatprep.mubr.msk.bf16.mxu1 %vm447_vm0, %v1093_v50  ;;  %v9374_v50 = vld [vmem:[%s12107_s27 + $0xa0] sm:$0xff]   ;;  %v9375_v51 = vld [vmem:[%s12107_s27 + $0xa8] sm:$0xff]  }
 0x64a   :  { %v1094_v56 = vpack.c.bf16 %v1092_v53, %v1091_v52  ;;  %v9376_v52 = vld [vmem:[%s12107_s27 + $0xb0] sm:$0xff]   ;;  %v9377_v53 = vld [vmem:[%s12107_s27 + $0xb8] sm:$0xff]  }
 0x64c   :  { %8695 = vmatmul.mubr.msk.bf16.vlgmr.msra.gmra.mrb[20].mxu1 %vm447_vm0, %v1094_v56 }
 0x64d   :  { %8730 = vmatprep.mubr.bf16.mxu1 %v10094_v11  ;;  %8715 = vmatpush3.bf16.msra.mxu1 %v9357_v61 }
 0x64e   :  { %8716 = vmatprep.subr.bf16.mxu1 %v9359_v62 }
 0x651   :  { %8717 = vmatpush3.bf16.msra.mxu1 %v9359_v62 }
 0x652   :  { %8718 = vmatprep.subr.bf16.mxu1 %v9361_v63 }
 0x655   :  { %8719 = vmatpush3.bf16.msra.mxu1 %v9361_v63 }
 0x656   :  { %8720 = vmatprep.subr.bf16.mxu1 %v9363_v0 }
 0x659   :  { %8721 = vmatpush3.bf16.msra.mxu1 %v9363_v0 }
 0x65a   :  { %8722 = vmatprep.subr.bf16.mxu1 %v9365_v1 }
 0x65d   :  { %8723 = vmatpush3.bf16.msra.mxu1 %v9365_v1 }
 0x65e   :  { %8724 = vmatprep.subr.bf16.mxu1 %v9367_v2 }
 0x661   :  { %8725 = vmatpush3.bf16.msra.mxu1 %v9367_v2 }
 0x662   :  { %8726 = vmatprep.subr.bf16.mxu1 %v9368_v3 }
 0x665   :  { %8727 = vmatpush3.bf16.msra.mxu1 %v9368_v3 }
 0x666   :  { %8728 = vmatprep.subr.bf16.mxu1 %v9369_v4 }
 0x669   :  { %8729 = vmatpush3.bf16.msra.mxu1 %v9369_v4 }
 0x66a   :  { %8754 = vmatprep.subr.bf16.mxu1 %v9370_v46 }
 0x66c   :  { %8731 = vmatmul.mubr.bf16.vlgmr.msra.gmra.mrb[24].mxu1 %v10125_v21 }
 0x66d   :  { %8770 = vmatprep.mubr.bf16.mxu1 %v10094_v11  ;;  %8755 = vmatpush3.bf16.msra.mxu1 %v9370_v46 }
 0x66e   :  { %8756 = vmatprep.subr.bf16.mxu1 %v9371_v47 }
 0x671   :  { %8757 = vmatpush3.bf16.msra.mxu1 %v9371_v47 }
 0x672   :  { %8758 = vmatprep.subr.bf16.mxu1 %v9372_v48 }
 0x675   :  { %8759 = vmatpush3.bf16.msra.mxu1 %v9372_v48 }
 0x676   :  { %8760 = vmatprep.subr.bf16.mxu1 %v9373_v49 }
 0x679   :  { %8761 = vmatpush3.bf16.msra.mxu1 %v9373_v49 }
 0x67a   :  { %8762 = vmatprep.subr.bf16.mxu1 %v9374_v50 }
 0x67d   :  { %8763 = vmatpush3.bf16.msra.mxu1 %v9374_v50  ;;  %v9379_v50 = vld [vmem:[%s12070_s8 + $0x28] sm:$0xff]  }
 0x67e   :  { %8764 = vmatprep.subr.bf16.mxu1 %v9375_v51 }
 0x681   :  { %8765 = vmatpush3.bf16.msra.mxu1 %v9375_v51  ;;  %v9380_v51 = vld [vmem:[%s12102_s29 + $0xc0] sm:$0xff]  }
 0x682   :  { %8766 = vmatprep.subr.bf16.mxu1 %v9376_v52 }
 0x685   :  { %8767 = vmatpush3.bf16.msra.mxu1 %v9376_v52  ;;  %v9383_v52 = vld [vmem:[%s12103_s1 + $0xc0] sm:$0xff]  }
 0x686   :  { %8768 = vmatprep.subr.bf16.mxu1 %v9377_v53 }
 0x689   :  { %8769 = vmatpush3.bf16.msra.mxu1 %v9377_v53  ;;  %v9385_v53 = vld [vmem:[%s12103_s1 + $0xc8] sm:$0xff]  }
 0x68a   :  { %8798 = vmatprep.subr.bf16.mxu1 %v9383_v52 }
 0x68c   :  { %8771 = vmatmul.mubr.bf16.vlgmr.msra.gmra.mrb[28].mxu1 %v10125_v21 }
 0x68d   :  { %8814 = vmatprep.mubr.bf16.mxu1 %v10094_v11  ;;  %8799 = vmatpush3.bf16.msra.mxu1 %v9383_v52  ;;  %v9909_v52 = vld [vmem:[%s12108_s26 + $0x18] sm:$0xff] }
 0x68e   :  { %8800 = vmatprep.subr.bf16.mxu1 %v9385_v53 }
 0x691   :  { %8801 = vmatpush3.bf16.msra.mxu1 %v9385_v53 }
 0x71f   :  { %v8696_v5 = vpop.f32.mrb[20].mxu1 }
 0x720   :  { %v1137_v6 = vpop.f32.mrb[21].mxu1 }
 0x721   :  { %v8697_v7 = vpop.f32.mrb[22].mxu1 }
 0x722   :  { %v1153_v8 = vpack.c.bf16 %v8697_v7, %v8696_v5  ;;  %v1140_v9 = vpop.f32.mrb[23].mxu1 }
 0x723   :  { %v1152_v10 = vpack.c.bf16 %v1140_v9, %v1137_v6 }
 0x725   :  { %8702 = vmatprep.mubr.msk.bf16.mxu0 %vm447_vm0, %v1152_v10 }
 0x726   :  { %8703 = vmatmul.mubr.msk.bf16.vlgmr.msra.gmra.mrb[16].mxu0 %vm447_vm0, %v1153_v8 }
 0x727   :  { %8707 = vmatpush3.bf16.msra.mxu0 %v9352_v59  ;;  %8710 = vmatprep.mubr.msk.bf16.mxu0 %vm447_vm0, %v612_v29  ;;  %v9366_v29 = vld [vmem:[%s12102_s29 + $0xb8] sm:$0xff]  }
 0x728   :  { %8708 = vmatprep.subr.bf16.mxu0 %v9353_v12 }
 0x72b   :  { %8709 = vmatpush3.bf16.msra.mxu0 %v9353_v12 }
 0x72c   :  { %8734 = vmatprep.subr.bf16.mxu0 %v9354_v13 }
 0x732   :  { %8711 = vmatmul.mubr.msk.bf16.vlgmr.msra.gmra.mrb[16].mxu0 %vm447_vm0, %v613_v27  ;;  %v9364_v27 = vld [vmem:[%s12102_s29 + $0xb0] sm:$0xff]  }
 0x733   :  { %8735 = vmatpush3.bf16.msra.mxu0 %v9354_v13  ;;  %8750 = vmatprep.mubr.bf16.mxu0 %v10094_v11 }
 0x734   :  { %8736 = vmatprep.subr.bf16.mxu0 %v9355_v14 }
 0x737   :  { %8737 = vmatpush3.bf16.msra.mxu0 %v9355_v14 }
 0x738   :  { %8738 = vmatprep.subr.bf16.mxu0 %v9356_v25 }
 0x73b   :  { %8739 = vmatpush3.bf16.msra.mxu0 %v9356_v25 }
 0x73c   :  { %8740 = vmatprep.subr.bf16.mxu0 %v9358_v28 }
 0x73f   :  { %8741 = vmatpush3.bf16.msra.mxu0 %v9358_v28  ;;  %v8732_v16 = vpop.f32.mrb[24].mxu1 }
 0x740   :  { %8742 = vmatprep.subr.bf16.mxu0 %v9360_v24  ;;  %v1409_v17 = vadd.f32 %v8732_v16, %v7296_v15  ;;  %v1400_v18 = vpop.f32.mrb[25].mxu1 }
 0x741   :  { %v1401_v19 = vadd.f32 %v7296_v15, %v1400_v18  ;;  %v8733_v20 = vpop.f32.mrb[26].mxu1 }
 0x742   :  { %v1412_v22 = vadd.f32 %v8733_v20, %v7296_v15  ;;  %v1403_v23 = vpop.f32.mrb[27].mxu1 }
 0x743   :  { %8743 = vmatpush3.bf16.msra.mxu0 %v9360_v24  ;;  %v1404_v30 = vadd.f32 %v7296_v15, %v1403_v23 }
 0x744   :  { %8744 = vmatprep.subr.bf16.mxu0 %v9362_v26  ;;  %v1660_v31 = vpack.c.bf16 %v1412_v22, %v1409_v17 }
 0x745   :  { %v1659_v32 = vpack.c.bf16 %v1404_v30, %v1401_v19 }
 0x747   :  { %8745 = vmatpush3.bf16.msra.mxu0 %v9362_v26 }
 0x748   :  { %8746 = vmatprep.subr.bf16.mxu0 %v9364_v27 }
 0x74b   :  { %8747 = vmatpush3.bf16.msra.mxu0 %v9364_v27 }
 0x74c   :  { %8748 = vmatprep.subr.bf16.mxu0 %v9366_v29 }
 0x74f   :  { %8749 = vmatpush3.bf16.msra.mxu0 %v9366_v29 }
 0x752   :  { %8751 = vmatmul.mubr.bf16.vlgmr.msra.gmra.mrb[20].mxu0 %v10125_v21 }
 0x753   :  { %8778 = vmatprep.mubr.msk.bf16.mxu0 %vm447_vm0, %v1659_v32 }
 0x825   :  { %v8752_v33 = vpop.f32.mrb[20].mxu0 }
 0x826   :  { %v1522_v35 = vpop.f32.mrb[21].mxu0  ;;  %v1531_v37 = vadd.f32 %v8752_v33, %v7322_v34 }
 0x827   :  { %v8753_v36 = vpop.f32.mrb[22].mxu0  ;;  %v1523_v40 = vadd.f32 %v7322_v34, %v1522_v35  ;;  %v9378_v35 = vld [vmem:[%s12070_s8 + $0x20] sm:$0xff]  }
 0x828   :  { %v1534_v38 = vadd.f32 %v8753_v36, %v7322_v34  ;;  %v1525_v39 = vpop.f32.mrb[23].mxu0 }
 0x829   :  { %v1526_v41 = vadd.f32 %v7322_v34, %v1525_v39 }
 0x82a   :  { %v1662_v42 = vpack.c.bf16 %v1534_v38, %v1531_v37 }
 0x82b   :  { %v1661_v43 = vpack.c.bf16 %v1526_v41, %v1523_v40 }
 0x82c   :  { %v1673_v45 = vsel %vm447_vm0, %v1662_v42, 0 }
 0x82d   :  { %9286 = vmatprep.subr.msk.bf16.mxu0 %vm447_vm0, %v1661_v43  ;;  %v1670_v44 = vsel %vm447_vm0, %v1661_v43, 0 }
 0x82e   :  { %8775 = vmatpush3.bf16.xpose.msra.mxu0 %v1670_v44 }
 0x82f   :  { %9287 = vmatprep.subr.msk.bf16.mxu0 %vm447_vm0, %v1662_v42 }
 0x836   :  { %8777 = vmatpush3.bf16.xpose.msra.mxu0 %v1673_v45 }
 0x83d   :  { %8779 = vmatmul.mubr.msk.bf16.vlgmr.msra.gmra.mrb[24].mxu0 %vm447_vm0, %v1660_v31 }
 0x910   :  { %v8780_v56 = vpop.f32.mrb[24].mxu0 }
 0x911   :  { %v1709_v58 = vpop.f32.mrb[25].mxu0  ;;  %v1718_v63 = vadd.f32 %v8780_v56, %v10171_v54  ;;  %v7348_v54 = vld [vmem:[%s12069_s7 + $0x2] ss:$0 sm:$0xff]  ;;  %v9387_v56 = vld [vmem:[%s12103_s1 + $0xd0] sm:$0xff]  }
 0x912   :  { %v1710_v59 = vadd.f32 %v1709_v58, %v10176_v55  ;;  %v8781_v61 = vpop.f32.mrb[26].mxu0  ;;  %v8772_v55 = vpop.f32.mrb[28].mxu1  ;;  %8802 = vmatprep.subr.bf16.mxu1 %v9387_v56  ;;  %v9389_v58 = vld [vmem:[%s12103_s1 + $0xd8] sm:$0xff]  }
 0x913   :  { %v1712_v62 = vpop.f32.mrb[27].mxu0  ;;  %v1721_v2 = vadd.f32 %v8781_v61, %v10181_v57  ;;  %v1730_v4 = vsel %vm447_vm0, %v1718_v63, -inf  ;;  %v1644_v6 = vpop.f32.mrb[29].mxu1  ;;  %8803 = vmatpush3.bf16.msra.mxu1 %v9387_v56  ;;  %v9393_v61 = vld [vmem:[%s12103_s1 + $0xe8] sm:$0xff]  }
 0x914   :  { %v1713_v0 = vadd.f32 %v1712_v62, %v10187_v60  ;;  %v1724_v1 = vsel %vm447_vm0, %v1710_v59, -inf  ;;  %v1653_v60 = vadd.f32 %v8772_v55, %v7348_v54  ;;  %v1645_v7 = vadd.f32 %v7348_v54, %v1644_v6  ;;  %v8773_v8 = vpop.f32.mrb[30].mxu1  ;;  %8804 = vmatprep.subr.bf16.mxu1 %v9389_v58  ;;  %v9394_v62 = vld [vmem:[%s12103_s1 + $0xf0] sm:$0xff]   ;;  %v9386_v6 = vld [vmem:[%s12102_s29 + $0xe0] sm:$0xff]  }
 0x915   :  { %1725 = vmax.xlane.f32.xlu0 %v1724_v1  ;;  %v1733_v5 = vsel %vm447_vm0, %v1721_v2, -inf  ;;  %v1656_v9 = vadd.f32 %v8773_v8, %v7348_v54  ;;  %v1647_v57 = vpop.f32.mrb[31].mxu1  ;;  %v9382_v55 = vld [vmem:[%s12102_s29 + $0xd0] sm:$0xff]   ;;  %v9392_v8 = vld [vmem:[%s12102_s29 + $0xf8] sm:$0xff]  }
 0x916   :  { %v1727_v3 = vsel %vm447_vm0, %v1713_v0, -inf  ;;  %v1648_v10 = vadd.f32 %v7348_v54, %v1647_v57  ;;  %v9381_v54 = vld [vmem:[%s12102_s29 + $0xc8] sm:$0xff]  }
 0x917   :  { %1728 = vmax.xlane.f32.xlu1 %v1727_v3  ;;  %v1771_v12 = vpack.c.bf16 %v1656_v9, %v1653_v60  ;;  %8805 = vmatpush3.bf16.msra.mxu1 %v9389_v58  ;;  %v9384_v60 = vld [vmem:[%s12102_s29 + $0xd8] sm:$0xff]   ;;  %v7386_v9 = vld [vmem:[%s12106_s25 + $0x3] ss:$0 sm:$0xff] }
 0x918   :  { %v1770_v13 = vpack.c.bf16 %v1648_v10, %v1645_v7  ;;  %v9390_v7 = vld [vmem:[%s12102_s29 + $0xf0] sm:$0xff]  }
 0x919   :  { %1731 = vmax.xlane.f32.xlu0 %v1730_v4 }
 0x91a   :  { %8782 = vmatprep.subr.bf16.mxu0 %v1770_v13 }
 0x91b   :  { %1734 = vmax.xlane.f32.xlu1 %v1733_v5  ;;  %8783 = vmatpush3.bf16.msra.mxu0 %v1770_v13 }
 0x91c   :  { %8784 = vmatprep.subr.bf16.mxu0 %v1771_v12 }
 0x91f   :  { %8785 = vmatpush3.bf16.msra.mxu0 %v1771_v12 }
 0x920   :  { %8790 = vmatprep.subr.bf16.mxu0 %v9378_v35 }
 0x9a2   :  { %v1726_v14 = vpop.xlane.xlu0 %1725 }
 0x9a3   :  { %v1736_v25 = vsub.f32 %v1710_v59, %v1726_v14  ;;  %v9391_v59 = vld [vmem:[%s12103_s1 + $0xe0] sm:$0xff]  }
 0x9a4   :  { %v1729_v28 = vpop.xlane.xlu1 %1728  ;;  %8806 = vmatprep.subr.bf16.mxu1 %v9391_v59 }
 0x9a5   :  { %v1740_v24 = vmul.f32 1.442695, %v1736_v25  ;;  %v1737_v26 = vsub.f32 %v1713_v0, %v1729_v28  ;;  %8807 = vmatpush3.bf16.msra.mxu1 %v9391_v59 }
 0x9a6   :  { %v1732_v27 = vpop.xlane.xlu0 %1731  ;;  %8808 = vmatprep.subr.bf16.mxu1 %v9393_v61 }
 0x9a7   :  { %9718 = vpow2.f32 %v1740_v24  ;;  %v1742_v29 = vmul.f32 1.442695, %v1737_v26  ;;  %v1738_v15 = vsub.f32 %v1718_v63, %v1732_v27  ;;  %v9395_v63 = vld [vmem:[%s12103_s1 + $0xf8] sm:$0xff]  }
 0x9a8   :  { %v1735_v16 = vpop.xlane.xlu1 %1734 }
 0x9a9   :  { %9720 = vpow2.f32 %v1742_v29  ;;  %v1744_v17 = vmul.f32 1.442695, %v1738_v15  ;;  %v1739_v18 = vsub.f32 %v1721_v2, %v1735_v16  ;;  %8809 = vmatpush3.bf16.msra.mxu1 %v9393_v61  ;;  %v7412_v15 = vld [vmem:[%s12105_s23 + $0x3] ss:$0 sm:$0xff] }
 0x9aa   :  { %8810 = vmatprep.subr.bf16.mxu1 %v9394_v62  ;;  %v7438_v61 = vld [vmem:[%s12069_s7 + $0x3] ss:$0 sm:$0xff] }
 0x9ab   :  { %9722 = vpow2.f32 %v1744_v17  ;;  %v1746_v19 = vmul.f32 1.442695, %v1739_v18 }
 0x9ad   :  { %9724 = vpow2.f32 %v1746_v19  ;;  %8811 = vmatpush3.bf16.msra.mxu1 %v9394_v62 }
 0x9ae   :  { %8812 = vmatprep.subr.bf16.mxu1 %v9395_v63 }
 0x9b1   :  { %v9719_v20 = vpop.eup %9718  ;;  %8813 = vmatpush3.bf16.msra.mxu1 %v9395_v63 }
 0x9b2   :  { %v1748_v22 = vsel %vm447_vm0, %v9719_v20, 0.0 }
 0x9b3   :  { %v9721_v23 = vpop.eup %9720  ;;  %1749 = vadd.xlane.f32.xlu0 %v1748_v22 }
 0x9b4   :  { %v1751_v30 = vsel %vm447_vm0, %v9721_v23, 0.0  ;;  %8815 = vmatmul.mubr.bf16.vlgmr.msra.gmra.mrb[32].mxu1 %v10125_v21 }
 0x9b5   :  { %v9723_v31 = vpop.eup %9722  ;;  %1752 = vadd.xlane.f32.xlu1 %v1751_v30  ;;  %8854 = vmatprep.mubr.bf16.mxu1 %v10094_v11 }
 0x9b6   :  { %v1754_v32 = vsel %vm447_vm0, %v9723_v31, 0.0 }
 0x9b7   :  { %v9725_v33 = vpop.eup %9724  ;;  %1755 = vadd.xlane.f32.xlu0 %v1754_v32 }
 0x9b8   :  { %v1757_v34 = vsel %vm447_vm0, %v9725_v33, 0.0 }
 0x9b9   :  { %1758 = vadd.xlane.f32.xlu1 %v1757_v34  ;;  %v9396_v34 = vld [vmem:[%s12107_s27 + $0xc0] sm:$0xff]  }
 0x9ba   :  { %8838 = vmatprep.subr.bf16.mxu1 %v9396_v34 }
 0x9bb   :  { %8839 = vmatpush3.bf16.msra.mxu1 %v9396_v34 }
 0xa40   :  { %v1750_v36 = vpop.xlane.xlu0 %1749 }
 0xa41   :  { %9726 = vrcp.f32 %v1750_v36  ;;  %v9398_v36 = vld [vmem:[%s12107_s27 + $0xd0] sm:$0xff]  }
 0xa42   :  { %v1753_v37 = vpop.xlane.xlu1 %1752 }
 0xa43   :  { %9728 = vrcp.f32 %v1753_v37  ;;  %v9399_v37 = vld [vmem:[%s12107_s27 + $0xd8] sm:$0xff]  }
 0xa44   :  { %v1756_v38 = vpop.xlane.xlu0 %1755 }
 0xa45   :  { %9730 = vrcp.f32 %v1756_v38  ;;  %v9400_v38 = vld [vmem:[%s12107_s27 + $0xe0] sm:$0xff]  }
 0xa46   :  { %v1759_v39 = vpop.xlane.xlu1 %1758 }
 0xa47   :  { %9732 = vrcp.f32 %v1759_v39  ;;  %v9401_v39 = vld [vmem:[%s12107_s27 + $0xe8] sm:$0xff]  }
 0xa4b   :  { %v9727_v40 = vpop.eup %9726 }
 0xa4c   :  { %v1764_v42 = vmul.f32 %v9727_v40, %v9719_v20  ;;  %v9402_v40 = vld [vmem:[%s12107_s27 + $0xf0] sm:$0xff]  }
 0xa4d   :  { %v9729_v41 = vpop.eup %9728 }
 0xa4e   :  { %v1765_v43 = vmul.f32 %v9729_v41, %v9721_v23  ;;  %v9403_v41 = vld [vmem:[%s12107_s27 + $0xf8] sm:$0xff]  }
 0xa4f   :  { %v9731_v44 = vpop.eup %9730 }
 0xa50   :  { %v1768_v45 = vpack.c.bf16 %v1765_v43, %v1764_v42  ;;  %v1766_v47 = vmul.f32 %v9731_v44, %v9723_v31  ;;  %v9906_v44 = vld [vmem:[%s12108_s26] sm:$0xff] }
 0xa51   :  { %v9733_v46 = vpop.eup %9732 }
 0xa52   :  { %v1767_v48 = vmul.f32 %v9733_v46, %v9725_v33  ;;  %8786 = vmatprep.mubr.msk.bf16.mxu0 %vm447_vm0, %v1768_v45 }
 0xa54   :  { %v1769_v49 = vpack.c.bf16 %v1767_v48, %v1766_v47  ;;  %v9907_v48 = vld [vmem:[%s12108_s26 + $0x10] sm:$0xff] }
 0xa56   :  { %8787 = vmatmul.mubr.msk.bf16.vlgmr.msra.gmra.mrb[28].mxu0 %vm447_vm0, %v1769_v49 }
 0xa57   :  { %8791 = vmatpush3.bf16.msra.mxu0 %v9378_v35  ;;  %v9397_v35 = vld [vmem:[%s12107_s27 + $0xc8] sm:$0xff]  }
 0xa58   :  { %8792 = vmatprep.subr.bf16.mxu0 %v9379_v50  ;;  %8840 = vmatprep.subr.bf16.mxu1 %v9397_v35 }
 0xa59   :  { %8841 = vmatpush3.bf16.msra.mxu1 %v9397_v35 }
 0xa5a   :  { %8842 = vmatprep.subr.bf16.mxu1 %v9398_v36 }
 0xa5b   :  { %8793 = vmatpush3.bf16.msra.mxu0 %v9379_v50  ;;  %v9908_v50 = vld [vmem:[%s12108_s26 + $0x8] sm:$0xff] }
 0xa5c   :  { %8818 = vmatprep.subr.bf16.mxu0 %v9380_v51 }
 0xa5d   :  { %8843 = vmatpush3.bf16.msra.mxu1 %v9398_v36 }
 0xa5e   :  { %8844 = vmatprep.subr.bf16.mxu1 %v9399_v37 }
 0xa61   :  { %8845 = vmatpush3.bf16.msra.mxu1 %v9399_v37 }
 0xa62   :  { %8846 = vmatprep.subr.bf16.mxu1 %v9400_v38 }
 0xa65   :  { %8847 = vmatpush3.bf16.msra.mxu1 %v9400_v38 }
 0xa66   :  { %8848 = vmatprep.subr.bf16.mxu1 %v9401_v39 }
 0xa69   :  { %8849 = vmatpush3.bf16.msra.mxu1 %v9401_v39 }
 0xa6a   :  { %8850 = vmatprep.subr.bf16.mxu1 %v9402_v40 }
 0xa6d   :  { %8851 = vmatpush3.bf16.msra.mxu1 %v9402_v40  ;;  %v9405_v40 = vld [vmem:[%s12070_s8 + $0x38] sm:$0xff]  }
 0xa6e   :  { %8852 = vmatprep.subr.bf16.mxu1 %v9403_v41 }
 0xa71   :  { %8853 = vmatpush3.bf16.msra.mxu1 %v9403_v41 }
 0xa74   :  { %8855 = vmatmul.mubr.bf16.vlgmr.msra.gmra.mrb[36].mxu1 %v10125_v21 }
 0xa87   :  { %v8816_v57 = vpop.f32.mrb[32].mxu1 }
 0xa88   :  { %v2021_v10 = vadd.f32 %v8816_v57, %v7386_v9  ;;  %v2012_v12 = vpop.f32.mrb[33].mxu1 }
 0xa89   :  { %v2013_v13 = vadd.f32 %v7386_v9, %v2012_v12  ;;  %v8817_v14 = vpop.f32.mrb[34].mxu1 }
 0xa8a   :  { %v2024_v25 = vadd.f32 %v8817_v14, %v7386_v9  ;;  %v2015_v28 = vpop.f32.mrb[35].mxu1 }
 0xa8b   :  { %v2016_v24 = vadd.f32 %v7386_v9, %v2015_v28 }
 0xa8c   :  { %v2272_v26 = vpack.c.bf16 %v2024_v25, %v2021_v10 }
 0xa8d   :  { %v2271_v27 = vpack.c.bf16 %v2016_v24, %v2013_v13 }
 0xb29   :  { %v8788_v0 = vpop.f32.mrb[28].mxu0 }
 0xb2a   :  { %v1812_v1 = vpop.f32.mrb[29].mxu0 }
 0xb2b   :  { %v8789_v2 = vpop.f32.mrb[30].mxu0 }
 0xb2c   :  { %v1828_v3 = vpack.c.bf16 %v8789_v2, %v8788_v0  ;;  %v1815_v4 = vpop.f32.mrb[31].mxu0 }
 0xb2d   :  { %v1827_v5 = vpack.c.bf16 %v1815_v4, %v1812_v1 }
 0xb2f   :  { %8794 = vmatprep.mubr.msk.bf16.mxu0 %vm447_vm0, %v1827_v5 }
 0xb30   :  { %8795 = vmatmul.mubr.msk.bf16.vlgmr.msra.gmra.mrb[16].mxu0 %vm447_vm0, %v1828_v3 }
 0xb31   :  { %8819 = vmatpush3.bf16.msra.mxu0 %v9380_v51  ;;  %8834 = vmatprep.mubr.bf16.mxu0 %v10094_v11  ;;  %v9388_v11 = vld [vmem:[%s12102_s29 + $0xe8] sm:$0xff]  }
 0xb32   :  { %8820 = vmatprep.subr.bf16.mxu0 %v9381_v54 }
 0xb35   :  { %8821 = vmatpush3.bf16.msra.mxu0 %v9381_v54 }
 0xb36   :  { %8822 = vmatprep.subr.bf16.mxu0 %v9382_v55 }
 0xb39   :  { %8823 = vmatpush3.bf16.msra.mxu0 %v9382_v55 }
 0xb3a   :  { %8824 = vmatprep.subr.bf16.mxu0 %v9384_v60 }
 0xb3d   :  { %8825 = vmatpush3.bf16.msra.mxu0 %v9384_v60 }
 0xb3e   :  { %8826 = vmatprep.subr.bf16.mxu0 %v9386_v6 }
 0xb41   :  { %8827 = vmatpush3.bf16.msra.mxu0 %v9386_v6 }
 0xb42   :  { %8828 = vmatprep.subr.bf16.mxu0 %v9388_v11 }
 0xb45   :  { %8829 = vmatpush3.bf16.msra.mxu0 %v9388_v11 }
 0xb46   :  { %8830 = vmatprep.subr.bf16.mxu0 %v9390_v7 }
 0xb47   :  { %v8856_v62 = vpop.f32.mrb[36].mxu1 }
 0xb48   :  { %v2265_v63 = vadd.f32 %v8856_v62, %v7438_v61  ;;  %v2256_v0 = vpop.f32.mrb[37].mxu1 }
 0xb49   :  { %8831 = vmatpush3.bf16.msra.mxu0 %v9390_v7  ;;  %v2257_v1 = vadd.f32 %v7438_v61, %v2256_v0  ;;  %v8857_v2 = vpop.f32.mrb[38].mxu1 }
 0xb4a   :  { %8832 = vmatprep.subr.bf16.mxu0 %v9392_v8  ;;  %v2268_v3 = vadd.f32 %v8857_v2, %v7438_v61  ;;  %v2259_v4 = vpop.f32.mrb[39].mxu1 }
 0xb4b   :  { %v2260_v5 = vadd.f32 %v7438_v61, %v2259_v4  ;;  %v9911_v61 = vld [vmem:[%s12104_s24 + $0x8] sm:$0xff]  ;;  %v9408_v4 = vld [vmem:[%s12074_s12 + $0x4] ss:$16 sps:$4 sm:$0xff]  }
 0xb4c   :  { %v2383_v54 = vpack.c.bf16 %v2268_v3, %v2265_v63  ;;  %v9912_v63 = vld [vmem:[%s12104_s24 + $0x10] sm:$0xff]  ;;  %2815 = vmatprep.subr.bf16.mxu1 %v9408_v4 }
 0xb4d   :  { %8833 = vmatpush3.bf16.msra.mxu0 %v9392_v8  ;;  %v2382_v55 = vpack.c.bf16 %v2260_v5, %v2257_v1  ;;  %v9913_v1 = vld [vmem:[%s12104_s24 + $0x18] sm:$0xff]  ;;  %v9406_v3 = vld [vmem:[%s12074_s12] ss:$16 sps:$4 sm:$0xff]  }
 0xb4e   :  { %v9409_v5 = vld [vmem:[%s12074_s12 + $0x8] ss:$16 sps:$4 sm:$0xff]   ;;  %2816 = vmatpush1.bf16.msra.mxu1 %v9406_v3 }
 0xb50   :  { %8835 = vmatmul.mubr.bf16.vlgmr.msra.gmra.mrb[32].mxu0 %v10125_v21 }
 0xb51   :  { %8862 = vmatprep.mubr.msk.bf16.mxu0 %vm447_vm0, %v2271_v27 }
 0xc23   :  { %v8836_v29 = vpop.f32.mrb[32].mxu0 }
 0xc24   :  { %v2134_v16 = vpop.f32.mrb[33].mxu0  ;;  %v2143_v18 = vadd.f32 %v8836_v29, %v7412_v15 }
 0xc25   :  { %v8837_v17 = vpop.f32.mrb[34].mxu0  ;;  %v2135_v22 = vadd.f32 %v7412_v15, %v2134_v16 }
 0xc26   :  { %v2146_v19 = vadd.f32 %v8837_v17, %v7412_v15  ;;  %v2137_v20 = vpop.f32.mrb[35].mxu0 }
 0xc27   :  { %v2138_v23 = vadd.f32 %v7412_v15, %v2137_v20 }
 0xc28   :  { %v2274_v30 = vpack.c.bf16 %v2146_v19, %v2143_v18  ;;  %v9404_v18 = vld [vmem:[%s12070_s8 + $0x30] sm:$0xff]  }
 0xc29   :  { %v2273_v31 = vpack.c.bf16 %v2138_v23, %v2135_v22 }
 0xc2a   :  { %v2285_v33 = vsel %vm447_vm0, %v2274_v30, 0 }
 0xc2b   :  { %9288 = vmatprep.subr.msk.bf16.mxu0 %vm447_vm0, %v2273_v31  ;;  %v2282_v32 = vsel %vm447_vm0, %v2273_v31, 0 }
 0xc2c   :  { %8859 = vmatpush3.bf16.xpose.msra.mxu0 %v2282_v32 }
 0xc2d   :  { %9289 = vmatprep.subr.msk.bf16.mxu0 %vm447_vm0, %v2274_v30 }
 0xc34   :  { %8861 = vmatpush3.bf16.xpose.msra.mxu0 %v2285_v33 }
 0xc35   :  { %8866 = vmatprep.subr.bf16.mxu0 %v2382_v55 }
 0xc3b   :  { %8863 = vmatmul.mubr.msk.bf16.vlgmr.msra.gmra.mrb[36].mxu0 %vm447_vm0, %v2272_v26 }
 0xc3c   :  { %8867 = vmatpush3.bf16.msra.mxu0 %v2382_v55  ;;  %v9414_v55 = vld [vmem:[%s12074_s12 + $0x24] ss:$16 sps:$4 sm:$0xff]  }
 0xc3d   :  { %8868 = vmatprep.subr.bf16.mxu0 %v2383_v54  ;;  %2817 = vmatprep.subr.bf16.mxu1 %v9414_v55  ;;  %v7461_v55 = vld [vmem:[%s12073_s11] ss:$0 sm:$0xff] }
 0xc40   :  { %8869 = vmatpush3.bf16.msra.mxu0 %v2383_v54  ;;  %v9411_v54 = vld [vmem:[%s12074_s12 + $0xc] ss:$16 sps:$4 sm:$0xff]  }
 0xc41   :  { %8874 = vmatprep.subr.bf16.mxu0 %v9404_v18 }
 0xd0e   :  { %v8864_v42 = vpop.f32.mrb[36].mxu0 }
 0xd0f   :  { %v2321_v43 = vpop.f32.mrb[37].mxu0  ;;  %v2330_v49 = vadd.f32 %v9907_v48, %v8864_v42 }
 0xd10   :  { %v2322_v45 = vadd.f32 %v9906_v44, %v2321_v43  ;;  %v8865_v46 = vpop.f32.mrb[38].mxu0 }
 0xd11   :  { %v2324_v47 = vpop.f32.mrb[39].mxu0  ;;  %v2333_v53 = vadd.f32 %v9909_v52, %v8865_v46  ;;  %v2342_v58 = vsel %vm447_vm0, %v2330_v49, -inf }
 0xd12   :  { %v2325_v51 = vadd.f32 %v9908_v50, %v2324_v47  ;;  %v2336_v21 = vsel %vm447_vm0, %v2322_v45, -inf  ;;  %v7459_v47 = vld [vmem:[%s12071_s9] ss:$0 sm:$0xff] }
 0xd13   :  { %2337 = vmax.xlane.f32.xlu0 %v2336_v21  ;;  %v2345_v59 = vsel %vm447_vm0, %v2333_v53, -inf }
 0xd14   :  { %v2339_v56 = vsel %vm447_vm0, %v2325_v51, -inf }
 0xd15   :  { %2340 = vmax.xlane.f32.xlu1 %v2339_v56  ;;  %v9910_v56 = vld [vmem:[%s12104_s24] sm:$0xff] }
 0xd17   :  { %2343 = vmax.xlane.f32.xlu0 %v2342_v58 }
 0xd19   :  { %2346 = vmax.xlane.f32.xlu1 %v2345_v59 }
 0xda0   :  { %v2338_v60 = vpop.xlane.xlu0 %2337 }
 0xda1   :  { %v2348_v6 = vsub.f32 %v2322_v45, %v2338_v60  ;;  %v9417_v60 = vld [vmem:[%s12074_s12 + $0x2c] ss:$16 sps:$4 sm:$0xff]  }
 0xda2   :  { %v2341_v11 = vpop.xlane.xlu1 %2340 }
 0xda3   :  { %v2352_v7 = vmul.f32 1.442695, %v2348_v6  ;;  %v2349_v8 = vsub.f32 %v2325_v51, %v2341_v11  ;;  %v9412_v6 = vld [vmem:[%s12074_s12 + $0x20] ss:$16 sps:$4 sm:$0xff]   ;;  %v9415_v11 = vld [vmem:[%s12074_s12 + $0x28] ss:$16 sps:$4 sm:$0xff]  }
 0xda4   :  { %v2344_v9 = vpop.xlane.xlu0 %2343  ;;  %2818 = vmatpush1.bf16.msra.mxu1 %v9412_v6 }
 0xda5   :  { %9734 = vpow2.f32 %v2352_v7  ;;  %v2354_v57 = vmul.f32 1.442695, %v2349_v8  ;;  %v2350_v10 = vsub.f32 %v2330_v49, %v2344_v9 }
 0xda6   :  { %v2347_v12 = vpop.xlane.xlu1 %2346 }
 0xda7   :  { %9736 = vpow2.f32 %v2354_v57  ;;  %v2356_v13 = vmul.f32 1.442695, %v2350_v10  ;;  %v2351_v14 = vsub.f32 %v2333_v53, %v2347_v12 }
 0xda9   :  { %9738 = vpow2.f32 %v2356_v13  ;;  %v2358_v25 = vmul.f32 1.442695, %v2351_v14 }
 0xdab   :  { %9740 = vpow2.f32 %v2358_v25 }
 0xdaf   :  { %v9735_v28 = vpop.eup %9734 }
 0xdb0   :  { %v2360_v24 = vsel %vm447_vm0, %v9735_v28, 0.0 }
 0xdb1   :  { %v9737_v26 = vpop.eup %9736  ;;  %2361 = vadd.xlane.f32.xlu0 %v2360_v24 }
 0xdb2   :  { %v2363_v27 = vsel %vm447_vm0, %v9737_v26, 0.0 }
 0xdb3   :  { %v9739_v29 = vpop.eup %9738  ;;  %2364 = vadd.xlane.f32.xlu1 %v2363_v27 }
 0xdb4   :  { %v2366_v15 = vsel %vm447_vm0, %v9739_v29, 0.0 }
 0xdb5   :  { %v9741_v16 = vpop.eup %9740  ;;  %2367 = vadd.xlane.f32.xlu0 %v2366_v15 }
 0xdb6   :  { %v2369_v17 = vsel %vm447_vm0, %v9741_v16, 0.0 }
 0xdb7   :  { %2370 = vadd.xlane.f32.xlu1 %v2369_v17  ;;  %v9420_v17 = vld [vmem:[%s12074_s12 + $0x44] ss:$16 sps:$4 sm:$0xff]  }
 0xdb8   :  { %2819 = vmatprep.subr.bf16.mxu1 %v9420_v17  ;;  %v9461_v17 = vld [vmem:[%s12076_s14 + $0x88] sm:$0xff]  }
 0xe3e   :  { %v2362_v19 = vpop.xlane.xlu0 %2361 }
 0xe3f   :  { %9742 = vrcp.f32 %v2362_v19  ;;  %v9418_v19 = vld [vmem:[%s12074_s12 + $0x40] ss:$16 sps:$4 sm:$0xff]  }
 0xe40   :  { %v2365_v20 = vpop.xlane.xlu1 %2364  ;;  %2820 = vmatpush1.bf16.msra.mxu1 %v9418_v19  ;;  %v9463_v19 = vld [vmem:[%s12076_s14 + $0xd0] sm:$0xff]  }
 0xe41   :  { %9744 = vrcp.f32 %v2365_v20  ;;  %v9421_v20 = vld [vmem:[%s12074_s12 + $0x48] ss:$16 sps:$4 sm:$0xff]  }
 0xe42   :  { %v2368_v22 = vpop.xlane.xlu0 %2367 }
 0xe43   :  { %9746 = vrcp.f32 %v2368_v22  ;;  %v9426_v22 = vld [vmem:[%s12074_s12 + $0x64] ss:$16 sps:$4 sm:$0xff]  }
 0xe44   :  { %v2371_v23 = vpop.xlane.xlu1 %2370  ;;  %2821 = vmatprep.subr.bf16.mxu1 %v9426_v22  ;;  %v9465_v22 = vld [vmem:[%s12076_s14 + $0x90] sm:$0xff]  }
 0xe45   :  { %9748 = vrcp.f32 %v2371_v23  ;;  %v9429_v23 = vld [vmem:[%s12074_s12 + $0x6c] ss:$16 sps:$4 sm:$0xff]  }
 0xe49   :  { %v9743_v30 = vpop.eup %9742 }
 0xe4a   :  { %v2376_v32 = vmul.f32 %v9743_v30, %v9735_v28  ;;  %v9424_v30 = vld [vmem:[%s12074_s12 + $0x60] ss:$16 sps:$4 sm:$0xff]  }
 0xe4b   :  { %v9745_v31 = vpop.eup %9744  ;;  %2822 = vmatpush1.bf16.msra.mxu1 %v9424_v30  ;;  %v9467_v30 = vld [vmem:[%s12076_s14 + $0xd8] sm:$0xff]  }
 0xe4c   :  { %v2377_v33 = vmul.f32 %v9745_v31, %v9737_v26  ;;  %v9427_v31 = vld [vmem:[%s12074_s12 + $0x68] ss:$16 sps:$4 sm:$0xff]  }
 0xe4d   :  { %v9747_v34 = vpop.eup %9746 }
 0xe4e   :  { %v2380_v35 = vpack.c.bf16 %v2377_v33, %v2376_v32  ;;  %v2378_v37 = vmul.f32 %v9747_v34, %v9739_v29  ;;  %v9432_v32 = vld [vmem:[%s12074_s12 + $0x84] ss:$16 sps:$4 sm:$0xff]   ;;  %v9435_v33 = vld [vmem:[%s12074_s12 + $0x8c] ss:$16 sps:$4 sm:$0xff]   ;;  %v9430_v34 = vld [vmem:[%s12074_s12 + $0x80] ss:$16 sps:$4 sm:$0xff]  }
 0xe4f   :  { %v9749_v36 = vpop.eup %9748  ;;  %2823 = vmatprep.subr.bf16.mxu1 %v9432_v32  ;;  %v9469_v32 = vld [vmem:[%s12076_s14 + $0x98] sm:$0xff]  }
 0xe50   :  { %v2379_v38 = vmul.f32 %v9749_v36, %v9741_v16  ;;  %8870 = vmatprep.mubr.msk.bf16.mxu0 %vm447_vm0, %v2380_v35  ;;  %v9433_v35 = vld [vmem:[%s12074_s12 + $0x88] ss:$16 sps:$4 sm:$0xff]   ;;  %2824 = vmatpush1.bf16.msra.mxu1 %v9430_v34  ;;  %v9438_v36 = vld [vmem:[%s12074_s12 + $0xa4] ss:$16 sps:$4 sm:$0xff]  }
 0xe51   :  { %2825 = vmatprep.subr.bf16.mxu1 %v9438_v36  ;;  %v9471_v34 = vld [vmem:[%s12076_s14 + $0xe0] sm:$0xff]  }
 0xe52   :  { %v2381_v39 = vpack.c.bf16 %v2379_v38, %v2378_v37  ;;  %v9441_v37 = vld [vmem:[%s12074_s12 + $0xac] ss:$16 sps:$4 sm:$0xff]   ;;  %v9436_v38 = vld [vmem:[%s12074_s12 + $0xa0] ss:$16 sps:$4 sm:$0xff]  }
 0xe53   :  { %v9473_v36 = vld [vmem:[%s12076_s14 + $0xa0] sm:$0xff]  }
 0xe54   :  { %8871 = vmatmul.mubr.msk.bf16.vlgmr.msra.gmra.mrb[40].mxu0 %vm447_vm0, %v2381_v39  ;;  %v9439_v39 = vld [vmem:[%s12074_s12 + $0xa8] ss:$16 sps:$4 sm:$0xff]   ;;  %2826 = vmatpush1.bf16.msra.mxu1 %v9436_v38 }
 0xe55   :  { %8875 = vmatpush3.bf16.msra.mxu0 %v9404_v18  ;;  %v9423_v18 = vld [vmem:[%s12074_s12 + $0x4c] ss:$16 sps:$4 sm:$0xff]  }
 0xe56   :  { %8876 = vmatprep.subr.bf16.mxu0 %v9405_v40  ;;  %v9475_v38 = vld [vmem:[%s12076_s14 + $0xe8] sm:$0xff]  }
 0xe59   :  { %8877 = vmatpush3.bf16.msra.mxu0 %v9405_v40  ;;  %v9444_v40 = vld [vmem:[%s12074_s12 + $0xc4] ss:$16 sps:$4 sm:$0xff]  }
 0xe5a   :  { %2868 = vmatprep.subr.bf16.mxu0 %v9411_v54  ;;  %2827 = vmatprep.subr.bf16.mxu1 %v9444_v40  ;;  %v9477_v40 = vld [vmem:[%s12076_s14 + $0xa8] sm:$0xff]  }
 0xf27   :  { %v8872_v41 = vpop.f32.mrb[40].mxu0 }
 0xf28   :  { %v2424_v42 = vpop.f32.mrb[41].mxu0 }
 0xf29   :  { %v8873_v43 = vpop.f32.mrb[42].mxu0 }
 0xf2a   :  { %v2440_v44 = vpack.c.bf16 %v8873_v43, %v8872_v41  ;;  %v2427_v45 = vpop.f32.mrb[43].mxu0  ;;  %v9447_v41 = vld [vmem:[%s12074_s12 + $0xcc] ss:$16 sps:$4 sm:$0xff]   ;;  %v9445_v43 = vld [vmem:[%s12074_s12 + $0xc8] ss:$16 sps:$4 sm:$0xff]  }
 0xf2b   :  { %v2439_v46 = vpack.c.bf16 %v2427_v45, %v2424_v42  ;;  %v9442_v42 = vld [vmem:[%s12074_s12 + $0xc0] ss:$16 sps:$4 sm:$0xff]   ;;  %v9450_v45 = vld [vmem:[%s12074_s12 + $0xe4] ss:$16 sps:$4 sm:$0xff]  }
 0xf2c   :  { %2828 = vmatpush1.bf16.msra.mxu1 %v9442_v42  ;;  %v9479_v42 = vld [vmem:[%s12076_s14 + $0xf0] sm:$0xff]  }
 0xf2d   :  { %8878 = vmatprep.mubr.msk.bf16.mxu0 %vm447_vm0, %v2439_v46  ;;  %v9451_v46 = vld [vmem:[%s12074_s12 + $0xe8] ss:$16 sps:$4 sm:$0xff]   ;;  %2829 = vmatprep.subr.bf16.mxu1 %v9450_v45 }
 0xf2e   :  { %8879 = vmatmul.mubr.msk.bf16.vlgmr.msra.gmra.mrb[16].mxu0 %vm447_vm0, %v2440_v44  ;;  %v9448_v44 = vld [vmem:[%s12074_s12 + $0xe0] ss:$16 sps:$4 sm:$0xff]   ;;  %v9482_v45 = vld [vmem:[%s12076_s14 + $0x78] sm:$0xff]  }
 0xf2f   :  { %2869 = vmatpush1.bf16.msra.mxu0 %v9409_v5 }
 0xf30   :  { %2870 = vmatprep.subr.bf16.mxu0 %v9417_v60  ;;  %2830 = vmatpush1.bf16.msra.mxu1 %v9448_v44  ;;  %v9481_v44 = vld [vmem:[%s12076_s14 + $0xb0] sm:$0xff]  }
 0xf33   :  { %2871 = vmatpush1.bf16.msra.mxu0 %v9415_v11 }
 0xf34   :  { %2872 = vmatprep.subr.bf16.mxu0 %v9423_v18  ;;  %v9462_v18 = vld [vmem:[%s12076_s14 + $0x50] sm:$0xff]  }
 0xf37   :  { %2873 = vmatpush1.bf16.msra.mxu0 %v9421_v20  ;;  %v9464_v20 = vld [vmem:[%s12076_s14 + $0x10] sm:$0xff]  }
 0xf38   :  { %2874 = vmatprep.subr.bf16.mxu0 %v9429_v23  ;;  %v9466_v23 = vld [vmem:[%s12076_s14 + $0x58] sm:$0xff]  }
 0xf3b   :  { %2875 = vmatpush1.bf16.msra.mxu0 %v9427_v31  ;;  %v9468_v31 = vld [vmem:[%s12076_s14 + $0x18] sm:$0xff]  }
 0xf3c   :  { %2876 = vmatprep.subr.bf16.mxu0 %v9435_v33  ;;  %v9470_v33 = vld [vmem:[%s12076_s14 + $0x60] sm:$0xff]  }
 0xf3f   :  { %2877 = vmatpush1.bf16.msra.mxu0 %v9433_v35  ;;  %v9472_v35 = vld [vmem:[%s12076_s14 + $0x20] sm:$0xff]  }
 0xf40   :  { %2878 = vmatprep.subr.bf16.mxu0 %v9441_v37  ;;  %v9474_v37 = vld [vmem:[%s12076_s14 + $0x68] sm:$0xff]  }
 0xf43   :  { %2879 = vmatpush1.bf16.msra.mxu0 %v9439_v39  ;;  %v9476_v39 = vld [vmem:[%s12076_s14 + $0x28] sm:$0xff]  }
 0xf44   :  { %2880 = vmatprep.subr.bf16.mxu0 %v9447_v41  ;;  %v9478_v41 = vld [vmem:[%s12076_s14 + $0x70] sm:$0xff]  }
 0xf47   :  { %2881 = vmatpush1.bf16.msra.mxu0 %v9445_v43  ;;  %v9480_v43 = vld [vmem:[%s12076_s14 + $0x30] sm:$0xff]  }
0x1001   :  { %v8880_v48 = vpop.f32.mrb[16].mxu0 }
0x1002   :  { %v2498_v49 = vpop.f32.mrb[17].mxu0  ;;  %v2526_v52 = vadd.f32 %v8880_v48, %v7459_v47  ;;  %v9942_v48 = vmov 0  }
0x1003   :  { %v2524_v50 = vadd.f32 %v7459_v47, %v2498_v49  ;;  %v8881_v51 = vpop.f32.mrb[18].mxu0  ;;  %2847 = vmatprep.mubr.bf16.mxu1 %v9942_v48  ;;  %2900 = vmatprep.mubr.bf16.mxu0 %v9942_v48 }
0x1004   :  { %v2501_v21 = vpop.f32.mrb[19].mxu0  ;;  %v2527_v59 = vadd.f32 %v8881_v51, %v7459_v47  ;;  %v2530_v0 = vadd.f32 %v9912_v63, %v2526_v52 }
0x1005   :  { %v2525_v53 = vadd.f32 %v7459_v47, %v2501_v21  ;;  %v2528_v58 = vadd.f32 %v9910_v56, %v2524_v50  ;;  %v9453_v47 = vld [vmem:[%s12074_s12 + $0xec] ss:$16 sps:$4 sm:$0xff]  }
0x1006   :  { %v2531_v2 = vadd.f32 %v9913_v1, %v2527_v59  ;;  %2882 = vmatprep.subr.bf16.mxu0 %v9453_v47  ;;  %v7460_v1 = vld [vmem:[%s12072_s10] ss:$0 sm:$0xff]  ;;  %v9484_v47 = vld [vmem:[%s12076_s14 + $0x38] sm:$0xff]  }
0x1007   :  { %2534 = vadd.xlane.f32.xlu0 %v2528_v58  ;;  %v2529_v62 = vadd.f32 %v9911_v61, %v2525_v53  ;;  %2883 = vmatpush1.bf16.msra.mxu0 %v9451_v46  ;;  %v9483_v46 = vld [vmem:[%s12076_s14 + $0xf8] sm:$0xff]  }
0x1009   :  { %2536 = vadd.xlane.f32.xlu1 %v2529_v62 }
0x100b   :  { %2538 = vadd.xlane.f32.xlu0 %v2530_v0 }
0x100d   :  { %2540 = vadd.xlane.f32.xlu1 %v2531_v2 }
0x1094   :  { %v2535_v7 = vpop.xlane.xlu0 %2534 }
0x1095   :  { %v2543_v8 = vmul.f32 0.0078125, %v2535_v7 }
0x1096   :  { %v2537_v9 = vpop.xlane.xlu1 %2536 }
0x1097   :  { %v10622_v57 = vsub.f32 %v2528_v58, %v2543_v8  ;;  %v2544_v10 = vmul.f32 0.0078125, %v2537_v9 }
0x1098   :  { %v2539_v12 = vpop.xlane.xlu0 %2538 }
0x1099   :  { %v10624_v13 = vsub.f32 %v2529_v62, %v2544_v10  ;;  %v2545_v14 = vmul.f32 0.0078125, %v2539_v12  ;;  %v2551_v25 = vmul.f32 %v10622_v57, %v10622_v57 }
0x109a   :  { %v2541_v28 = vpop.xlane.xlu1 %2540 }
0x109b   :  { %v10628_v24 = vsub.f32 %v2530_v0, %v2545_v14  ;;  %v2546_v26 = vmul.f32 0.0078125, %v2541_v28  ;;  %2555 = vadd.xlane.f32.xlu0 %v2551_v25  ;;  %v2552_v27 = vmul.f32 %v10624_v13, %v10624_v13  ;;  %v9454_v28 = vld [vmem:[%s12076_s14 + $0x40] sm:$0xff]  }
0x109c   :  { %8248 = vmatprep.subr.bf16.mxu1 %v9454_v28 }
0x109d   :  { %v10632_v29 = vsub.f32 %v2531_v2, %v2546_v26  ;;  %2557 = vadd.xlane.f32.xlu1 %v2552_v27  ;;  %v2553_v15 = vmul.f32 %v10628_v24, %v10628_v24  ;;  %v9456_v26 = vld [vmem:[%s12076_s14] sm:$0xff]  }
0x109e   :  { %v9457_v27 = vld [vmem:[%s12076_s14 + $0x80] sm:$0xff]  }
0x109f   :  { %2559 = vadd.xlane.f32.xlu0 %v2553_v15  ;;  %v2554_v16 = vmul.f32 %v10632_v29, %v10632_v29  ;;  %v9459_v15 = vld [vmem:[%s12076_s14 + $0xc8] sm:$0xff]  }
0x10a1   :  { %2561 = vadd.xlane.f32.xlu1 %v2554_v16  ;;  %v9460_v16 = vld [vmem:[%s12076_s14 + $0x8] sm:$0xff]  }
0x1128   :  { %v2556_v49 = vpop.xlane.xlu0 %2555 }
0x1129   :  { %v2563_v50 = vmul.f32 0.0078125, %v2556_v49  ;;  %v9485_v49 = vld [vmem:[%s12076_s14 + $0xb8] sm:$0xff]  }
0x112a   :  { %v2558_v51 = vpop.xlane.xlu1 %2557 }
0x112b   :  { %v2567_v21 = vadd.f32 1e-12, %v2563_v50  ;;  %v2564_v52 = vmul.f32 0.0078125, %v2558_v51  ;;  %v2635_v50 = vlaneseq }
0x112c   :  { %v2560_v53 = vpop.xlane.xlu0 %2559 }
0x112d   :  { %9750 = vrsqrt.f32 %v2567_v21  ;;  %v2568_v56 = vadd.f32 1e-12, %v2564_v52  ;;  %v2565_v58 = vmul.f32 0.0078125, %v2560_v53  ;;  %v10832_v51 = vshrl.u32 %v2635_v50, 7  ;;  %v2633_v53 = vld [vmem:[%s12075_s13] sm:$0xf] }
0x112e   :  { %v2562_v59 = vpop.xlane.xlu1 %2561 }
0x112f   :  { %9752 = vrsqrt.f32 %v2568_v56  ;;  %v2569_v61 = vadd.f32 1e-12, %v2565_v58  ;;  %v2566_v62 = vmul.f32 0.0078125, %v2562_v59  ;;  %v2637_v21 = vsub.s32 0, %v10832_v51 }
0x1130   :  { %v2645_v52 = vsub.s32 2, %v10832_v51  ;;  %v2641_v56 = vsub.s32 1, %v10832_v51 }
0x1131   :  { %9754 = vrsqrt.f32 %v2569_v61  ;;  %v2570_v63 = vadd.f32 1e-12, %v2566_v62  ;;  %v10842_v58 = vrot.slane %v2633_v53, %v2637_v21  ;;  %v2649_v61 = vsub.s32 3, %v10832_v51 }
0x1132   :  { %v10846_v59 = vrot.slane %v2633_v53, %v2645_v52 }
0x1133   :  { %9756 = vrsqrt.f32 %v2570_v63 }
0x1137   :  { %v9751_v0 = vpop.eup %9750 }
0x1138   :  { %v2575_v2 = vmul.f32 %v9751_v0, %v10622_v57  ;;  %v10851_v0 = vrot.slane %v2633_v53, %v2641_v56 }
0x1139   :  { %v9753_v3 = vpop.eup %9752 }
0x113a   :  { %v2576_v4 = vmul.f32 %v9753_v3, %v10624_v13  ;;  %v2585_v5 = vmul.f32 %v7460_v1, %v2575_v2 }
0x113b   :  { %v9755_v54 = vpop.eup %9754 }
0x113c   :  { %v2586_v60 = vmul.f32 %v7460_v1, %v2576_v4  ;;  %v10720_v11 = vadd.f32 %v7461_v55, %v2585_v5  ;;  %v2577_v8 = vmul.f32 %v9755_v54, %v10628_v24  ;;  %v9455_v24 = vld [vmem:[%s12076_s14 + $0xc0] sm:$0xff]   ;;  %v10857_v5 = vrot.slane %v2633_v53, %v2649_v61 }
0x113d   :  { %v9757_v6 = vpop.eup %9756  ;;  %8276 = vmatprep.subr.bf16.mxu0 %v9455_v24 }
0x113e   :  { %v10722_v7 = vadd.f32 %v7461_v55, %v2586_v60  ;;  %v2578_v9 = vmul.f32 %v9757_v6, %v10632_v29  ;;  %v2587_v12 = vmul.f32 %v7460_v1, %v2577_v8  ;;  %v9458_v29 = vld [vmem:[%s12076_s14 + $0x48] sm:$0xff]  }
0x1140   :  { %v2599_v57 = vpack.c.bf16 %v10722_v7, %v10720_v11  ;;  %v2588_v10 = vmul.f32 %v7460_v1, %v2578_v9  ;;  %v10732_v14 = vadd.f32 %v7461_v55, %v2587_v12 }
0x1142   :  { %2848 = vmatmul.mubr.bf16.vlgmr.msra.gmra.mrb[40].mxu1 %v2599_v57  ;;  %2901 = vmatmul.mubr.bf16.vlgmr.msra.gmra.mrb[44].mxu0 %v2599_v57  ;;  %v10730_v13 = vadd.f32 %v7461_v55, %v2588_v10 }
0x1143   :  { %2857 = vmatprep.mubr.bf16.mxu1 %v9942_v48  ;;  %2910 = vmatprep.mubr.bf16.mxu0 %v9942_v48 }
0x1144   :  { %v2600_v25 = vpack.c.bf16 %v10730_v13, %v10732_v14  ;;  %8249 = vmatpush3.bf16.msra.mxu1 %v9456_v26  ;;  %8277 = vmatpush3.bf16.msra.mxu0 %v9457_v27 }
0x1145   :  { %8250 = vmatprep.subr.bf16.mxu1 %v9458_v29  ;;  %8278 = vmatprep.subr.bf16.mxu0 %v9459_v15 }
0x1148   :  { %8251 = vmatpush3.bf16.msra.mxu1 %v9460_v16  ;;  %8279 = vmatpush3.bf16.msra.mxu0 %v9461_v17 }
0x1149   :  { %8252 = vmatprep.subr.bf16.mxu1 %v9462_v18  ;;  %8280 = vmatprep.subr.bf16.mxu0 %v9463_v19 }
0x114a   :  { %2858 = vmatmul.mubr.bf16.gmra.mrb[44].mxu1 %v2600_v25  ;;  %2911 = vmatmul.mubr.bf16.gmra.mrb[48].mxu0 %v2600_v25 }
0x114c   :  { %8253 = vmatpush3.bf16.msra.mxu1 %v9464_v20  ;;  %8281 = vmatpush3.bf16.msra.mxu0 %v9465_v22 }
0x114d   :  { %8254 = vmatprep.subr.bf16.mxu1 %v9466_v23  ;;  %8282 = vmatprep.subr.bf16.mxu0 %v9467_v30 }
0x1150   :  { %8255 = vmatpush3.bf16.msra.mxu1 %v9468_v31  ;;  %8283 = vmatpush3.bf16.msra.mxu0 %v9469_v32 }
0x1151   :  { %8256 = vmatprep.subr.bf16.mxu1 %v9470_v33  ;;  %8284 = vmatprep.subr.bf16.mxu0 %v9471_v34 }
0x1154   :  { %8257 = vmatpush3.bf16.msra.mxu1 %v9472_v35  ;;  %8285 = vmatpush3.bf16.msra.mxu0 %v9473_v36 }
0x1155   :  { %8258 = vmatprep.subr.bf16.mxu1 %v9474_v37  ;;  %8286 = vmatprep.subr.bf16.mxu0 %v9475_v38 }
0x1158   :  { %8259 = vmatpush3.bf16.msra.mxu1 %v9476_v39  ;;  %8287 = vmatpush3.bf16.msra.mxu0 %v9477_v40 }
0x1159   :  { %8260 = vmatprep.subr.bf16.mxu1 %v9478_v41  ;;  %8288 = vmatprep.subr.bf16.mxu0 %v9479_v42 }
0x115c   :  { %8261 = vmatpush3.bf16.msra.mxu1 %v9480_v43  ;;  %8289 = vmatpush3.bf16.msra.mxu0 %v9481_v44 }
0x115d   :  { %8262 = vmatprep.subr.bf16.mxu1 %v9482_v45  ;;  %8290 = vmatprep.subr.bf16.mxu0 %v9483_v46 }
0x1160   :  { %8263 = vmatpush3.bf16.msra.mxu1 %v9484_v47  ;;  %8291 = vmatpush3.bf16.msra.mxu0 %v9485_v49 }
0x1215   :  { %v2849_v62 = vpop.f32.mrb[40].mxu1  ;;  %v2902_v63 = vpop.f32.mrb[44].mxu0 }
0x1216   :  { %v2850_v1 = vadd.f32 %v2849_v62, %v10842_v58  ;;  %v2903_v2 = vadd.f32 %v2902_v63, %v10846_v59  ;;  %v2851_v3 = vpop.f32.mrb[41].mxu1  ;;  %v2904_v4 = vpop.f32.mrb[45].mxu0 }
0x1217   :  { %v2853_v54 = vpop.f32.mrb[42].mxu1  ;;  %v2906_v55 = vpop.f32.mrb[46].mxu0  ;;  %v10860_v8 = vadd.f32 %v2851_v3, %v10851_v0  ;;  %v10870_v26 = vadd.f32 %v2904_v4, %v10857_v5 }
0x1218   :  { %v2937_v60 = vmul.f32 0.044715, %v2850_v1  ;;  %v2939_v6 = vmul.f32 0.044715, %v2903_v2  ;;  %v2854_v9 = vadd.f32 %v2853_v54, %v10842_v58  ;;  %v10864_v57 = vadd.f32 %v2906_v55, %v10846_v59  ;;  %v2855_v10 = vpop.f32.mrb[43].mxu1  ;;  %v2908_v12 = vpop.f32.mrb[47].mxu0 }
0x1219   :  { %v10867_v24 = vadd.f32 %v2855_v10, %v10851_v0  ;;  %v10873_v29 = vadd.f32 %v2908_v12, %v10857_v5  ;;  %v10875_v15 = vmul.f32 0.5, %v2850_v1  ;;  %v2938_v19 = vmul.f32 0.044715, %v10860_v8 }
0x121a   :  { %v2953_v25 = vmul.f32 %v2937_v60, %v2850_v1  ;;  %v2955_v28 = vmul.f32 %v2939_v6, %v2903_v2  ;;  %v2941_v27 = vmul.f32 0.044715, %v2854_v9  ;;  %v2943_v18 = vmul.f32 0.044715, %v10864_v57 }
0x121b   :  { %v2942_v22 = vmul.f32 0.044715, %v10867_v24  ;;  %v10880_v32 = vmul.f32 0.5, %v2903_v2  ;;  %v2940_v37 = vmul.f32 0.044715, %v10870_v26  ;;  %v2954_v49 = vmul.f32 %v2938_v19, %v10860_v8 }
0x121c   :  { %v2969_v16 = vmul.f32 %v2953_v25, %v2850_v1  ;;  %v2971_v17 = vmul.f32 %v2955_v28, %v2903_v2  ;;  %v2957_v20 = vmul.f32 %v2941_v27, %v2854_v9  ;;  %v2959_v34 = vmul.f32 %v2943_v18, %v10864_v57 }
0x121d   :  { %v2859_v23 = vpop.f32.mrb[44].mxu1  ;;  %v2912_v30 = vpop.f32.mrb[48].mxu0  ;;  %v2944_v39 = vmul.f32 0.044715, %v10873_v29  ;;  %v2958_v53 = vmul.f32 %v2942_v22, %v10867_v24  ;;  %v2956_v3 = vmul.f32 %v2940_v37, %v10870_v26  ;;  %v2970_v12 = vmul.f32 %v2954_v49, %v10860_v8 }
0x121e   :  { %v2985_v31 = vadd.f32 %v2969_v16, %v2850_v1  ;;  %v2987_v33 = vadd.f32 %v2971_v17, %v2903_v2  ;;  %v2861_v35 = vpop.f32.mrb[45].mxu1  ;;  %v2914_v36 = vpop.f32.mrb[49].mxu0  ;;  %v2973_v38 = vmul.f32 %v2957_v20, %v2854_v9  ;;  %v10886_v40 = vadd.f32 %v2859_v23, %v10842_v58 }
0x121f   :  { %v2863_v41 = vpop.f32.mrb[46].mxu1  ;;  %v2916_v42 = vpop.f32.mrb[50].mxu0  ;;  %v2975_v45 = vmul.f32 %v2959_v34, %v10864_v57  ;;  %v10892_v62 = vadd.f32 %v2912_v30, %v10846_v59  ;;  %v10897_v2 = vadd.f32 %v2861_v35, %v10851_v0  ;;  %v2960_v54 = vmul.f32 %v2944_v39, %v10873_v29 }
0x1220   :  { %v3001_v43 = vmul.f32 0.7978846, %v2985_v31  ;;  %v3003_v44 = vmul.f32 0.7978846, %v2987_v33  ;;  %v2865_v46 = vpop.f32.mrb[47].mxu1  ;;  %v2918_v47 = vpop.f32.mrb[51].mxu0  ;;  %v2989_v50 = vadd.f32 %v2973_v38, %v2854_v9  ;;  %v10903_v6 = vadd.f32 %v2914_v36, %v10857_v5 }
0x1221   :  { %v2991_v63 = vadd.f32 %v2975_v45, %v10864_v57  ;;  %v2945_v1 = vmul.f32 0.044715, %v10886_v40  ;;  %v2946_v60 = vmul.f32 0.044715, %v10897_v2  ;;  %v10906_v10 = vadd.f32 %v2863_v41, %v10842_v58 }
0x1222   :  { %9758 = vtanh.f32 %v3001_v43  ;;  %v3005_v4 = vmul.f32 0.7978846, %v2989_v50  ;;  %v2974_v25 = vmul.f32 %v2958_v53, %v10867_v24  ;;  %v10911_v28 = vadd.f32 %v2916_v42, %v10846_v59 }
0x1223   :  { %9760 = vtanh.f32 %v3003_v44  ;;  %v3007_v55 = vmul.f32 0.7978846, %v2991_v63  ;;  %v2961_v27 = vmul.f32 %v2945_v1, %v10886_v40  ;;  %v2947_v16 = vmul.f32 0.044715, %v10892_v62 }
0x1224   :  { %9762 = vtanh.f32 %v3005_v4  ;;  %v2948_v17 = vmul.f32 0.044715, %v10903_v6  ;;  %v2925_v18 = vmul.f32 0.5, %v2854_v9  ;;  %v2962_v19 = vmul.f32 %v2946_v60, %v10897_v2 }
0x1225   :  { %9764 = vtanh.f32 %v3007_v55  ;;  %v10918_v58 = vadd.f32 %v2865_v46, %v10851_v0  ;;  %v10921_v20 = vadd.f32 %v2918_v47, %v10857_v5  ;;  %v2972_v22 = vmul.f32 %v2956_v3, %v10870_v26 }
0x1226   :  { %v2976_v59 = vmul.f32 %v2960_v54, %v10873_v29  ;;  %v2949_v23 = vmul.f32 0.044715, %v10906_v10  ;;  %v2951_v30 = vmul.f32 0.044715, %v10911_v28  ;;  %v2964_v31 = vmul.f32 %v2948_v17, %v10903_v6 }
0x1227   :  { %v2950_v9 = vmul.f32 0.044715, %v10918_v58  ;;  %v2952_v33 = vmul.f32 0.044715, %v10921_v20  ;;  %v2986_v0 = vadd.f32 %v2970_v12, %v10860_v8  ;;  %v2927_v34 = vmul.f32 0.5, %v10864_v57 }
0x1228   :  { %v2977_v5 = vmul.f32 %v2961_v27, %v10886_v40  ;;  %v2963_v35 = vmul.f32 %v2947_v16, %v10892_v62  ;;  %v2990_v36 = vadd.f32 %v2974_v25, %v10867_v24  ;;  %v2978_v37 = vmul.f32 %v2962_v19, %v10897_v2 }
0x1229   :  { %v2966_v38 = vmul.f32 %v2950_v9, %v10918_v58  ;;  %v2968_v39 = vmul.f32 %v2952_v33, %v10921_v20  ;;  %v3002_v41 = vmul.f32 0.7978846, %v2986_v0  ;;  %v2965_v43 = vmul.f32 %v2949_v23, %v10906_v10 }
0x122a   :  { %v3006_v44 = vmul.f32 0.7978846, %v2990_v36  ;;  %v2988_v45 = vadd.f32 %v2972_v22, %v10870_v26  ;;  %v2992_v57 = vadd.f32 %v2976_v59, %v10873_v29  ;;  %v2980_v47 = vmul.f32 %v2964_v31, %v10903_v6 }
0x122b   :  { %v2967_v49 = vmul.f32 %v2951_v30, %v10911_v28  ;;  %v2982_v50 = vmul.f32 %v2966_v38, %v10918_v58  ;;  %9766 = vtanh.f32 %v3002_v41  ;;  %v2979_v4 = vmul.f32 %v2963_v35, %v10892_v62 }
0x122c   :  { %v9759_v42 = vpop.eup %9758  ;;  %9768 = vtanh.f32 %v3006_v44  ;;  %v3004_v53 = vmul.f32 0.7978846, %v2988_v45  ;;  %v3008_v63 = vmul.f32 0.7978846, %v2992_v57  ;;  %v2984_v54 = vmul.f32 %v2968_v39, %v10921_v20 }
0x122d   :  { %v9761_v46 = vpop.eup %9760  ;;  %v3033_v1 = vadd.f32 1.0, %v9759_v42  ;;  %v2994_v60 = vadd.f32 %v2978_v37, %v10897_v2  ;;  %v2981_v25 = vmul.f32 %v2965_v43, %v10906_v10  ;;  %v2998_v16 = vadd.f32 %v2982_v50, %v10918_v58 }
0x122e   :  { %v9763_v3 = vpop.eup %9762  ;;  %v3035_v55 = vadd.f32 1.0, %v9761_v46  ;;  %9770 = vtanh.f32 %v3004_v53  ;;  %v2983_v17 = vmul.f32 %v2967_v49, %v10911_v28  ;;  %v2996_v31 = vadd.f32 %v2980_v47, %v10903_v6 }
0x122f   :  { %v9765_v12 = vpop.eup %9764  ;;  %v3037_v27 = vadd.f32 1.0, %v9763_v3  ;;  %9772 = vtanh.f32 %v3008_v63  ;;  %v3010_v22 = vmul.f32 0.7978846, %v2994_v60  ;;  %v3049_v59 = vmul.f32 %v3033_v1, %v10875_v15 }
0x1230   :  { %v3039_v19 = vadd.f32 1.0, %v9765_v12  ;;  %v3014_v30 = vmul.f32 0.7978846, %v2998_v16  ;;  %v3051_v9 = vmul.f32 %v3035_v55, %v10880_v32  ;;  %v3000_v0 = vadd.f32 %v2984_v54, %v10921_v20 }
0x1231   :  { %v3053_v23 = vmul.f32 %v3037_v27, %v2925_v18  ;;  %9774 = vtanh.f32 %v3010_v22  ;;  %v3012_v36 = vmul.f32 0.7978846, %v2996_v31  ;;  %v2993_v39 = vadd.f32 %v2977_v5, %v10886_v40 }
0x1232   :  { %v3055_v33 = vmul.f32 %v3039_v19, %v2927_v34  ;;  %9776 = vtanh.f32 %v3014_v30  ;;  %v3016_v38 = vmul.f32 0.7978846, %v3000_v0  ;;  %v2997_v41 = vadd.f32 %v2981_v25, %v10906_v10 }
0x1233   :  { %v3065_v35 = vpack.c.bf16 %v3053_v23, %v3049_v59  ;;  %9778 = vtanh.f32 %v3012_v36  ;;  %v2995_v15 = vadd.f32 %v2979_v4, %v10892_v62  ;;  %v3009_v42 = vmul.f32 0.7978846, %v2993_v39 }
0x1234   :  { %v3067_v37 = vpack.c.bf16 %v3055_v33, %v3051_v9  ;;  %9780 = vtanh.f32 %v3016_v38  ;;  %v3013_v32 = vmul.f32 0.7978846, %v2997_v41  ;;  %v2999_v34 = vadd.f32 %v2983_v17, %v10911_v28 }
0x1235   :  { %v9767_v18 = vpop.eup %9766  ;;  %v2922_v44 = vmul.f32 0.5, %v10860_v8  ;;  %v3011_v57 = vmul.f32 0.7978846, %v2995_v15  ;;  %v2926_v46 = vmul.f32 0.5, %v10867_v24  ;;  %9782 = vtanh.f32 %v3009_v42 }
0x1236   :  { %v9769_v43 = vpop.eup %9768  ;;  %v3034_v45 = vadd.f32 1.0, %v9767_v18  ;;  %v3015_v5 = vmul.f32 0.7978846, %v2999_v34  ;;  %9784 = vtanh.f32 %v3013_v32  ;;  %v2924_v3 = vmul.f32 0.5, %v10870_v26 }
0x1237   :  { %v3038_v47 = vadd.f32 1.0, %v9769_v43  ;;  %9786 = vtanh.f32 %v3011_v57  ;;  %v2928_v4 = vmul.f32 0.5, %v10873_v29  ;;  %v2930_v27 = vmul.f32 0.5, %v10897_v2 }
0x1238   :  { %v9771_v49 = vpop.eup %9770  ;;  %v3050_v53 = vmul.f32 %v3034_v45, %v2922_v44  ;;  %9788 = vtanh.f32 %v3015_v5  ;;  %v2934_v16 = vmul.f32 0.5, %v10918_v58  ;;  %v2932_v30 = vmul.f32 0.5, %v10903_v6 }
0x1239   :  { %v9773_v50 = vpop.eup %9772  ;;  %v3054_v63 = vmul.f32 %v3038_v47, %v2926_v46  ;;  %v3036_v1 = vadd.f32 1.0, %v9771_v49  ;;  %v2936_v31 = vmul.f32 0.5, %v10921_v20  ;;  %v2933_v41 = vmul.f32 0.5, %v10906_v10  ;;  %v7494_v10 = vld [vmem:[%s12077_s15] ss:$0 sm:$0xff] }
0x123a   :  { %v3040_v54 = vadd.f32 1.0, %v9773_v50  ;;  %v2931_v6 = vmul.f32 0.5, %v10892_v62 }
0x123b   :  { %v9775_v8 = vpop.eup %9774  ;;  %v3066_v55 = vpack.c.bf16 %v3054_v63, %v3050_v53  ;;  %v3052_v24 = vmul.f32 %v3036_v1, %v2924_v3 }
0x123c   :  { %v9777_v60 = vpop.eup %9776  ;;  %v3056_v12 = vmul.f32 %v3040_v54, %v2928_v4  ;;  %v3042_v25 = vadd.f32 1.0, %v9775_v8 }
0x123d   :  { %3368 = vmatprep.mubr.bf16.mxu1 %v3066_v55  ;;  %v3046_v17 = vadd.f32 1.0, %v9777_v60  ;;  %v9779_v19 = vpop.eup %9778 }
0x123e   :  { %v3068_v22 = vpack.c.bf16 %v3056_v12, %v3052_v24  ;;  %3369 = vmatmul.mubr.bf16.vlgmr.msra.gmra.mrb[48].mxu1 %v3065_v35  ;;  %v9781_v26 = vpop.eup %9780  ;;  %v3058_v59 = vmul.f32 %v3042_v25, %v2930_v27  ;;  %v3044_v23 = vadd.f32 1.0, %v9779_v19  ;;  %v2929_v35 = vmul.f32 0.5, %v10886_v40 }
0x123f   :  { %v3062_v29 = vmul.f32 %v3046_v17, %v2934_v16  ;;  %v3048_v9 = vadd.f32 1.0, %v9781_v26  ;;  %v9783_v33 = vpop.eup %9782 }
0x1240   :  { %3417 = vmatprep.mubr.bf16.mxu0 %v3068_v22  ;;  %v9785_v2 = vpop.eup %9784  ;;  %v3060_v36 = vmul.f32 %v3044_v23, %v2932_v30  ;;  %v3041_v38 = vadd.f32 1.0, %v9783_v33 }
0x1241   :  { %3418 = vmatmul.mubr.bf16.vlgmr.msra.gmra.mrb[52].mxu0 %v3067_v37  ;;  %v3070_v0 = vpack.c.bf16 %v3062_v29, %v3058_v59  ;;  %v3064_v58 = vmul.f32 %v3048_v9, %v2936_v31  ;;  %v9787_v39 = vpop.eup %9786  ;;  %v3045_v15 = vadd.f32 1.0, %v9785_v2  ;;  %v2935_v37 = vmul.f32 0.5, %v10911_v28 }
0x1242   :  { %v9789_v18 = vpop.eup %9788  ;;  %v3043_v20 = vadd.f32 1.0, %v9787_v39  ;;  %v3057_v32 = vmul.f32 %v3041_v38, %v2929_v35 }
0x1243   :  { %3376 = vmatprep.mubr.bf16.mxu1 %v3070_v0  ;;  %v3072_v42 = vpack.c.bf16 %v3064_v58, %v3060_v36  ;;  %v3061_v34 = vmul.f32 %v3045_v15, %v2933_v41  ;;  %v3047_v43 = vadd.f32 1.0, %v9789_v18 }
0x1244   :  { %v3059_v45 = vmul.f32 %v3043_v20, %v2931_v6 }
0x1245   :  { %3425 = vmatprep.mubr.bf16.mxu0 %v3072_v42  ;;  %v3069_v44 = vpack.c.bf16 %v3061_v34, %v3057_v32  ;;  %v3063_v57 = vmul.f32 %v3047_v43, %v2935_v37  ;;  %v9486_v43 = vld [vmem:[%s12103_s1 + $0x100] sm:$0xff]  }
0x1246   :  { %8882 = vmatprep.subr.bf16.mxu1 %v9486_v43 }
0x1247   :  { %3377 = vmatmul.mubr.bf16.gmra.mrb[52].mxu1 %v3069_v44  ;;  %v3071_v46 = vpack.c.bf16 %v3063_v57, %v3059_v45  ;;  %v9487_v44 = vld [vmem:[%s12102_s29 + $0x100] sm:$0xff]   ;;  %v9488_v45 = vld [vmem:[%s12103_s1 + $0x108] sm:$0xff]  }
0x1248   :  { %8883 = vmatpush3.bf16.msra.mxu1 %v9486_v43  ;;  %8902 = vmatprep.subr.bf16.mxu0 %v9487_v44  ;;  %v9489_v57 = vld [vmem:[%s12102_s29 + $0x108] sm:$0xff]   ;;  %v9512_v43 = vld [vmem:[%s12103_s1 + $0x150] sm:$0xff]  }
0x1249   :  { %3426 = vmatmul.mubr.bf16.gmra.mrb[56].mxu0 %v3071_v46  ;;  %8884 = vmatprep.subr.bf16.mxu1 %v9488_v45  ;;  %v9490_v46 = vld [vmem:[%s12103_s1 + $0x110] sm:$0xff]  }
0x124a   :  { %8903 = vmatpush3.bf16.msra.mxu0 %v9487_v44  ;;  %v9513_v44 = vld [vmem:[%s12103_s1 + $0x158] sm:$0xff]  }
0x124b   :  { %8904 = vmatprep.subr.bf16.mxu0 %v9489_v57 }
0x124c   :  { %8885 = vmatpush3.bf16.msra.mxu1 %v9488_v45  ;;  %v9514_v45 = vld [vmem:[%s12103_s1 + $0x160] sm:$0xff]  }
0x124d   :  { %8886 = vmatprep.subr.bf16.mxu1 %v9490_v46 }
0x124e   :  { %8905 = vmatpush3.bf16.msra.mxu0 %v9489_v57  ;;  %v9515_v57 = vld [vmem:[%s12103_s1 + $0x168] sm:$0xff]  }
0x1250   :  { %8887 = vmatpush3.bf16.msra.mxu1 %v9490_v46  ;;  %v9516_v46 = vld [vmem:[%s12103_s1 + $0x170] sm:$0xff]  }
0x1311   :  { %v8264_v40 = vpop.f32.mrb[48].mxu1 }
0x1312   :  { %v8265_v47 = vpop.f32.mrb[49].mxu1 }
0x1313   :  { %v8266_v62 = vadd.f32 %v8265_v47, %v8264_v40  ;;  %v8267_v5 = vpop.f32.mrb[50].mxu1  ;;  %v9491_v40 = vld [vmem:[%s12102_s29 + $0x110] sm:$0xff]   ;;  %v9493_v47 = vld [vmem:[%s12102_s29 + $0x118] sm:$0xff]  }
0x1314   :  { %v8292_v49 = vpop.f32.mrb[52].mxu0  ;;  %v8268_v50 = vpop.f32.mrb[51].mxu1  ;;  %8906 = vmatprep.subr.bf16.mxu0 %v9491_v40 }
0x1315   :  { %v3371_v53 = vadd.f32 %v8266_v62, %v7494_v10  ;;  %v8293_v28 = vpop.f32.mrb[53].mxu0  ;;  %v8269_v63 = vadd.f32 %v8268_v50, %v8267_v5  ;;  %8907 = vmatpush3.bf16.msra.mxu0 %v9491_v40  ;;  %v9494_v62 = vld [vmem:[%s12103_s1 + $0x120] sm:$0xff]   ;;  %v9497_v50 = vld [vmem:[%s12102_s29 + $0x128] sm:$0xff]   ;;  %v9517_v40 = vld [vmem:[%s12103_s1 + $0x178] sm:$0xff]  }
0x1316   :  { %v8294_v1 = vadd.f32 %v8293_v28, %v8292_v49  ;;  %v8295_v3 = vpop.f32.mrb[54].mxu0  ;;  %8908 = vmatprep.subr.bf16.mxu0 %v9493_v47  ;;  %v9495_v5 = vld [vmem:[%s12102_s29 + $0x120] sm:$0xff]   ;;  %v9496_v49 = vld [vmem:[%s12103_s1 + $0x128] sm:$0xff]   ;;  %v9499_v28 = vld [vmem:[%s12102_s29 + $0x130] sm:$0xff]  }
0x1317   :  { %v3374_v4 = vadd.f32 %v8269_v63, %v7494_v10  ;;  %v8296_v54 = vpop.f32.mrb[55].mxu0  ;;  %v9500_v63 = vld [vmem:[%s12103_s1 + $0x138] sm:$0xff]  }
0x1318   :  { %v3420_v8 = vadd.f32 %v8294_v1, %v3371_v53  ;;  %v8297_v55 = vadd.f32 %v8296_v54, %v8295_v3  ;;  %v9498_v53 = vld [vmem:[%s12103_s1 + $0x130] sm:$0xff]   ;;  %v9501_v1 = vld [vmem:[%s12102_s29 + $0x138] sm:$0xff]   ;;  %v9502_v3 = vld [vmem:[%s12107_s27 + $0x100] sm:$0xff]  }
0x1319   :  { %8909 = vmatpush3.bf16.msra.mxu0 %v9493_v47  ;;  %v9519_v47 = vld [vmem:[%s12107_s27 + $0x148] sm:$0xff]  }
0x131a   :  { %v3423_v60 = vadd.f32 %v8297_v55, %v3374_v4  ;;  %v3434_v24 = vadd.f32 %v3420_v8, %v10720_v11  ;;  %v8270_v12 = vpop.f32.mrb[52].mxu1  ;;  %8910 = vmatprep.subr.bf16.mxu0 %v9495_v5 }
0x131b   :  { %v8271_v27 = vpop.f32.mrb[53].mxu1 }
0x131c   :  { %3440 = vadd.xlane.f32.xlu0 %v3434_v24  ;;  %v3435_v25 = vadd.f32 %v3423_v60, %v10722_v7  ;;  %v8298_v16 = vpop.f32.mrb[56].mxu0  ;;  %v8272_v17 = vadd.f32 %v8271_v27, %v8270_v12  ;;  %v8273_v19 = vpop.f32.mrb[54].mxu1 }
0x131d   :  { %v8299_v22 = vpop.f32.mrb[57].mxu0  ;;  %v8274_v26 = vpop.f32.mrb[55].mxu1  ;;  %8911 = vmatpush3.bf16.msra.mxu0 %v9495_v5  ;;  %v9521_v5 = vld [vmem:[%s12107_s27 + $0x158] sm:$0xff]  }
0x131e   :  { %3442 = vadd.xlane.f32.xlu1 %v3435_v25  ;;  %v3379_v59 = vadd.f32 %v8272_v17, %v7494_v10  ;;  %v8300_v29 = vadd.f32 %v8299_v22, %v8298_v16  ;;  %v8301_v23 = vpop.f32.mrb[58].mxu0  ;;  %v8275_v30 = vadd.f32 %v8274_v26, %v8273_v19  ;;  %8912 = vmatprep.subr.bf16.mxu0 %v9497_v50  ;;  %v7527_v22 = vld [vmem:[%s12078_s16] ss:$0 sm:$0xff] }
0x131f   :  { %v8302_v31 = vpop.f32.mrb[59].mxu0 }
0x1320   :  { %v3428_v9 = vadd.f32 %v8300_v29, %v3379_v59  ;;  %v3382_v33 = vadd.f32 %v8275_v30, %v7494_v10  ;;  %v8303_v0 = vadd.f32 %v8302_v31, %v8301_v23  ;;  %v9492_v10 = vld [vmem:[%s12103_s1 + $0x118] sm:$0xff]   ;;  %v7528_v31 = vld [vmem:[%s12079_s17] ss:$0 sm:$0xff] }
0x1321   :  { %8888 = vmatprep.subr.bf16.mxu1 %v9492_v10  ;;  %8913 = vmatpush3.bf16.msra.mxu0 %v9497_v50  ;;  %v9523_v50 = vld [vmem:[%s12107_s27 + $0x168] sm:$0xff]  }
0x1322   :  { %v3431_v11 = vadd.f32 %v8303_v0, %v3382_v33  ;;  %v3436_v2 = vadd.f32 %v3428_v9, %v10732_v14  ;;  %8889 = vmatpush3.bf16.msra.mxu1 %v9492_v10  ;;  %8914 = vmatprep.subr.bf16.mxu0 %v9499_v28  ;;  %v9518_v10 = vld [vmem:[%s12107_s27 + $0x140] sm:$0xff]  }
0x1323   :  { %8890 = vmatprep.subr.bf16.mxu1 %v9494_v62 }
0x1324   :  { %3444 = vadd.xlane.f32.xlu0 %v3436_v2  ;;  %v3437_v7 = vadd.f32 %v3431_v11, %v10730_v13 }
0x1325   :  { %8915 = vmatpush3.bf16.msra.mxu0 %v9499_v28  ;;  %v9525_v28 = vld [vmem:[%s12107_s27 + $0x178] sm:$0xff]  }
0x1326   :  { %3446 = vadd.xlane.f32.xlu1 %v3437_v7  ;;  %8891 = vmatpush3.bf16.msra.mxu1 %v9494_v62  ;;  %v9520_v62 = vld [vmem:[%s12107_s27 + $0x150] sm:$0xff]  }
0x1327   :  { %8892 = vmatprep.subr.bf16.mxu1 %v9496_v49  ;;  %8916 = vmatprep.subr.bf16.mxu0 %v9501_v1 }
0x1329   :  { %8917 = vmatpush3.bf16.msra.mxu0 %v9501_v1  ;;  %v9527_v1 = vld [vmem:[%s12103_s1 + $0x188] sm:$0xff]  }
0x132a   :  { %8893 = vmatpush3.bf16.msra.mxu1 %v9496_v49  ;;  %v9522_v49 = vld [vmem:[%s12107_s27 + $0x160] sm:$0xff]  }
0x132b   :  { %8894 = vmatprep.subr.bf16.mxu1 %v9498_v53 }
0x132e   :  { %8895 = vmatpush3.bf16.msra.mxu1 %v9498_v53  ;;  %v9524_v53 = vld [vmem:[%s12107_s27 + $0x170] sm:$0xff]  }
0x132f   :  { %8896 = vmatprep.subr.bf16.mxu1 %v9500_v63 }
0x1332   :  { %8897 = vmatpush3.bf16.msra.mxu1 %v9500_v63  ;;  %v9526_v63 = vld [vmem:[%s12103_s1 + $0x180] sm:$0xff]  }
0x1333   :  { %8922 = vmatprep.subr.bf16.mxu1 %v9502_v3 }
0x13a9   :  { %v3441_v36 = vpop.xlane.xlu0 %3440 }
0x13aa   :  { %v3448_v58 = vmul.f32 0.0078125, %v3441_v36 }
0x13ab   :  { %v3443_v38 = vpop.xlane.xlu1 %3442 }
0x13ac   :  { %v10977_v39 = vsub.f32 %v3434_v24, %v3448_v58  ;;  %v3449_v35 = vmul.f32 0.0078125, %v3443_v38 }
0x13ae   :  { %v10979_v41 = vsub.f32 %v3435_v25, %v3449_v35  ;;  %v3456_v15 = vmul.f32 %v10977_v39, %v10977_v39 }
0x13b0   :  { %3460 = vadd.xlane.f32.xlu0 %v3456_v15  ;;  %v3457_v18 = vmul.f32 %v10979_v41, %v10979_v41 }
0x13b1   :  { %v3445_v14 = vpop.xlane.xlu0 %3444 }
0x13b2   :  { %3462 = vadd.xlane.f32.xlu1 %v3457_v18  ;;  %v3450_v42 = vmul.f32 0.0078125, %v3445_v14  ;;  %v9503_v18 = vld [vmem:[%s12107_s27 + $0x108] sm:$0xff]   ;;  %v9504_v14 = vld [vmem:[%s12107_s27 + $0x110] sm:$0xff]  }
0x13b3   :  { %v3447_v13 = vpop.xlane.xlu1 %3446 }
0x13b4   :  { %v10985_v6 = vsub.f32 %v3436_v2, %v3450_v42  ;;  %v3451_v20 = vmul.f32 0.0078125, %v3447_v13  ;;  %v9505_v42 = vld [vmem:[%s12107_s27 + $0x118] sm:$0xff]   ;;  %v9506_v13 = vld [vmem:[%s12107_s27 + $0x120] sm:$0xff]  }
0x13b6   :  { %v10987_v32 = vsub.f32 %v3437_v7, %v3451_v20  ;;  %v3458_v34 = vmul.f32 %v10985_v6, %v10985_v6  ;;  %v9508_v20 = vld [vmem:[%s12107_s27 + $0x130] sm:$0xff]  }
0x13b8   :  { %3464 = vadd.xlane.f32.xlu0 %v3458_v34  ;;  %v3459_v37 = vmul.f32 %v10987_v32, %v10987_v32  ;;  %v9510_v34 = vld [vmem:[%s12103_s1 + $0x140] sm:$0xff]  }
0x13ba   :  { %3466 = vadd.xlane.f32.xlu1 %v3459_v37  ;;  %v9511_v37 = vld [vmem:[%s12103_s1 + $0x148] sm:$0xff]  }
0x143d   :  { %v3461_v4 = vpop.xlane.xlu0 %3460 }
0x143e   :  { %v3468_v54 = vmul.f32 0.0078125, %v3461_v4  ;;  %v9529_v4 = vld [vmem:[%s12103_s1 + $0x198] sm:$0xff]  }
0x143f   :  { %v3463_v8 = vpop.xlane.xlu1 %3462 }
0x1440   :  { %v3472_v55 = vadd.f32 1e-12, %v3468_v54  ;;  %v3469_v60 = vmul.f32 0.0078125, %v3463_v8  ;;  %v9530_v54 = vld [vmem:[%s12103_s1 + $0x1a0] sm:$0xff]   ;;  %v9531_v8 = vld [vmem:[%s12103_s1 + $0x1a8] sm:$0xff]  }
0x1442   :  { %9790 = vrsqrt.f32 %v3472_v55  ;;  %v3473_v24 = vadd.f32 1e-12, %v3469_v60  ;;  %v9532_v55 = vld [vmem:[%s12103_s1 + $0x1b0] sm:$0xff]   ;;  %v9533_v60 = vld [vmem:[%s12103_s1 + $0x1b8] sm:$0xff]  }
0x1444   :  { %9792 = vrsqrt.f32 %v3473_v24  ;;  %v9534_v24 = vld [vmem:[%s12107_s27 + $0x180] sm:$0xff]  }
0x1445   :  { %v3465_v12 = vpop.xlane.xlu0 %3464 }
0x1446   :  { %v3470_v25 = vmul.f32 0.0078125, %v3465_v12  ;;  %v9535_v12 = vld [vmem:[%s12107_s27 + $0x188] sm:$0xff]  }
0x1447   :  { %v3467_v27 = vpop.xlane.xlu1 %3466 }
0x1448   :  { %v3474_v16 = vadd.f32 1e-12, %v3470_v25  ;;  %v3471_v17 = vmul.f32 0.0078125, %v3467_v27  ;;  %v9536_v25 = vld [vmem:[%s12107_s27 + $0x190] sm:$0xff]   ;;  %v9537_v27 = vld [vmem:[%s12107_s27 + $0x198] sm:$0xff]  }
0x144a   :  { %9794 = vrsqrt.f32 %v3474_v16  ;;  %v3475_v26 = vadd.f32 1e-12, %v3471_v17  ;;  %v9538_v16 = vld [vmem:[%s12107_s27 + $0x1a0] sm:$0xff]   ;;  %v9539_v17 = vld [vmem:[%s12107_s27 + $0x1a8] sm:$0xff]  }
0x144c   :  { %v9791_v19 = vpop.eup %9790  ;;  %9796 = vrsqrt.f32 %v3475_v26  ;;  %v9542_v26 = vld [vmem:[%s12103_s1 + $0x1c0] sm:$0xff]  }
0x144d   :  { %v3480_v59 = vmul.f32 %v9791_v19, %v10977_v39  ;;  %v9540_v19 = vld [vmem:[%s12107_s27 + $0x1b0] sm:$0xff]  }
0x144e   :  { %v9793_v29 = vpop.eup %9792 }
0x144f   :  { %v3490_v23 = vmul.f32 %v7527_v22, %v3480_v59  ;;  %v3481_v30 = vmul.f32 %v9793_v29, %v10979_v41  ;;  %v9543_v59 = vld [vmem:[%s12103_s1 + $0x1c8] sm:$0xff]   ;;  %v9544_v29 = vld [vmem:[%s12103_s1 + $0x1d0] sm:$0xff]  }
0x1451   :  { %v3491_v9 = vmul.f32 %v7527_v22, %v3481_v30  ;;  %v11052_v33 = vadd.f32 %v7528_v31, %v3490_v23  ;;  %v9545_v23 = vld [vmem:[%s12103_s1 + $0x1d8] sm:$0xff]   ;;  %v9546_v30 = vld [vmem:[%s12103_s1 + $0x1e0] sm:$0xff]  }
0x1453   :  { %v11054_v0 = vadd.f32 %v7528_v31, %v3491_v9  ;;  %v9548_v9 = vld [vmem:[%s12103_s1 + $0x1f0] sm:$0xff]  }
0x1454   :  { %v9795_v2 = vpop.eup %9794 }
0x1455   :  { %v11058_v11 = vpack.c.bf16 %v11054_v0, %v11052_v33  ;;  %v3482_v7 = vmul.f32 %v9795_v2, %v10985_v6  ;;  %v9507_v6 = vld [vmem:[%s12107_s27 + $0x128] sm:$0xff]   ;;  %v9549_v2 = vld [vmem:[%s12103_s1 + $0x1f8] sm:$0xff]  }
0x1456   :  { %v9797_v36 = vpop.eup %9796 }
0x1457   :  { %8898 = vmatprep.mubr.bf16.mxu1 %v11058_v11  ;;  %8918 = vmatprep.mubr.bf16.mxu0 %v11058_v11  ;;  %v3492_v58 = vmul.f32 %v7527_v22, %v3482_v7  ;;  %v3483_v38 = vmul.f32 %v9797_v36, %v10987_v32  ;;  %v9509_v32 = vld [vmem:[%s12107_s27 + $0x138] sm:$0xff]   ;;  %v9550_v7 = vld [vmem:[%s12107_s27 + $0x1c0] sm:$0xff]   ;;  %v9551_v36 = vld [vmem:[%s12107_s27 + $0x1c8] sm:$0xff]  }
0x1459   :  { %v3493_v39 = vmul.f32 %v7527_v22, %v3483_v38  ;;  %v11064_v35 = vadd.f32 %v7528_v31, %v3492_v58  ;;  %v9541_v22 = vld [vmem:[%s12107_s27 + $0x1b8] sm:$0xff]   ;;  %v9552_v58 = vld [vmem:[%s12107_s27 + $0x1d0] sm:$0xff]  }
0x145a   :  { %v9553_v38 = vld [vmem:[%s12107_s27 + $0x1d8] sm:$0xff]  }
0x145b   :  { %v11066_v41 = vadd.f32 %v7528_v31, %v3493_v39  ;;  %v9547_v31 = vld [vmem:[%s12103_s1 + $0x1e8] sm:$0xff]   ;;  %v9554_v39 = vld [vmem:[%s12107_s27 + $0x1e0] sm:$0xff]  }
0x145d   :  { %v11070_v15 = vpack.c.bf16 %v11066_v41, %v11064_v35 }
0x145f   :  { %8899 = vmatmul.mubr.bf16.vlgmr.msra.gmra.mrb[56].mxu1 %v11070_v15  ;;  %8919 = vmatmul.mubr.bf16.vlgmr.msra.gmra.mrb[60].mxu0 %v11070_v15 }
0x1460   :  { %8923 = vmatpush3.bf16.msra.mxu1 %v9502_v3  ;;  %8938 = vmatprep.mubr.bf16.mxu1 %v11058_v11  ;;  %v9528_v3 = vld [vmem:[%s12103_s1 + $0x190] sm:$0xff]  }
0x1461   :  { %8924 = vmatprep.subr.bf16.mxu1 %v9503_v18 }
0x1464   :  { %8925 = vmatpush3.bf16.msra.mxu1 %v9503_v18  ;;  %v9555_v18 = vld [vmem:[%s12107_s27 + $0x1e8] sm:$0xff]  }
0x1465   :  { %8926 = vmatprep.subr.bf16.mxu1 %v9504_v14 }
0x1468   :  { %8927 = vmatpush3.bf16.msra.mxu1 %v9504_v14  ;;  %v9556_v14 = vld [vmem:[%s12107_s27 + $0x1f0] sm:$0xff]  }
0x1469   :  { %8928 = vmatprep.subr.bf16.mxu1 %v9505_v42 }
0x146c   :  { %8929 = vmatpush3.bf16.msra.mxu1 %v9505_v42 }
0x146d   :  { %8930 = vmatprep.subr.bf16.mxu1 %v9506_v13 }
0x1470   :  { %8931 = vmatpush3.bf16.msra.mxu1 %v9506_v13  ;;  %v7546_v13 = vld [vmem:[%s12106_s25 + $0x4] ss:$0 sm:$0xff] }
0x1471   :  { %8932 = vmatprep.subr.bf16.mxu1 %v9507_v6 }
0x1474   :  { %8933 = vmatpush3.bf16.msra.mxu1 %v9507_v6 }
0x1475   :  { %8934 = vmatprep.subr.bf16.mxu1 %v9508_v20 }
0x1478   :  { %8935 = vmatpush3.bf16.msra.mxu1 %v9508_v20  ;;  %v7572_v20 = vld [vmem:[%s12105_s23 + $0x4] ss:$0 sm:$0xff] }
0x1479   :  { %8936 = vmatprep.subr.bf16.mxu1 %v9509_v32 }
0x147c   :  { %8937 = vmatpush3.bf16.msra.mxu1 %v9509_v32 }
0x147d   :  { %8958 = vmatprep.subr.bf16.mxu1 %v9510_v34 }
0x147f   :  { %8939 = vmatmul.mubr.bf16.vlgmr.msra.gmra.mrb[60].mxu1 %v11070_v15 }
0x1480   :  { %8959 = vmatpush3.bf16.msra.mxu1 %v9510_v34  ;;  %8974 = vmatprep.mubr.bf16.mxu1 %v11058_v11 }
0x1481   :  { %8960 = vmatprep.subr.bf16.mxu1 %v9511_v37 }
0x1484   :  { %8961 = vmatpush3.bf16.msra.mxu1 %v9511_v37 }
0x1485   :  { %8962 = vmatprep.subr.bf16.mxu1 %v9512_v43 }
0x1488   :  { %8963 = vmatpush3.bf16.msra.mxu1 %v9512_v43 }
0x1489   :  { %8964 = vmatprep.subr.bf16.mxu1 %v9513_v44 }
0x148c   :  { %8965 = vmatpush3.bf16.msra.mxu1 %v9513_v44 }
0x148d   :  { %8966 = vmatprep.subr.bf16.mxu1 %v9514_v45 }
0x1490   :  { %8967 = vmatpush3.bf16.msra.mxu1 %v9514_v45 }
0x1491   :  { %8968 = vmatprep.subr.bf16.mxu1 %v9515_v57 }
0x1494   :  { %8969 = vmatpush3.bf16.msra.mxu1 %v9515_v57 }
0x1495   :  { %8970 = vmatprep.subr.bf16.mxu1 %v9516_v46 }
0x1498   :  { %8971 = vmatpush3.bf16.msra.mxu1 %v9516_v46 }
0x1499   :  { %8972 = vmatprep.subr.bf16.mxu1 %v9517_v40 }
0x149c   :  { %8973 = vmatpush3.bf16.msra.mxu1 %v9517_v40 }
0x149d   :  { %8998 = vmatprep.subr.bf16.mxu1 %v9518_v10 }
0x149f   :  { %8975 = vmatmul.mubr.bf16.vlgmr.msra.gmra.mrb[64].mxu1 %v11070_v15 }
0x14a0   :  { %8999 = vmatpush3.bf16.msra.mxu1 %v9518_v10  ;;  %9014 = vmatprep.mubr.bf16.mxu1 %v11058_v11 }
0x14a1   :  { %9000 = vmatprep.subr.bf16.mxu1 %v9519_v47 }
0x14a4   :  { %9001 = vmatpush3.bf16.msra.mxu1 %v9519_v47  ;;  %v9557_v47 = vld [vmem:[%s12107_s27 + $0x1f8] sm:$0xff]  }
0x14a5   :  { %9002 = vmatprep.subr.bf16.mxu1 %v9520_v62 }
0x14a8   :  { %9003 = vmatpush3.bf16.msra.mxu1 %v9520_v62 }
0x14a9   :  { %9004 = vmatprep.subr.bf16.mxu1 %v9521_v5 }
0x14ac   :  { %9005 = vmatpush3.bf16.msra.mxu1 %v9521_v5 }
0x14ad   :  { %9006 = vmatprep.subr.bf16.mxu1 %v9522_v49 }
0x14b0   :  { %9007 = vmatpush3.bf16.msra.mxu1 %v9522_v49 }
0x14b1   :  { %9008 = vmatprep.subr.bf16.mxu1 %v9523_v50 }
0x14b4   :  { %9009 = vmatpush3.bf16.msra.mxu1 %v9523_v50 }
0x14b5   :  { %9010 = vmatprep.subr.bf16.mxu1 %v9524_v53 }
0x14b8   :  { %9011 = vmatpush3.bf16.msra.mxu1 %v9524_v53 }
0x14b9   :  { %9012 = vmatprep.subr.bf16.mxu1 %v9525_v28 }
0x14bc   :  { %9013 = vmatpush3.bf16.msra.mxu1 %v9525_v28 }
0x14bd   :  { %9050 = vmatprep.subr.bf16.mxu1 %v9526_v63 }
0x14bf   :  { %9015 = vmatmul.mubr.bf16.vlgmr.msra.gmra.mrb[68].mxu1 %v11070_v15 }
0x14c0   :  { %9051 = vmatpush3.bf16.msra.mxu1 %v9526_v63  ;;  %9066 = vmatprep.mubr.bf16.mxu1 %v11058_v11 }
0x14c1   :  { %9052 = vmatprep.subr.bf16.mxu1 %v9527_v1 }
0x14c4   :  { %9053 = vmatpush3.bf16.msra.mxu1 %v9527_v1 }
0x14c5   :  { %9054 = vmatprep.subr.bf16.mxu1 %v9528_v3 }
0x14c8   :  { %9055 = vmatpush3.bf16.msra.mxu1 %v9528_v3 }
0x14c9   :  { %9056 = vmatprep.subr.bf16.mxu1 %v9529_v4 }
0x14cc   :  { %9057 = vmatpush3.bf16.msra.mxu1 %v9529_v4 }
0x14cd   :  { %9058 = vmatprep.subr.bf16.mxu1 %v9530_v54 }
0x14d0   :  { %9059 = vmatpush3.bf16.msra.mxu1 %v9530_v54 }
0x14d1   :  { %9060 = vmatprep.subr.bf16.mxu1 %v9531_v8 }
0x14d4   :  { %9061 = vmatpush3.bf16.msra.mxu1 %v9531_v8  ;;  %v7598_v8 = vld [vmem:[%s12069_s7 + $0x4] ss:$0 sm:$0xff] }
0x14d5   :  { %9062 = vmatprep.subr.bf16.mxu1 %v9532_v55 }
0x14d8   :  { %9063 = vmatpush3.bf16.msra.mxu1 %v9532_v55 }
0x14d9   :  { %9064 = vmatprep.subr.bf16.mxu1 %v9533_v60 }
0x14dc   :  { %9065 = vmatpush3.bf16.msra.mxu1 %v9533_v60 }
0x14dd   :  { %9090 = vmatprep.subr.bf16.mxu1 %v9534_v24 }
0x14df   :  { %9067 = vmatmul.mubr.bf16.vlgmr.msra.gmra.mrb[72].mxu1 %v11070_v15 }
0x14e0   :  { %9091 = vmatpush3.bf16.msra.mxu1 %v9534_v24  ;;  %9106 = vmatprep.mubr.bf16.mxu1 %v11058_v11 }
0x14e1   :  { %9092 = vmatprep.subr.bf16.mxu1 %v9535_v12 }
0x14e4   :  { %9093 = vmatpush3.bf16.msra.mxu1 %v9535_v12 }
0x14e5   :  { %9094 = vmatprep.subr.bf16.mxu1 %v9536_v25 }
0x14e8   :  { %9095 = vmatpush3.bf16.msra.mxu1 %v9536_v25 }
0x14e9   :  { %9096 = vmatprep.subr.bf16.mxu1 %v9537_v27 }
0x14ec   :  { %9097 = vmatpush3.bf16.msra.mxu1 %v9537_v27 }
0x14ed   :  { %9098 = vmatprep.subr.bf16.mxu1 %v9538_v16 }
0x14f0   :  { %9099 = vmatpush3.bf16.msra.mxu1 %v9538_v16 }
0x14f1   :  { %9100 = vmatprep.subr.bf16.mxu1 %v9539_v17 }
0x14f4   :  { %9101 = vmatpush3.bf16.msra.mxu1 %v9539_v17 }
0x14f5   :  { %9102 = vmatprep.subr.bf16.mxu1 %v9540_v19 }
0x14f8   :  { %9103 = vmatpush3.bf16.msra.mxu1 %v9540_v19 }
0x14f9   :  { %9104 = vmatprep.subr.bf16.mxu1 %v9541_v22 }
0x14fc   :  { %9105 = vmatpush3.bf16.msra.mxu1 %v9541_v22  ;;  %v7632_v22 = vld [vmem:[%s12106_s25 + $0x5] ss:$0 sm:$0xff] }
0x14fd   :  { %9134 = vmatprep.subr.bf16.mxu1 %v9542_v26 }
0x14ff   :  { %9107 = vmatmul.mubr.bf16.vlgmr.msra.gmra.mrb[76].mxu1 %v11070_v15 }
0x1500   :  { %9135 = vmatpush3.bf16.msra.mxu1 %v9542_v26  ;;  %9150 = vmatprep.mubr.bf16.mxu1 %v11058_v11 }
0x1501   :  { %9136 = vmatprep.subr.bf16.mxu1 %v9543_v59 }
0x1504   :  { %9137 = vmatpush3.bf16.msra.mxu1 %v9543_v59 }
0x1505   :  { %9138 = vmatprep.subr.bf16.mxu1 %v9544_v29 }
0x1508   :  { %9139 = vmatpush3.bf16.msra.mxu1 %v9544_v29 }
0x1509   :  { %9140 = vmatprep.subr.bf16.mxu1 %v9545_v23 }
0x150c   :  { %9141 = vmatpush3.bf16.msra.mxu1 %v9545_v23 }
0x150d   :  { %9142 = vmatprep.subr.bf16.mxu1 %v9546_v30 }
0x1510   :  { %9143 = vmatpush3.bf16.msra.mxu1 %v9546_v30 }
0x1511   :  { %9144 = vmatprep.subr.bf16.mxu1 %v9547_v31 }
0x1514   :  { %9145 = vmatpush3.bf16.msra.mxu1 %v9547_v31 }
0x1515   :  { %9146 = vmatprep.subr.bf16.mxu1 %v9548_v9 }
0x1518   :  { %9147 = vmatpush3.bf16.msra.mxu1 %v9548_v9 }
0x1519   :  { %9148 = vmatprep.subr.bf16.mxu1 %v9549_v2 }
0x151c   :  { %9149 = vmatpush3.bf16.msra.mxu1 %v9549_v2 }
0x151d   :  { %9174 = vmatprep.subr.bf16.mxu1 %v9550_v7 }
0x151f   :  { %9151 = vmatmul.mubr.bf16.vlgmr.msra.gmra.mrb[80].mxu1 %v11070_v15 }
0x1520   :  { %9175 = vmatpush3.bf16.msra.mxu1 %v9550_v7  ;;  %9190 = vmatprep.mubr.bf16.mxu1 %v11058_v11 }
0x1521   :  { %9176 = vmatprep.subr.bf16.mxu1 %v9551_v36 }
0x1524   :  { %9177 = vmatpush3.bf16.msra.mxu1 %v9551_v36 }
0x1525   :  { %9178 = vmatprep.subr.bf16.mxu1 %v9552_v58 }
0x1528   :  { %9179 = vmatpush3.bf16.msra.mxu1 %v9552_v58 }
0x1529   :  { %9180 = vmatprep.subr.bf16.mxu1 %v9553_v38 }
0x152c   :  { %9181 = vmatpush3.bf16.msra.mxu1 %v9553_v38  ;;  %v7684_v38 = vld [vmem:[%s12069_s7 + $0x5] ss:$0 sm:$0xff] }
0x152d   :  { %9182 = vmatprep.subr.bf16.mxu1 %v9554_v39 }
0x1530   :  { %9183 = vmatpush3.bf16.msra.mxu1 %v9554_v39 }
0x1531   :  { %9184 = vmatprep.subr.bf16.mxu1 %v9555_v18 }
0x1532   :  { %v8900_v42 = vpop.f32.mrb[56].mxu1  ;;  %v8920_v6 = vpop.f32.mrb[60].mxu0 }
0x1533   :  { %v3613_v32 = vpop.f32.mrb[57].mxu1  ;;  %v3735_v34 = vpop.f32.mrb[61].mxu0  ;;  %v3622_v44 = vadd.f32 %v8900_v42, %v7546_v13  ;;  %v3744_v45 = vadd.f32 %v8920_v6, %v7572_v20 }
0x1534   :  { %9185 = vmatpush3.bf16.msra.mxu1 %v9555_v18  ;;  %v8901_v37 = vpop.f32.mrb[58].mxu1  ;;  %v8921_v43 = vpop.f32.mrb[62].mxu0  ;;  %v3614_v62 = vadd.f32 %v7546_v13, %v3613_v32  ;;  %v3736_v5 = vadd.f32 %v7572_v20, %v3735_v34 }
0x1535   :  { %v3625_v57 = vadd.f32 %v8901_v37, %v7546_v13  ;;  %v3747_v46 = vadd.f32 %v8921_v43, %v7572_v20  ;;  %v3616_v40 = vpop.f32.mrb[59].mxu1  ;;  %v3738_v10 = vpop.f32.mrb[63].mxu0  ;;  %9186 = vmatprep.subr.bf16.mxu1 %v9556_v14  ;;  %v7726_v37 = vld [vmem:[%s12106_s25 + $0x6] ss:$0 sm:$0xff] }
0x1536   :  { %v3617_v49 = vadd.f32 %v7546_v13, %v3616_v40  ;;  %v3739_v50 = vadd.f32 %v7572_v20, %v3738_v10 }
0x1537   :  { %v3873_v53 = vpack.c.bf16 %v3625_v57, %v3622_v44  ;;  %v3875_v28 = vpack.c.bf16 %v3747_v46, %v3744_v45 }
0x1538   :  { %v3872_v63 = vpack.c.bf16 %v3617_v49, %v3614_v62  ;;  %v3874_v1 = vpack.c.bf16 %v3739_v50, %v3736_v5  ;;  %9187 = vmatpush3.bf16.msra.mxu1 %v9556_v14  ;;  %v7778_v50 = vld [vmem:[%s12069_s7 + $0x6] ss:$0 sm:$0xff] }
0x1539   :  { %9188 = vmatprep.subr.bf16.mxu1 %v9557_v47  ;;  %v3886_v4 = vsel %vm447_vm0, %v3875_v28, 0 }
0x153a   :  { %9290 = vmatprep.subr.msk.bf16.mxu0 %vm447_vm0, %v3874_v1  ;;  %8946 = vmatprep.mubr.msk.bf16.mxu0 %vm447_vm0, %v3872_v63  ;;  %v3883_v3 = vsel %vm447_vm0, %v3874_v1, 0 }
0x153b   :  { %8943 = vmatpush3.bf16.xpose.msra.mxu0 %v3883_v3 }
0x153c   :  { %9189 = vmatpush3.bf16.msra.mxu1 %v9557_v47  ;;  %9291 = vmatprep.subr.msk.bf16.mxu0 %vm447_vm0, %v3875_v28 }
0x153f   :  { %9191 = vmatmul.mubr.bf16.vlgmr.msra.gmra.mrb[84].mxu1 %v11070_v15 }
0x1540   :  { %6280 = vmatprep.mubr.bf16.mxu1 %v9942_v48 }
0x1543   :  { %8945 = vmatpush3.bf16.xpose.msra.mxu0 %v3886_v4 }
0x154a   :  { %8947 = vmatmul.mubr.msk.bf16.vlgmr.msra.gmra.mrb[64].mxu0 %vm447_vm0, %v3873_v53 }
0x1552   :  { %v8940_v54 = vpop.f32.mrb[60].mxu1 }
0x1553   :  { %v3857_v55 = vpop.f32.mrb[61].mxu1  ;;  %v3866_v24 = vadd.f32 %v8940_v54, %v7598_v8 }
0x1554   :  { %v8941_v60 = vpop.f32.mrb[62].mxu1  ;;  %v3858_v27 = vadd.f32 %v7598_v8, %v3857_v55 }
0x1555   :  { %v3869_v12 = vadd.f32 %v8941_v60, %v7598_v8  ;;  %v3860_v25 = vpop.f32.mrb[63].mxu1  ;;  %v7816_v60 = vld [vmem:[%s12106_s25 + $0x7] ss:$0 sm:$0xff] }
0x1556   :  { %v3861_v16 = vadd.f32 %v7598_v8, %v3860_v25 }
0x1557   :  { %v3984_v17 = vpack.c.bf16 %v3869_v12, %v3866_v24 }
0x1558   :  { %v3983_v19 = vpack.c.bf16 %v3861_v16, %v3858_v27 }
0x155a   :  { %8950 = vmatprep.subr.bf16.mxu0 %v3983_v19 }
0x155b   :  { %8951 = vmatpush3.bf16.msra.mxu0 %v3983_v19 }
0x155c   :  { %8952 = vmatprep.subr.bf16.mxu0 %v3984_v17 }
0x155f   :  { %8953 = vmatpush3.bf16.msra.mxu0 %v3984_v17 }
0x1572   :  { %v8976_v26 = vpop.f32.mrb[64].mxu1 }
0x1573   :  { %v11272_v59 = vadd.f32 %v8976_v26, %v7632_v22  ;;  %v4154_v29 = vpop.f32.mrb[65].mxu1 }
0x1574   :  { %v8977_v23 = vpop.f32.mrb[66].mxu1  ;;  %v11276_v9 = vadd.f32 %v7632_v22, %v4154_v29 }
0x1575   :  { %v11274_v30 = vadd.f32 %v8977_v23, %v7632_v22  ;;  %v4157_v31 = vpop.f32.mrb[67].mxu1 }
0x1576   :  { %v11278_v2 = vadd.f32 %v7632_v22, %v4157_v31  ;;  %v7868_v31 = vld [vmem:[%s12069_s7 + $0x7] ss:$0 sm:$0xff] }
0x1577   :  { %v4414_v7 = vpack.c.bf16 %v11274_v30, %v11272_v59 }
0x1578   :  { %v4413_v36 = vpack.c.bf16 %v11278_v2, %v11276_v9  ;;  %v7658_v9 = vld [vmem:[%s12105_s23 + $0x5] ss:$0 sm:$0xff] }
0x1592   :  { %v9016_v58 = vpop.f32.mrb[68].mxu1 }
0x1593   :  { %v4398_v39 = vpop.f32.mrb[69].mxu1  ;;  %v4407_v14 = vadd.f32 %v9016_v58, %v7684_v38 }
0x1594   :  { %v9017_v18 = vpop.f32.mrb[70].mxu1  ;;  %v4399_v6 = vadd.f32 %v7684_v38, %v4398_v39 }
0x1595   :  { %v4410_v42 = vadd.f32 %v9017_v18, %v7684_v38  ;;  %v4401_v13 = vpop.f32.mrb[71].mxu1 }
0x1596   :  { %v4402_v20 = vadd.f32 %v7684_v38, %v4401_v13 }
0x1597   :  { %v11287_v32 = vpack.c.bf16 %v4410_v42, %v4407_v14 }
0x1598   :  { %v11289_v34 = vpack.c.bf16 %v4402_v20, %v4399_v6 }
0x15b2   :  { %v9068_v43 = vpop.f32.mrb[72].mxu1 }
0x15b3   :  { %v11294_v44 = vadd.f32 %v9068_v43, %v7726_v37  ;;  %v4829_v45 = vpop.f32.mrb[73].mxu1 }
0x15b4   :  { %v9069_v57 = vpop.f32.mrb[74].mxu1  ;;  %v11298_v10 = vadd.f32 %v7726_v37, %v4829_v45  ;;  %v11338_v45 = vld [vmem:[%s12108_s26] sm:$0xff] }
0x15b5   :  { %v11296_v46 = vadd.f32 %v9069_v57, %v7726_v37  ;;  %v4832_v40 = vpop.f32.mrb[75].mxu1 }
0x15b6   :  { %v11300_v47 = vadd.f32 %v7726_v37, %v4832_v40 }
0x15b7   :  { %v5089_v62 = vpack.c.bf16 %v11296_v46, %v11294_v44 }
0x15b8   :  { %v5088_v5 = vpack.c.bf16 %v11300_v47, %v11298_v10 }
0x15d2   :  { %v9108_v49 = vpop.f32.mrb[76].mxu1 }
0x15d3   :  { %v5073_v53 = vpop.f32.mrb[77].mxu1  ;;  %v5082_v63 = vadd.f32 %v9108_v49, %v7778_v50 }
0x15d4   :  { %v9109_v28 = vpop.f32.mrb[78].mxu1  ;;  %v5074_v4 = vadd.f32 %v7778_v50, %v5073_v53 }
0x15d5   :  { %v5085_v1 = vadd.f32 %v9109_v28, %v7778_v50  ;;  %v5076_v3 = vpop.f32.mrb[79].mxu1  ;;  %v11350_v28 = vld [vmem:[%s12108_s26 + $0x8] sm:$0xff] }
0x15d6   :  { %v5077_v54 = vadd.f32 %v7778_v50, %v5076_v3  ;;  %v11344_v50 = vld [vmem:[%s12108_s26 + $0x10] sm:$0xff]  ;;  %v11357_v3 = vld [vmem:[%s12108_s26 + $0x18] sm:$0xff]  ;;  %s12109_s26 = sld [smem:[#allocation12_spill]] }
0x15d7   :  { %v11309_v8 = vpack.c.bf16 %v5085_v1, %v5082_v63 }
0x15d8   :  { %v11311_v55 = vpack.c.bf16 %v5077_v54, %v5074_v4 }
0x15f2   :  { %v9152_v24 = vpop.f32.mrb[80].mxu1 }
0x15f3   :  { %v11316_v12 = vadd.f32 %v9152_v24, %v7816_v60  ;;  %v5441_v25 = vpop.f32.mrb[81].mxu1 }
0x15f4   :  { %v9153_v27 = vpop.f32.mrb[82].mxu1  ;;  %v11320_v19 = vadd.f32 %v7816_v60, %v5441_v25 }
0x15f5   :  { %v11318_v16 = vadd.f32 %v9153_v27, %v7816_v60  ;;  %v5444_v17 = vpop.f32.mrb[83].mxu1 }
0x15f6   :  { %v11322_v22 = vadd.f32 %v7816_v60, %v5444_v17 }
0x15f7   :  { %v5701_v26 = vpack.c.bf16 %v11318_v16, %v11316_v12 }
0x15f8   :  { %v5700_v29 = vpack.c.bf16 %v11322_v22, %v11320_v19 }
0x1612   :  { %v9192_v23 = vpop.f32.mrb[84].mxu1 }
0x1613   :  { %v5685_v58 = vpop.f32.mrb[85].mxu1  ;;  %v5694_v39 = vadd.f32 %v9192_v23, %v7868_v31 }
0x1614   :  { %v9193_v38 = vpop.f32.mrb[86].mxu1  ;;  %v5686_v42 = vadd.f32 %v7868_v31, %v5685_v58 }
0x1615   :  { %v5697_v18 = vadd.f32 %v9193_v38, %v7868_v31  ;;  %v5688_v14 = vpop.f32.mrb[87].mxu1 }
0x1616   :  { %v5689_v13 = vadd.f32 %v7868_v31, %v5688_v14 }
0x1617   :  { %v11331_v6 = vpack.c.bf16 %v5697_v18, %v5694_v39 }
0x1618   :  { %v11333_v20 = vpack.c.bf16 %v5689_v13, %v5686_v42 }
0x161d   :  { %v8948_v37 = vpop.f32.mrb[64].mxu0 }
0x161e   :  { %v3922_v43 = vpop.f32.mrb[65].mxu0  ;;  %v3931_v53 = vadd.f32 %v11344_v50, %v8948_v37 }
0x161f   :  { %v3923_v57 = vadd.f32 %v11338_v45, %v3922_v43  ;;  %v8949_v40 = vpop.f32.mrb[66].mxu0 }
0x1620   :  { %v3925_v49 = vpop.f32.mrb[67].mxu0  ;;  %v3934_v4 = vadd.f32 %v11357_v3, %v8949_v40  ;;  %v3943_v60 = vsel %vm447_vm0, %v3931_v53, -inf }
0x1621   :  { %v3926_v63 = vadd.f32 %v11350_v28, %v3925_v49  ;;  %v3937_v1 = vsel %vm447_vm0, %v3923_v57, -inf }
0x1622   :  { %3938 = vmax.xlane.f32.xlu0 %v3937_v1  ;;  %v3946_v24 = vsel %vm447_vm0, %v3934_v4, -inf }
0x1623   :  { %v3940_v54 = vsel %vm447_vm0, %v3926_v63, -inf }
0x1624   :  { %3941 = vmax.xlane.f32.xlu1 %v3940_v54 }
0x1626   :  { %3944 = vmax.xlane.f32.xlu0 %v3943_v60 }
0x1628   :  { %3947 = vmax.xlane.f32.xlu1 %v3946_v24 }
0x16af   :  { %v3939_v25 = vpop.xlane.xlu0 %3938 }
0x16b0   :  { %v3949_v27 = vsub.f32 %v3923_v57, %v3939_v25 }
0x16b1   :  { %v3942_v17 = vpop.xlane.xlu1 %3941 }
0x16b2   :  { %v3953_v23 = vmul.f32 1.442695, %v3949_v27  ;;  %v3950_v31 = vsub.f32 %v3926_v63, %v3942_v17 }
0x16b3   :  { %v3945_v58 = vpop.xlane.xlu0 %3944 }
0x16b4   :  { %9798 = vpow2.f32 %v3953_v23  ;;  %v3955_v38 = vmul.f32 1.442695, %v3950_v31  ;;  %v3951_v39 = vsub.f32 %v3931_v53, %v3945_v58 }
0x16b5   :  { %v3948_v18 = vpop.xlane.xlu1 %3947 }
0x16b6   :  { %9800 = vpow2.f32 %v3955_v38  ;;  %v3957_v14 = vmul.f32 1.442695, %v3951_v39  ;;  %v3952_v42 = vsub.f32 %v3934_v4, %v3948_v18  ;;  %v9558_v4 = vld [vmem:[%s12102_s29 + $0x140] sm:$0xff]  }
0x16b7   :  { %8978 = vmatprep.subr.bf16.mxu0 %v9558_v4 }
0x16b8   :  { %9802 = vpow2.f32 %v3957_v14  ;;  %v3959_v13 = vmul.f32 1.442695, %v3952_v42 }
0x16ba   :  { %9804 = vpow2.f32 %v3959_v13  ;;  %v9559_v13 = vld [vmem:[%s12102_s29 + $0x148] sm:$0xff]  }
0x16be   :  { %v9799_v37 = vpop.eup %9798 }
0x16bf   :  { %v3961_v43 = vsel %vm447_vm0, %v9799_v37, 0.0 }
0x16c0   :  { %v9801_v40 = vpop.eup %9800  ;;  %3962 = vadd.xlane.f32.xlu0 %v3961_v43  ;;  %v9561_v43 = vld [vmem:[%s12102_s29 + $0x158] sm:$0xff]  }
0x16c1   :  { %v3964_v57 = vsel %vm447_vm0, %v9801_v40, 0.0 }
0x16c2   :  { %v9803_v49 = vpop.eup %9802  ;;  %3965 = vadd.xlane.f32.xlu1 %v3964_v57  ;;  %v9563_v57 = vld [vmem:[%s12102_s29 + $0x168] sm:$0xff]  }
0x16c3   :  { %v3967_v63 = vsel %vm447_vm0, %v9803_v49, 0.0 }
0x16c4   :  { %v9805_v1 = vpop.eup %9804  ;;  %3968 = vadd.xlane.f32.xlu0 %v3967_v63  ;;  %v9565_v63 = vld [vmem:[%s12102_s29 + $0x178] sm:$0xff]  }
0x16c5   :  { %v3970_v53 = vsel %vm447_vm0, %v9805_v1, 0.0 }
0x16c6   :  { %3971 = vadd.xlane.f32.xlu1 %v3970_v53 }
0x174d   :  { %v3963_v54 = vpop.xlane.xlu0 %3962 }
0x174e   :  { %9806 = vrcp.f32 %v3963_v54 }
0x174f   :  { %v3966_v60 = vpop.xlane.xlu1 %3965 }
0x1750   :  { %9808 = vrcp.f32 %v3966_v60 }
0x1751   :  { %v3969_v24 = vpop.xlane.xlu0 %3968 }
0x1752   :  { %9810 = vrcp.f32 %v3969_v24 }
0x1753   :  { %v3972_v25 = vpop.xlane.xlu1 %3971 }
0x1754   :  { %9812 = vrcp.f32 %v3972_v25 }
0x1758   :  { %v9807_v27 = vpop.eup %9806 }
0x1759   :  { %v3977_v23 = vmul.f32 %v9807_v27, %v9799_v37  ;;  %v9560_v37 = vld [vmem:[%s12102_s29 + $0x150] sm:$0xff]  }
0x175a   :  { %v9809_v17 = vpop.eup %9808 }
0x175b   :  { %v3978_v31 = vmul.f32 %v9809_v17, %v9801_v40  ;;  %v9562_v40 = vld [vmem:[%s12102_s29 + $0x160] sm:$0xff]  }
0x175c   :  { %v9811_v58 = vpop.eup %9810 }
0x175d   :  { %v3981_v38 = vpack.c.bf16 %v3978_v31, %v3977_v23  ;;  %v3979_v18 = vmul.f32 %v9811_v58, %v9803_v49  ;;  %v9564_v49 = vld [vmem:[%s12102_s29 + $0x170] sm:$0xff]  }
0x175e   :  { %v9813_v39 = vpop.eup %9812 }
0x175f   :  { %v3980_v14 = vmul.f32 %v9813_v39, %v9805_v1  ;;  %8954 = vmatprep.mubr.msk.bf16.mxu0 %vm447_vm0, %v3981_v38 }
0x1761   :  { %v3982_v42 = vpack.c.bf16 %v3980_v14, %v3979_v18 }
0x1763   :  { %8955 = vmatmul.mubr.msk.bf16.vlgmr.msra.gmra.mrb[68].mxu0 %vm447_vm0, %v3982_v42 }
0x1764   :  { %8979 = vmatpush3.bf16.msra.mxu0 %v9558_v4  ;;  %8994 = vmatprep.mubr.bf16.mxu0 %v11058_v11 }
0x1765   :  { %8980 = vmatprep.subr.bf16.mxu0 %v9559_v13 }
0x1768   :  { %8981 = vmatpush3.bf16.msra.mxu0 %v9559_v13 }
0x1769   :  { %8982 = vmatprep.subr.bf16.mxu0 %v9560_v37 }
0x176c   :  { %8983 = vmatpush3.bf16.msra.mxu0 %v9560_v37 }
0x176d   :  { %8984 = vmatprep.subr.bf16.mxu0 %v9561_v43 }
0x1770   :  { %8985 = vmatpush3.bf16.msra.mxu0 %v9561_v43 }
0x1771   :  { %8986 = vmatprep.subr.bf16.mxu0 %v9562_v40 }
0x1774   :  { %8987 = vmatpush3.bf16.msra.mxu0 %v9562_v40 }
0x1775   :  { %8988 = vmatprep.subr.bf16.mxu0 %v9563_v57 }
0x1778   :  { %8989 = vmatpush3.bf16.msra.mxu0 %v9563_v57 }
0x1779   :  { %8990 = vmatprep.subr.bf16.mxu0 %v9564_v49 }
0x177c   :  { %8991 = vmatpush3.bf16.msra.mxu0 %v9564_v49 }
0x177d   :  { %8992 = vmatprep.subr.bf16.mxu0 %v9565_v63 }
0x1780   :  { %8993 = vmatpush3.bf16.msra.mxu0 %v9565_v63 }
0x1783   :  { %8995 = vmatmul.mubr.bf16.vlgmr.msra.gmra.mrb[72].mxu0 %v11070_v15 }
0x1784   :  { %9022 = vmatprep.mubr.msk.bf16.mxu0 %vm447_vm0, %v4413_v36 }
0x1836   :  { %v11399_v1 = vpop.f32.mrb[68].mxu0 }
0x1837   :  { %v11401_v53 = vpop.f32.mrb[69].mxu0 }
0x1838   :  { %v11403_v4 = vpop.f32.mrb[70].mxu0 }
0x1839   :  { %v4041_v54 = vpack.c.bf16 %v11403_v4, %v11399_v1  ;;  %v11407_v60 = vpop.f32.mrb[71].mxu0  ;;  %v9574_v1 = vld [vmem:[%s12102_s29 + $0x1a0] sm:$0xff]   ;;  %v9575_v4 = vld [vmem:[%s12102_s29 + $0x1a8] sm:$0xff]  }
0x183a   :  { %v4040_v24 = vpack.c.bf16 %v11407_v60, %v11401_v53  ;;  %v9572_v53 = vld [vmem:[%s12102_s29 + $0x190] sm:$0xff]   ;;  %v9573_v60 = vld [vmem:[%s12102_s29 + $0x198] sm:$0xff]  }
0x1856   :  { %v8996_v25 = vpop.f32.mrb[72].mxu0 }
0x1857   :  { %v4276_v2 = vpop.f32.mrb[73].mxu0  ;;  %v4285_v27 = vadd.f32 %v8996_v25, %v7658_v9 }
0x1858   :  { %v8997_v36 = vpop.f32.mrb[74].mxu0  ;;  %v4277_v31 = vadd.f32 %v7658_v9, %v4276_v2 }
0x1859   :  { %v4288_v17 = vadd.f32 %v8997_v36, %v7658_v9  ;;  %v4279_v23 = vpop.f32.mrb[75].mxu0 }
0x185a   :  { %v4280_v58 = vadd.f32 %v7658_v9, %v4279_v23 }
0x185b   :  { %v4416_v38 = vpack.c.bf16 %v4288_v17, %v4285_v27 }
0x185c   :  { %v4415_v39 = vpack.c.bf16 %v4280_v58, %v4277_v31 }
0x185d   :  { %v4427_v14 = vsel %vm447_vm0, %v4416_v38, 0 }
0x185e   :  { %9292 = vmatprep.subr.msk.bf16.mxu0 %vm447_vm0, %v4415_v39  ;;  %v4424_v18 = vsel %vm447_vm0, %v4415_v39, 0 }
0x185f   :  { %9019 = vmatpush3.bf16.xpose.msra.mxu0 %v4424_v18 }
0x1860   :  { %9293 = vmatprep.subr.msk.bf16.mxu0 %vm447_vm0, %v4416_v38 }
0x1867   :  { %9021 = vmatpush3.bf16.xpose.msra.mxu0 %v4427_v14 }
0x1868   :  { %9026 = vmatprep.subr.bf16.mxu0 %v11289_v34 }
0x186e   :  { %9023 = vmatmul.mubr.msk.bf16.vlgmr.msra.gmra.mrb[76].mxu0 %vm447_vm0, %v4414_v7 }
0x186f   :  { %9027 = vmatpush3.bf16.msra.mxu0 %v11289_v34 }
0x1870   :  { %9028 = vmatprep.subr.bf16.mxu0 %v11287_v32 }
0x1873   :  { %9029 = vmatpush3.bf16.msra.mxu0 %v11287_v32 }
0x1941   :  { %v9024_v42 = vpop.f32.mrb[76].mxu0 }
0x1942   :  { %v4463_v13 = vpop.f32.mrb[77].mxu0  ;;  %v4472_v57 = vadd.f32 %v11344_v50, %v9024_v42 }
0x1943   :  { %v4464_v37 = vadd.f32 %v11338_v45, %v4463_v13  ;;  %v9025_v43 = vpop.f32.mrb[78].mxu0 }
0x1944   :  { %v4466_v40 = vpop.f32.mrb[79].mxu0  ;;  %v4475_v30 = vadd.f32 %v11357_v3, %v9025_v43  ;;  %v4484_v32 = vsel %vm447_vm0, %v4472_v57, -inf }
0x1945   :  { %v4467_v49 = vadd.f32 %v11350_v28, %v4466_v40  ;;  %v4478_v59 = vsel %vm447_vm0, %v4464_v37, -inf }
0x1946   :  { %4479 = vmax.xlane.f32.xlu0 %v4478_v59  ;;  %v4487_v34 = vsel %vm447_vm0, %v4475_v30, -inf }
0x1947   :  { %v4481_v7 = vsel %vm447_vm0, %v4467_v49, -inf }
0x1948   :  { %4482 = vmax.xlane.f32.xlu1 %v4481_v7 }
0x194a   :  { %4485 = vmax.xlane.f32.xlu0 %v4484_v32 }
0x194c   :  { %4488 = vmax.xlane.f32.xlu1 %v4487_v34 }
0x19d3   :  { %v4480_v63 = vpop.xlane.xlu0 %4479 }
0x19d4   :  { %v4490_v25 = vsub.f32 %v4464_v37, %v4480_v63 }
0x19d5   :  { %v4483_v9 = vpop.xlane.xlu1 %4482 }
0x19d6   :  { %v4494_v2 = vmul.f32 1.442695, %v4490_v25  ;;  %v4491_v36 = vsub.f32 %v4467_v49, %v4483_v9  ;;  %v9566_v49 = vld [vmem:[%s12070_s8 + $0x50] sm:$0xff]  }
0x19d7   :  { %v4486_v27 = vpop.xlane.xlu0 %4485  ;;  %9034 = vmatprep.subr.bf16.mxu0 %v9566_v49 }
0x19d8   :  { %9814 = vpow2.f32 %v4494_v2  ;;  %v4496_v17 = vmul.f32 1.442695, %v4491_v36  ;;  %v4492_v23 = vsub.f32 %v4472_v57, %v4486_v27 }
0x19d9   :  { %v4489_v31 = vpop.xlane.xlu1 %4488 }
0x19da   :  { %9816 = vpow2.f32 %v4496_v17  ;;  %v4498_v58 = vmul.f32 1.442695, %v4492_v23  ;;  %v4493_v38 = vsub.f32 %v4475_v30, %v4489_v31 }
0x19dc   :  { %9818 = vpow2.f32 %v4498_v58  ;;  %v4500_v39 = vmul.f32 1.442695, %v4493_v38  ;;  %v9567_v58 = vld [vmem:[%s12070_s8 + $0x58] sm:$0xff]   ;;  %v9568_v38 = vld [vmem:[%s12070_s8 + $0x40] sm:$0xff]  }
0x19de   :  { %9820 = vpow2.f32 %v4500_v39 }
0x19e2   :  { %v9815_v18 = vpop.eup %9814 }
0x19e3   :  { %v4502_v14 = vsel %vm447_vm0, %v9815_v18, 0.0 }
0x19e4   :  { %v9817_v42 = vpop.eup %9816  ;;  %4503 = vadd.xlane.f32.xlu0 %v4502_v14 }
0x19e5   :  { %v4505_v13 = vsel %vm447_vm0, %v9817_v42, 0.0 }
0x19e6   :  { %v9819_v37 = vpop.eup %9818  ;;  %4506 = vadd.xlane.f32.xlu1 %v4505_v13 }
0x19e7   :  { %v4508_v43 = vsel %vm447_vm0, %v9819_v37, 0.0 }
0x19e8   :  { %v9821_v40 = vpop.eup %9820  ;;  %4509 = vadd.xlane.f32.xlu0 %v4508_v43  ;;  %v9569_v43 = vld [vmem:[%s12070_s8 + $0x48] sm:$0xff]  }
0x19e9   :  { %v4511_v57 = vsel %vm447_vm0, %v9821_v40, 0.0 }
0x19ea   :  { %4512 = vadd.xlane.f32.xlu1 %v4511_v57  ;;  %v9571_v57 = vld [vmem:[%s12102_s29 + $0x188] sm:$0xff]  }
0x1a71   :  { %v4504_v59 = vpop.xlane.xlu0 %4503 }
0x1a72   :  { %9822 = vrcp.f32 %v4504_v59  ;;  %v7752_v59 = vld [vmem:[%s12105_s23 + $0x6] ss:$0 sm:$0xff] }
0x1a73   :  { %v4507_v30 = vpop.xlane.xlu1 %4506 }
0x1a74   :  { %9824 = vrcp.f32 %v4507_v30 }
0x1a75   :  { %v4510_v7 = vpop.xlane.xlu0 %4509 }
0x1a76   :  { %9826 = vrcp.f32 %v4510_v7 }
0x1a77   :  { %v4513_v32 = vpop.xlane.xlu1 %4512 }
0x1a78   :  { %9828 = vrcp.f32 %v4513_v32 }
0x1a7c   :  { %v9823_v34 = vpop.eup %9822 }
0x1a7d   :  { %v4518_v25 = vmul.f32 %v9823_v34, %v9815_v18 }
0x1a7e   :  { %v9825_v63 = vpop.eup %9824 }
0x1a7f   :  { %v4519_v9 = vmul.f32 %v9825_v63, %v9817_v42 }
0x1a80   :  { %v9827_v2 = vpop.eup %9826 }
0x1a81   :  { %v4522_v36 = vpack.c.bf16 %v4519_v9, %v4518_v25  ;;  %v4520_v17 = vmul.f32 %v9827_v2, %v9819_v37 }
0x1a82   :  { %v9829_v27 = vpop.eup %9828 }
0x1a83   :  { %v4521_v23 = vmul.f32 %v9829_v27, %v9821_v40  ;;  %9030 = vmatprep.mubr.msk.bf16.mxu0 %vm447_vm0, %v4522_v36  ;;  %v9570_v40 = vld [vmem:[%s12102_s29 + $0x180] sm:$0xff]  }
0x1a85   :  { %v4523_v31 = vpack.c.bf16 %v4521_v23, %v4520_v17 }
0x1a87   :  { %9031 = vmatmul.mubr.msk.bf16.vlgmr.msra.gmra.mrb[80].mxu0 %vm447_vm0, %v4523_v31 }
0x1a88   :  { %9035 = vmatpush3.bf16.msra.mxu0 %v9566_v49 }
0x1a89   :  { %9036 = vmatprep.subr.bf16.mxu0 %v9567_v58 }
0x1a8c   :  { %9037 = vmatpush3.bf16.msra.mxu0 %v9567_v58 }
0x1a8d   :  { %9042 = vmatprep.subr.bf16.mxu0 %v9568_v38 }
0x1b5a   :  { %v9032_v39 = vpop.f32.mrb[80].mxu0 }
0x1b5b   :  { %v4566_v18 = vpop.f32.mrb[81].mxu0 }
0x1b5c   :  { %v9033_v14 = vpop.f32.mrb[82].mxu0 }
0x1b5d   :  { %v4582_v42 = vpack.c.bf16 %v9033_v14, %v9032_v39  ;;  %v4569_v13 = vpop.f32.mrb[83].mxu0 }
0x1b5e   :  { %v4581_v37 = vpack.c.bf16 %v4569_v13, %v4566_v18 }
0x1b60   :  { %9038 = vmatprep.mubr.msk.bf16.mxu0 %vm447_vm0, %v4581_v37 }
0x1b61   :  { %9039 = vmatmul.mubr.msk.bf16.vlgmr.msra.gmra.mrb[84].mxu0 %vm447_vm0, %v4582_v42 }
0x1b62   :  { %9043 = vmatpush3.bf16.msra.mxu0 %v9568_v38  ;;  %9046 = vmatprep.mubr.msk.bf16.mxu0 %vm447_vm0, %v4040_v24  ;;  %v9577_v24 = vld [vmem:[%s12102_s29 + $0x1b8] sm:$0xff]  }
0x1b63   :  { %9044 = vmatprep.subr.bf16.mxu0 %v9569_v43 }
0x1b66   :  { %9045 = vmatpush3.bf16.msra.mxu0 %v9569_v43 }
0x1b67   :  { %9070 = vmatprep.subr.bf16.mxu0 %v9570_v40 }
0x1b6d   :  { %9047 = vmatmul.mubr.msk.bf16.vlgmr.msra.gmra.mrb[84].mxu0 %vm447_vm0, %v4041_v54  ;;  %v9576_v54 = vld [vmem:[%s12102_s29 + $0x1b0] sm:$0xff]  }
0x1b6e   :  { %9071 = vmatpush3.bf16.msra.mxu0 %v9570_v40  ;;  %9086 = vmatprep.mubr.bf16.mxu0 %v11058_v11 }
0x1b6f   :  { %9072 = vmatprep.subr.bf16.mxu0 %v9571_v57 }
0x1b72   :  { %9073 = vmatpush3.bf16.msra.mxu0 %v9571_v57 }
0x1b73   :  { %9074 = vmatprep.subr.bf16.mxu0 %v9572_v53 }
0x1b76   :  { %9075 = vmatpush3.bf16.msra.mxu0 %v9572_v53 }
0x1b77   :  { %9076 = vmatprep.subr.bf16.mxu0 %v9573_v60 }
0x1b7a   :  { %9077 = vmatpush3.bf16.msra.mxu0 %v9573_v60 }
0x1b7b   :  { %9078 = vmatprep.subr.bf16.mxu0 %v9574_v1 }
0x1b7e   :  { %9079 = vmatpush3.bf16.msra.mxu0 %v9574_v1 }
0x1b7f   :  { %9080 = vmatprep.subr.bf16.mxu0 %v9575_v4 }
0x1b82   :  { %9081 = vmatpush3.bf16.msra.mxu0 %v9575_v4 }
0x1b83   :  { %9082 = vmatprep.subr.bf16.mxu0 %v9576_v54 }
0x1b86   :  { %9083 = vmatpush3.bf16.msra.mxu0 %v9576_v54 }
0x1b87   :  { %9084 = vmatprep.subr.bf16.mxu0 %v9577_v24 }
0x1b8a   :  { %9085 = vmatpush3.bf16.msra.mxu0 %v9577_v24 }
0x1b8d   :  { %9087 = vmatmul.mubr.bf16.vlgmr.msra.gmra.mrb[88].mxu0 %v11070_v15 }
0x1b8e   :  { %9114 = vmatprep.mubr.msk.bf16.mxu0 %vm447_vm0, %v5088_v5 }
0x1c60   :  { %v9088_v49 = vpop.f32.mrb[88].mxu0 }
0x1c61   :  { %v4951_v30 = vpop.f32.mrb[89].mxu0  ;;  %v4960_v32 = vadd.f32 %v9088_v49, %v7752_v59 }
0x1c62   :  { %v9089_v7 = vpop.f32.mrb[90].mxu0  ;;  %v4952_v25 = vadd.f32 %v7752_v59, %v4951_v30 }
0x1c63   :  { %v4963_v34 = vadd.f32 %v9089_v7, %v7752_v59  ;;  %v4954_v63 = vpop.f32.mrb[91].mxu0 }
0x1c64   :  { %v4955_v9 = vadd.f32 %v7752_v59, %v4954_v63 }
0x1c65   :  { %v5091_v2 = vpack.c.bf16 %v4963_v34, %v4960_v32  ;;  %v9578_v34 = vld [vmem:[%s12070_s8 + $0x60] sm:$0xff]  }
0x1c66   :  { %v5090_v36 = vpack.c.bf16 %v4955_v9, %v4952_v25 }
0x1c67   :  { %v5102_v47 = vsel %vm447_vm0, %v5091_v2, 0 }
0x1c68   :  { %9294 = vmatprep.subr.msk.bf16.mxu0 %vm447_vm0, %v5090_v36  ;;  %v5099_v10 = vsel %vm447_vm0, %v5090_v36, 0 }
0x1c69   :  { %9111 = vmatpush3.bf16.xpose.msra.mxu0 %v5099_v10 }
0x1c6a   :  { %9295 = vmatprep.subr.msk.bf16.mxu0 %vm447_vm0, %v5091_v2 }
0x1c71   :  { %9113 = vmatpush3.bf16.xpose.msra.mxu0 %v5102_v47 }
0x1c72   :  { %9118 = vmatprep.subr.bf16.mxu0 %v11311_v55 }
0x1c78   :  { %9115 = vmatmul.mubr.msk.bf16.vlgmr.msra.gmra.mrb[92].mxu0 %vm447_vm0, %v5089_v62 }
0x1c79   :  { %9119 = vmatpush3.bf16.msra.mxu0 %v11311_v55 }
0x1c7a   :  { %9120 = vmatprep.subr.bf16.mxu0 %v11309_v8 }
0x1c7d   :  { %9121 = vmatpush3.bf16.msra.mxu0 %v11309_v8 }
0x1c7e   :  { %9126 = vmatprep.subr.bf16.mxu0 %v9578_v34 }
0x1d4b   :  { %v9116_v5 = vpop.f32.mrb[92].mxu0 }
0x1d4c   :  { %v5138_v27 = vpop.f32.mrb[93].mxu0  ;;  %v5147_v58 = vadd.f32 %v11344_v50, %v9116_v5 }
0x1d4d   :  { %v5139_v17 = vadd.f32 %v11338_v45, %v5138_v27  ;;  %v9117_v23 = vpop.f32.mrb[94].mxu0 }
0x1d4e   :  { %v5141_v31 = vpop.f32.mrb[95].mxu0  ;;  %v5150_v46 = vadd.f32 %v11357_v3, %v9117_v23  ;;  %v5159_v8 = vsel %vm447_vm0, %v5147_v58, -inf }
0x1d4f   :  { %v5142_v38 = vadd.f32 %v11350_v28, %v5141_v31  ;;  %v5153_v44 = vsel %vm447_vm0, %v5139_v17, -inf }
0x1d50   :  { %5154 = vmax.xlane.f32.xlu0 %v5153_v44  ;;  %v5162_v55 = vsel %vm447_vm0, %v5150_v46, -inf  ;;  %v9579_v44 = vld [vmem:[%s12070_s8 + $0x68] sm:$0xff]  }
0x1d51   :  { %v5156_v62 = vsel %vm447_vm0, %v5142_v38, -inf }
0x1d52   :  { %5157 = vmax.xlane.f32.xlu1 %v5156_v62 }
0x1d54   :  { %5160 = vmax.xlane.f32.xlu0 %v5159_v8 }
0x1d56   :  { %5163 = vmax.xlane.f32.xlu1 %v5162_v55 }
0x1ddd   :  { %v5155_v39 = vpop.xlane.xlu0 %5154 }
0x1dde   :  { %v5165_v18 = vsub.f32 %v5139_v17, %v5155_v39 }
0x1ddf   :  { %v5158_v14 = vpop.xlane.xlu1 %5157 }
0x1de0   :  { %v5169_v42 = vmul.f32 1.442695, %v5165_v18  ;;  %v5166_v13 = vsub.f32 %v5142_v38, %v5158_v14 }
0x1de1   :  { %v5161_v37 = vpop.xlane.xlu0 %5160 }
0x1de2   :  { %9830 = vpow2.f32 %v5169_v42  ;;  %v5171_v43 = vmul.f32 1.442695, %v5166_v13  ;;  %v5167_v40 = vsub.f32 %v5147_v58, %v5161_v37  ;;  %v9581_v42 = vld [vmem:[%s12102_s29 + $0x1c8] sm:$0xff]   ;;  %v9582_v13 = vld [vmem:[%s12102_s29 + $0x1d0] sm:$0xff]   ;;  %v9583_v37 = vld [vmem:[%s12102_s29 + $0x1d8] sm:$0xff]  }
0x1de3   :  { %v5164_v57 = vpop.xlane.xlu1 %5163 }
0x1de4   :  { %9832 = vpow2.f32 %v5171_v43  ;;  %v5173_v53 = vmul.f32 1.442695, %v5167_v40  ;;  %v5168_v60 = vsub.f32 %v5150_v46, %v5164_v57  ;;  %v9580_v46 = vld [vmem:[%s12102_s29 + $0x1c0] sm:$0xff]   ;;  %v9586_v40 = vld [vmem:[%s12102_s29 + $0x1f0] sm:$0xff]   ;;  %v9587_v57 = vld [vmem:[%s12102_s29 + $0x1f8] sm:$0xff]  }
0x1de5   :  { %v9584_v43 = vld [vmem:[%s12102_s29 + $0x1e0] sm:$0xff]  }
0x1de6   :  { %9834 = vpow2.f32 %v5173_v53  ;;  %v5175_v1 = vmul.f32 1.442695, %v5168_v60  ;;  %v7842_v60 = vld [vmem:[%s12105_s23 + $0x7] ss:$0 sm:$0xff] }
0x1de8   :  { %9836 = vpow2.f32 %v5175_v1 }
0x1dec   :  { %v9831_v4 = vpop.eup %9830 }
0x1ded   :  { %v5177_v54 = vsel %vm447_vm0, %v9831_v4, 0.0 }
0x1dee   :  { %v9833_v24 = vpop.eup %9832  ;;  %5178 = vadd.xlane.f32.xlu0 %v5177_v54 }
0x1def   :  { %v5180_v49 = vsel %vm447_vm0, %v9833_v24, 0.0 }
0x1df0   :  { %v9835_v59 = vpop.eup %9834  ;;  %5181 = vadd.xlane.f32.xlu1 %v5180_v49 }
0x1df1   :  { %v5183_v30 = vsel %vm447_vm0, %v9835_v59, 0.0 }
0x1df2   :  { %v9837_v7 = vpop.eup %9836  ;;  %5184 = vadd.xlane.f32.xlu0 %v5183_v30 }
0x1df3   :  { %v5186_v32 = vsel %vm447_vm0, %v9837_v7, 0.0 }
0x1df4   :  { %5187 = vadd.xlane.f32.xlu1 %v5186_v32 }
0x1e7b   :  { %v5179_v63 = vpop.xlane.xlu0 %5178 }
0x1e7c   :  { %9838 = vrcp.f32 %v5179_v63 }
0x1e7d   :  { %v5182_v25 = vpop.xlane.xlu1 %5181 }
0x1e7e   :  { %9840 = vrcp.f32 %v5182_v25 }
0x1e7f   :  { %v5185_v9 = vpop.xlane.xlu0 %5184 }
0x1e80   :  { %9842 = vrcp.f32 %v5185_v9 }
0x1e81   :  { %v5188_v2 = vpop.xlane.xlu1 %5187 }
0x1e82   :  { %9844 = vrcp.f32 %v5188_v2 }
0x1e86   :  { %v9839_v36 = vpop.eup %9838 }
0x1e87   :  { %v5193_v47 = vmul.f32 %v9839_v36, %v9831_v4 }
0x1e88   :  { %v9841_v10 = vpop.eup %9840 }
0x1e89   :  { %v5194_v5 = vmul.f32 %v9841_v10, %v9833_v24 }
0x1e8a   :  { %v9843_v27 = vpop.eup %9842 }
0x1e8b   :  { %v5197_v17 = vpack.c.bf16 %v5194_v5, %v5193_v47  ;;  %v5195_v31 = vmul.f32 %v9843_v27, %v9835_v59 }
0x1e8c   :  { %v9845_v23 = vpop.eup %9844 }
0x1e8d   :  { %v5196_v58 = vmul.f32 %v9845_v23, %v9837_v7  ;;  %9122 = vmatprep.mubr.msk.bf16.mxu0 %vm447_vm0, %v5197_v17 }
0x1e8f   :  { %v5198_v38 = vpack.c.bf16 %v5196_v58, %v5195_v31 }
0x1e91   :  { %9123 = vmatmul.mubr.msk.bf16.vlgmr.msra.gmra.mrb[96].mxu0 %vm447_vm0, %v5198_v38 }
0x1e92   :  { %9127 = vmatpush3.bf16.msra.mxu0 %v9578_v34 }
0x1e93   :  { %9128 = vmatprep.subr.bf16.mxu0 %v9579_v44 }
0x1e96   :  { %9129 = vmatpush3.bf16.msra.mxu0 %v9579_v44 }
0x1e97   :  { %9154 = vmatprep.subr.bf16.mxu0 %v9580_v46 }
0x1f64   :  { %v9124_v62 = vpop.f32.mrb[96].mxu0 }
0x1f65   :  { %v5241_v8 = vpop.f32.mrb[97].mxu0 }
0x1f66   :  { %v9125_v55 = vpop.f32.mrb[98].mxu0 }
0x1f67   :  { %v5257_v39 = vpack.c.bf16 %v9125_v55, %v9124_v62  ;;  %v5244_v18 = vpop.f32.mrb[99].mxu0 }
0x1f68   :  { %v5256_v14 = vpack.c.bf16 %v5244_v18, %v5241_v8  ;;  %v9588_v18 = vld [vmem:[%s12070_s8 + $0x70] sm:$0xff]  }
0x1f6a   :  { %9130 = vmatprep.mubr.msk.bf16.mxu0 %vm447_vm0, %v5256_v14 }
0x1f6b   :  { %9131 = vmatmul.mubr.msk.bf16.vlgmr.msra.gmra.mrb[84].mxu0 %vm447_vm0, %v5257_v39 }
0x1f6c   :  { %9155 = vmatpush3.bf16.msra.mxu0 %v9580_v46  ;;  %9170 = vmatprep.mubr.bf16.mxu0 %v11058_v11  ;;  %v9585_v11 = vld [vmem:[%s12102_s29 + $0x1e8] sm:$0xff]  }
0x1f6d   :  { %9156 = vmatprep.subr.bf16.mxu0 %v9581_v42 }
0x1f70   :  { %9157 = vmatpush3.bf16.msra.mxu0 %v9581_v42 }
0x1f71   :  { %9158 = vmatprep.subr.bf16.mxu0 %v9582_v13 }
0x1f74   :  { %9159 = vmatpush3.bf16.msra.mxu0 %v9582_v13 }
0x1f75   :  { %9160 = vmatprep.subr.bf16.mxu0 %v9583_v37 }
0x1f78   :  { %9161 = vmatpush3.bf16.msra.mxu0 %v9583_v37 }
0x1f79   :  { %9162 = vmatprep.subr.bf16.mxu0 %v9584_v43 }
0x1f7c   :  { %9163 = vmatpush3.bf16.msra.mxu0 %v9584_v43 }
0x1f7d   :  { %9164 = vmatprep.subr.bf16.mxu0 %v9585_v11 }
0x1f80   :  { %9165 = vmatpush3.bf16.msra.mxu0 %v9585_v11 }
0x1f81   :  { %9166 = vmatprep.subr.bf16.mxu0 %v9586_v40 }
0x1f84   :  { %9167 = vmatpush3.bf16.msra.mxu0 %v9586_v40 }
0x1f85   :  { %9168 = vmatprep.subr.bf16.mxu0 %v9587_v57 }
0x1f88   :  { %9169 = vmatpush3.bf16.msra.mxu0 %v9587_v57 }
0x1f8b   :  { %9171 = vmatmul.mubr.bf16.vlgmr.msra.gmra.mrb[100].mxu0 %v11070_v15 }
0x1f8c   :  { %9198 = vmatprep.mubr.msk.bf16.mxu0 %vm447_vm0, %v5700_v29 }
0x205e   :  { %v9172_v53 = vpop.f32.mrb[100].mxu0 }
0x205f   :  { %v5563_v1 = vpop.f32.mrb[101].mxu0  ;;  %v5572_v54 = vadd.f32 %v9172_v53, %v7842_v60 }
0x2060   :  { %v9173_v4 = vpop.f32.mrb[102].mxu0  ;;  %v5564_v59 = vadd.f32 %v7842_v60, %v5563_v1 }
0x2061   :  { %v5575_v24 = vadd.f32 %v9173_v4, %v7842_v60  ;;  %v5566_v49 = vpop.f32.mrb[103].mxu0 }
0x2062   :  { %v5567_v30 = vadd.f32 %v7842_v60, %v5566_v49  ;;  %v9589_v49 = vld [vmem:[%s12070_s8 + $0x78] sm:$0xff]  }
0x2063   :  { %v5703_v7 = vpack.c.bf16 %v5575_v24, %v5572_v54 }
0x2064   :  { %v5702_v32 = vpack.c.bf16 %v5567_v30, %v5564_v59 }
0x2065   :  { %v5714_v19 = vsel %vm447_vm0, %v5703_v7, 0 }
0x2066   :  { %9296 = vmatprep.subr.msk.bf16.mxu0 %vm447_vm0, %v5702_v32  ;;  %v5711_v15 = vsel %vm447_vm0, %v5702_v32, 0 }
0x2067   :  { %9195 = vmatpush3.bf16.xpose.msra.mxu0 %v5711_v15 }
0x2068   :  { %9297 = vmatprep.subr.msk.bf16.mxu0 %vm447_vm0, %v5703_v7 }
0x206f   :  { %9197 = vmatpush3.bf16.xpose.msra.mxu0 %v5714_v19 }
0x2070   :  { %9202 = vmatprep.subr.bf16.mxu0 %v11333_v20 }
0x2076   :  { %9199 = vmatmul.mubr.msk.bf16.vlgmr.msra.gmra.mrb[104].mxu0 %vm447_vm0, %v5701_v26 }
0x2077   :  { %9203 = vmatpush3.bf16.msra.mxu0 %v11333_v20 }
0x2078   :  { %9204 = vmatprep.subr.bf16.mxu0 %v11331_v6 }
0x207b   :  { %9205 = vmatpush3.bf16.msra.mxu0 %v11331_v6 }
0x207c   :  { %9210 = vmatprep.subr.bf16.mxu0 %v9588_v18 }
0x2149   :  { %v9200_v22 = vpop.f32.mrb[104].mxu0 }
0x214a   :  { %v5750_v29 = vpop.f32.mrb[105].mxu0  ;;  %v5759_v9 = vadd.f32 %v11344_v50, %v9200_v22  ;;  %v7890_v22 = vld [vmem:[%s12071_s9 + $0x1] ss:$0 sm:$0xff] }
0x214b   :  { %v5751_v34 = vadd.f32 %v11338_v45, %v5750_v29  ;;  %v9201_v63 = vpop.f32.mrb[106].mxu0 }
0x214c   :  { %v5753_v25 = vpop.f32.mrb[107].mxu0  ;;  %v5762_v16 = vadd.f32 %v11357_v3, %v9201_v63  ;;  %v5771_v6 = vsel %vm447_vm0, %v5759_v9, -inf }
0x214d   :  { %v5754_v2 = vadd.f32 %v11350_v28, %v5753_v25  ;;  %v5765_v12 = vsel %vm447_vm0, %v5751_v34, -inf }
0x214e   :  { %5766 = vmax.xlane.f32.xlu0 %v5765_v12  ;;  %v5774_v20 = vsel %vm447_vm0, %v5762_v16, -inf }
0x214f   :  { %v5768_v26 = vsel %vm447_vm0, %v5754_v2, -inf }
0x2150   :  { %5769 = vmax.xlane.f32.xlu1 %v5768_v26 }
0x2152   :  { %5772 = vmax.xlane.f32.xlu0 %v5771_v6 }
0x2154   :  { %5775 = vmax.xlane.f32.xlu1 %v5774_v20 }
0x21db   :  { %v5767_v45 = vpop.xlane.xlu0 %5766 }
0x21dc   :  { %v5777_v36 = vsub.f32 %v5751_v34, %v5767_v45 }
0x21dd   :  { %v5770_v10 = vpop.xlane.xlu1 %5769 }
0x21de   :  { %v5781_v50 = vmul.f32 1.442695, %v5777_v36  ;;  %v5778_v47 = vsub.f32 %v5754_v2, %v5770_v10  ;;  %v9590_v36 = vld [vmem:[%s12074_s12 + $0x100] ss:$16 sps:$4 sm:$0xff]   ;;  %v9592_v10 = vld [vmem:[%s12074_s12 + $0x104] ss:$16 sps:$4 sm:$0xff]  }
0x21df   :  { %v5773_v28 = vpop.xlane.xlu0 %5772  ;;  %6248 = vmatprep.subr.bf16.mxu1 %v9592_v10 }
0x21e0   :  { %9846 = vpow2.f32 %v5781_v50  ;;  %v5783_v5 = vmul.f32 1.442695, %v5778_v47  ;;  %v5779_v27 = vsub.f32 %v5759_v9, %v5773_v28  ;;  %6249 = vmatpush1.bf16.msra.mxu1 %v9590_v36  ;;  %v9596_v50 = vld [vmem:[%s12074_s12 + $0x120] ss:$16 sps:$4 sm:$0xff]   ;;  %v9599_v47 = vld [vmem:[%s12074_s12 + $0x128] ss:$16 sps:$4 sm:$0xff]  }
0x21e1   :  { %v5776_v17 = vpop.xlane.xlu1 %5775 }
0x21e2   :  { %9848 = vpow2.f32 %v5783_v5  ;;  %v5785_v3 = vmul.f32 1.442695, %v5779_v27  ;;  %v5780_v23 = vsub.f32 %v5762_v16, %v5776_v17 }
0x21e4   :  { %9850 = vpow2.f32 %v5785_v3  ;;  %v5787_v31 = vmul.f32 1.442695, %v5780_v23 }
0x21e6   :  { %9852 = vpow2.f32 %v5787_v31 }
0x21ea   :  { %v9847_v58 = vpop.eup %9846 }
0x21eb   :  { %v5789_v38 = vsel %vm447_vm0, %v9847_v58, 0.0 }
0x21ec   :  { %v9849_v44 = vpop.eup %9848  ;;  %5790 = vadd.xlane.f32.xlu0 %v5789_v38 }
0x21ed   :  { %v5792_v46 = vsel %vm447_vm0, %v9849_v44, 0.0 }
0x21ee   :  { %v9851_v62 = vpop.eup %9850  ;;  %5793 = vadd.xlane.f32.xlu1 %v5792_v46 }
0x21ef   :  { %v5795_v8 = vsel %vm447_vm0, %v9851_v62, 0.0 }
0x21f0   :  { %v9853_v55 = vpop.eup %9852  ;;  %5796 = vadd.xlane.f32.xlu0 %v5795_v8 }
0x21f1   :  { %v5798_v39 = vsel %vm447_vm0, %v9853_v55, 0.0 }
0x21f2   :  { %5799 = vadd.xlane.f32.xlu1 %v5798_v39 }
0x2279   :  { %v5791_v14 = vpop.xlane.xlu0 %5790 }
0x227a   :  { %9854 = vrcp.f32 %v5791_v14  ;;  %v9604_v14 = vld [vmem:[%s12074_s12 + $0x144] ss:$16 sps:$4 sm:$0xff]  }
0x227b   :  { %v5794_v42 = vpop.xlane.xlu1 %5793 }
0x227c   :  { %9856 = vrcp.f32 %v5794_v42  ;;  %v9607_v42 = vld [vmem:[%s12074_s12 + $0x14c] ss:$16 sps:$4 sm:$0xff]  }
0x227d   :  { %v5797_v13 = vpop.xlane.xlu0 %5796 }
0x227e   :  { %9858 = vrcp.f32 %v5797_v13  ;;  %v9602_v13 = vld [vmem:[%s12074_s12 + $0x140] ss:$16 sps:$4 sm:$0xff]  }
0x227f   :  { %v5800_v37 = vpop.xlane.xlu1 %5799 }
0x2280   :  { %9860 = vrcp.f32 %v5800_v37  ;;  %v9605_v37 = vld [vmem:[%s12074_s12 + $0x148] ss:$16 sps:$4 sm:$0xff]  }
0x2284   :  { %v9855_v43 = vpop.eup %9854 }
0x2285   :  { %v5805_v40 = vmul.f32 %v9855_v43, %v9847_v58  ;;  %v9610_v43 = vld [vmem:[%s12074_s12 + $0x164] ss:$16 sps:$4 sm:$0xff]  }
0x2286   :  { %v9857_v11 = vpop.eup %9856 }
0x2287   :  { %v5806_v57 = vmul.f32 %v9857_v11, %v9849_v44  ;;  %v9613_v11 = vld [vmem:[%s12074_s12 + $0x16c] ss:$16 sps:$4 sm:$0xff]  }
0x2288   :  { %v9859_v53 = vpop.eup %9858 }
0x2289   :  { %v5809_v60 = vpack.c.bf16 %v5806_v57, %v5805_v40  ;;  %v5807_v4 = vmul.f32 %v9859_v53, %v9851_v62  ;;  %v9608_v40 = vld [vmem:[%s12074_s12 + $0x160] ss:$16 sps:$4 sm:$0xff]   ;;  %v9611_v57 = vld [vmem:[%s12074_s12 + $0x168] ss:$16 sps:$4 sm:$0xff]   ;;  %v9616_v53 = vld [vmem:[%s12074_s12 + $0x184] ss:$16 sps:$4 sm:$0xff]  }
0x228a   :  { %v9861_v1 = vpop.eup %9860 }
0x228b   :  { %v5808_v54 = vmul.f32 %v9861_v1, %v9853_v55  ;;  %9206 = vmatprep.mubr.msk.bf16.mxu0 %vm447_vm0, %v5809_v60  ;;  %v9619_v60 = vld [vmem:[%s12074_s12 + $0x18c] ss:$16 sps:$4 sm:$0xff]   ;;  %v9614_v1 = vld [vmem:[%s12074_s12 + $0x180] ss:$16 sps:$4 sm:$0xff]  }
0x228d   :  { %v5810_v24 = vpack.c.bf16 %v5808_v54, %v5807_v4  ;;  %v9617_v4 = vld [vmem:[%s12074_s12 + $0x188] ss:$16 sps:$4 sm:$0xff]   ;;  %v9620_v54 = vld [vmem:[%s12074_s12 + $0x1a0] ss:$16 sps:$4 sm:$0xff]  }
0x228f   :  { %9207 = vmatmul.mubr.msk.bf16.vlgmr.msra.gmra.mrb[108].mxu0 %vm447_vm0, %v5810_v24  ;;  %v9622_v24 = vld [vmem:[%s12074_s12 + $0x1a4] ss:$16 sps:$4 sm:$0xff]  }
0x2290   :  { %9211 = vmatpush3.bf16.msra.mxu0 %v9588_v18 }
0x2291   :  { %9212 = vmatprep.subr.bf16.mxu0 %v9589_v49 }
0x2294   :  { %9213 = vmatpush3.bf16.msra.mxu0 %v9589_v49  ;;  %v9623_v49 = vld [vmem:[%s12074_s12 + $0x1a8] ss:$16 sps:$4 sm:$0xff]  }
0x2362   :  { %v9208_v59 = vpop.f32.mrb[108].mxu0 }
0x2363   :  { %v5853_v30 = vpop.f32.mrb[109].mxu0 }
0x2364   :  { %v9209_v7 = vpop.f32.mrb[110].mxu0 }
0x2365   :  { %v5869_v32 = vpack.c.bf16 %v9209_v7, %v9208_v59  ;;  %v5856_v15 = vpop.f32.mrb[111].mxu0  ;;  %v9625_v59 = vld [vmem:[%s12074_s12 + $0x1ac] ss:$16 sps:$4 sm:$0xff]  }
0x2366   :  { %v5868_v19 = vpack.c.bf16 %v5856_v15, %v5853_v30  ;;  %v9628_v30 = vld [vmem:[%s12074_s12 + $0x1c4] ss:$16 sps:$4 sm:$0xff]   ;;  %v9631_v7 = vld [vmem:[%s12074_s12 + $0x1cc] ss:$16 sps:$4 sm:$0xff]   ;;  %v9629_v15 = vld [vmem:[%s12074_s12 + $0x1c8] ss:$16 sps:$4 sm:$0xff]  }
0x2368   :  { %9214 = vmatprep.mubr.msk.bf16.mxu0 %vm447_vm0, %v5868_v19  ;;  %v9634_v19 = vld [vmem:[%s12074_s12 + $0x1e4] ss:$16 sps:$4 sm:$0xff]  }
0x2369   :  { %9215 = vmatmul.mubr.msk.bf16.vlgmr.msra.gmra.mrb[84].mxu0 %vm447_vm0, %v5869_v32  ;;  %v9626_v32 = vld [vmem:[%s12074_s12 + $0x1c0] ss:$16 sps:$4 sm:$0xff]  }
0x236a   :  { %6333 = vmatprep.mubr.bf16.mxu0 %v9942_v48 }
0x243c   :  { %v9216_v29 = vpop.f32.mrb[84].mxu0 }
0x243d   :  { %v5927_v34 = vpop.f32.mrb[85].mxu0  ;;  %v5956_v2 = vadd.f32 %v9216_v29, %v7890_v22  ;;  %v9632_v29 = vld [vmem:[%s12074_s12 + $0x1e0] ss:$16 sps:$4 sm:$0xff]  }
0x243e   :  { %v5954_v63 = vadd.f32 %v7890_v22, %v5927_v34  ;;  %v9217_v25 = vpop.f32.mrb[86].mxu0  ;;  %v9635_v34 = vld [vmem:[%s12074_s12 + $0x1e8] ss:$16 sps:$4 sm:$0xff]  }
0x243f   :  { %v5930_v9 = vpop.f32.mrb[87].mxu0  ;;  %v5957_v26 = vadd.f32 %v9217_v25, %v7890_v22  ;;  %v5960_v20 = vadd.f32 %v5956_v2, %v11064_v35  ;;  %v9598_v35 = vld [vmem:[%s12074_s12 + $0x124] ss:$16 sps:$4 sm:$0xff]  }
0x2440   :  { %v5955_v12 = vadd.f32 %v7890_v22, %v5930_v9  ;;  %v5958_v16 = vadd.f32 %v5954_v63, %v11052_v33  ;;  %v9593_v33 = vld [vmem:[%s12074_s12 + $0x108] ss:$16 sps:$4 sm:$0xff]   ;;  %6250 = vmatprep.subr.bf16.mxu1 %v9598_v35  ;;  %v9637_v22 = vld [vmem:[%s12074_s12 + $0x1ec] ss:$16 sps:$4 sm:$0xff]  }
0x2441   :  { %v5961_v45 = vadd.f32 %v5957_v26, %v11066_v41  ;;  %v9601_v41 = vld [vmem:[%s12074_s12 + $0x12c] ss:$16 sps:$4 sm:$0xff]   ;;  %6251 = vmatpush1.bf16.msra.mxu1 %v9596_v50 }
0x2442   :  { %5966 = vadd.xlane.f32.xlu0 %v5958_v16  ;;  %v5959_v6 = vadd.f32 %v5955_v12, %v11054_v0  ;;  %v9595_v0 = vld [vmem:[%s12074_s12 + $0x10c] ss:$16 sps:$4 sm:$0xff]   ;;  %6252 = vmatprep.subr.bf16.mxu1 %v9604_v14  ;;  %v9640_v14 = vld [vmem:[%s12076_s14 + $0x100] sm:$0xff]  }
0x2443   :  { %6301 = vmatprep.subr.bf16.mxu0 %v9595_v0  ;;  %v7893_v0 = vld [vmem:[%s12072_s10 + $0x1] ss:$0 sm:$0xff] }
0x2444   :  { %5968 = vadd.xlane.f32.xlu1 %v5959_v6  ;;  %6302 = vmatpush1.bf16.msra.mxu0 %v9593_v33 }
0x2445   :  { %6303 = vmatprep.subr.bf16.mxu0 %v9601_v41  ;;  %6253 = vmatpush1.bf16.msra.mxu1 %v9602_v13  ;;  %v9643_v13 = vld [vmem:[%s12076_s14 + $0x1c8] sm:$0xff]  }
0x2446   :  { %5970 = vadd.xlane.f32.xlu0 %v5960_v20  ;;  %6254 = vmatprep.subr.bf16.mxu1 %v9610_v43  ;;  %v9645_v43 = vld [vmem:[%s12076_s14 + $0x188] sm:$0xff]  }
0x2448   :  { %5972 = vadd.xlane.f32.xlu1 %v5961_v45  ;;  %6304 = vmatpush1.bf16.msra.mxu0 %v9599_v47 }
0x2449   :  { %6305 = vmatprep.subr.bf16.mxu0 %v9607_v42  ;;  %6255 = vmatpush1.bf16.msra.mxu1 %v9608_v40  ;;  %v9642_v42 = vld [vmem:[%s12076_s14 + $0x148] sm:$0xff]   ;;  %v9647_v40 = vld [vmem:[%s12076_s14 + $0x1d0] sm:$0xff]  }
0x244a   :  { %6256 = vmatprep.subr.bf16.mxu1 %v9616_v53  ;;  %v9649_v53 = vld [vmem:[%s12076_s14 + $0x190] sm:$0xff]  }
0x244c   :  { %6306 = vmatpush1.bf16.msra.mxu0 %v9605_v37  ;;  %v9644_v37 = vld [vmem:[%s12076_s14 + $0x108] sm:$0xff]  }
0x244d   :  { %6307 = vmatprep.subr.bf16.mxu0 %v9613_v11  ;;  %6257 = vmatpush1.bf16.msra.mxu1 %v9614_v1  ;;  %v9646_v11 = vld [vmem:[%s12076_s14 + $0x150] sm:$0xff]   ;;  %v9651_v1 = vld [vmem:[%s12076_s14 + $0x1d8] sm:$0xff]  }
0x244e   :  { %6258 = vmatprep.subr.bf16.mxu1 %v9622_v24  ;;  %v9654_v24 = vld [vmem:[%s12076_s14 + $0x160] sm:$0xff]  }
0x2450   :  { %6308 = vmatpush1.bf16.msra.mxu0 %v9611_v57  ;;  %v9648_v57 = vld [vmem:[%s12076_s14 + $0x110] sm:$0xff]  }
0x2451   :  { %6309 = vmatprep.subr.bf16.mxu0 %v9619_v60  ;;  %6259 = vmatpush1.bf16.msra.mxu1 %v9620_v54  ;;  %v9650_v60 = vld [vmem:[%s12076_s14 + $0x158] sm:$0xff]  }
0x2452   :  { %6260 = vmatprep.subr.bf16.mxu1 %v9628_v30  ;;  %v9653_v54 = vld [vmem:[%s12076_s14 + $0x198] sm:$0xff]   ;;  %v9657_v30 = vld [vmem:[%s12076_s14 + $0x1a0] sm:$0xff]  }
0x2454   :  { %6310 = vmatpush1.bf16.msra.mxu0 %v9617_v4  ;;  %v9652_v4 = vld [vmem:[%s12076_s14 + $0x118] sm:$0xff]  }
0x2455   :  { %6311 = vmatprep.subr.bf16.mxu0 %v9625_v59  ;;  %6261 = vmatpush1.bf16.msra.mxu1 %v9626_v32  ;;  %v9656_v59 = vld [vmem:[%s12076_s14 + $0x120] sm:$0xff]   ;;  %v9659_v32 = vld [vmem:[%s12076_s14 + $0x1e8] sm:$0xff]  }
0x2456   :  { %6262 = vmatprep.subr.bf16.mxu1 %v9634_v19  ;;  %v9661_v19 = vld [vmem:[%s12076_s14 + $0x1a8] sm:$0xff]  }
0x2458   :  { %6312 = vmatpush1.bf16.msra.mxu0 %v9623_v49  ;;  %v9655_v49 = vld [vmem:[%s12076_s14 + $0x1e0] sm:$0xff]  }
0x2459   :  { %6313 = vmatprep.subr.bf16.mxu0 %v9631_v7  ;;  %6263 = vmatpush1.bf16.msra.mxu1 %v9632_v29  ;;  %v9658_v7 = vld [vmem:[%s12076_s14 + $0x168] sm:$0xff]   ;;  %v9663_v29 = vld [vmem:[%s12076_s14 + $0x1f0] sm:$0xff]  }
0x245c   :  { %6314 = vmatpush1.bf16.msra.mxu0 %v9629_v15  ;;  %v9660_v15 = vld [vmem:[%s12076_s14 + $0x128] sm:$0xff]  }
0x245d   :  { %6315 = vmatprep.subr.bf16.mxu0 %v9637_v22  ;;  %v9662_v22 = vld [vmem:[%s12076_s14 + $0x170] sm:$0xff]  }
0x2460   :  { %6316 = vmatpush1.bf16.msra.mxu0 %v9635_v34  ;;  %v9664_v34 = vld [vmem:[%s12076_s14 + $0x130] sm:$0xff]  }
0x24cf   :  { %v5967_v28 = vpop.xlane.xlu0 %5966 }
0x24d0   :  { %v5974_v5 = vmul.f32 0.0078125, %v5967_v28 }
0x24d1   :  { %v5969_v27 = vpop.xlane.xlu1 %5968 }
0x24d2   :  { %v11628_v17 = vsub.f32 %v5958_v16, %v5974_v5  ;;  %v5975_v3 = vmul.f32 0.0078125, %v5969_v27  ;;  %v7894_v5 = vld [vmem:[%s12073_s11 + $0x1] ss:$0 sm:$0xff] }
0x24d3   :  { %v5971_v23 = vpop.xlane.xlu0 %5970 }
0x24d4   :  { %v11630_v31 = vsub.f32 %v5959_v6, %v5975_v3  ;;  %v5976_v58 = vmul.f32 0.0078125, %v5971_v23  ;;  %v5982_v38 = vmul.f32 %v11628_v17, %v11628_v17 }
0x24d5   :  { %v5973_v44 = vpop.xlane.xlu1 %5972 }
0x24d6   :  { %v11634_v46 = vsub.f32 %v5960_v20, %v5976_v58  ;;  %v5977_v62 = vmul.f32 0.0078125, %v5973_v44  ;;  %5986 = vadd.xlane.f32.xlu0 %v5982_v38  ;;  %v5983_v8 = vmul.f32 %v11630_v31, %v11630_v31 }
0x24d8   :  { %v11638_v55 = vsub.f32 %v5961_v45, %v5977_v62  ;;  %5988 = vadd.xlane.f32.xlu1 %v5983_v8  ;;  %v5984_v39 = vmul.f32 %v11634_v46, %v11634_v46 }
0x24da   :  { %5990 = vadd.xlane.f32.xlu0 %v5984_v39  ;;  %v5985_v18 = vmul.f32 %v11638_v55, %v11638_v55 }
0x24dc   :  { %5992 = vadd.xlane.f32.xlu1 %v5985_v18 }
0x2563   :  { %v5987_v63 = vpop.xlane.xlu0 %5986 }
0x2564   :  { %v5994_v25 = vmul.f32 0.0078125, %v5987_v63  ;;  %v9665_v63 = vld [vmem:[%s12076_s14 + $0x1b0] sm:$0xff]  }
0x2565   :  { %v5989_v9 = vpop.xlane.xlu1 %5988 }
0x2566   :  { %v5998_v2 = vadd.f32 1e-12, %v5994_v25  ;;  %v5995_v12 = vmul.f32 0.0078125, %v5989_v9  ;;  %v9666_v25 = vld [vmem:[%s12076_s14 + $0x178] sm:$0xff]  }
0x2567   :  { %v5991_v16 = vpop.xlane.xlu0 %5990  ;;  %v9667_v9 = vld [vmem:[%s12076_s14 + $0x1f8] sm:$0xff]  }
0x2568   :  { %9862 = vrsqrt.f32 %v5998_v2  ;;  %v5999_v26 = vadd.f32 1e-12, %v5995_v12  ;;  %v5996_v6 = vmul.f32 0.0078125, %v5991_v16  ;;  %v9668_v2 = vld [vmem:[%s12076_s14 + $0x138] sm:$0xff]   ;;  %v7927_v16 = vld [vmem:[%s12075_s13 + $0x4] sm:$0xf] }
0x2569   :  { %v5993_v20 = vpop.xlane.xlu1 %5992  ;;  %v9669_v12 = vld [vmem:[%s12076_s14 + $0x1b8] sm:$0xff]  }
0x256a   :  { %9864 = vrsqrt.f32 %v5999_v26  ;;  %v6000_v45 = vadd.f32 1e-12, %v5996_v6  ;;  %v5997_v36 = vmul.f32 0.0078125, %v5993_v20  ;;  %v11835_v26 = vrot.slane %v7927_v16, %v2637_v21 }
0x256b   :  { %v11839_v6 = vrot.slane %v7927_v16, %v2645_v52  ;;  %v11849_v21 = vrot.slane %v7927_v16, %v2649_v61 }
0x256c   :  { %9866 = vrsqrt.f32 %v6000_v45  ;;  %v6001_v10 = vadd.f32 1e-12, %v5997_v36  ;;  %v11843_v36 = vrot.slane %v7927_v16, %v2641_v56 }
0x256e   :  { %9868 = vrsqrt.f32 %v6001_v10 }
0x2572   :  { %v9863_v33 = vpop.eup %9862 }
0x2573   :  { %v6006_v35 = vmul.f32 %v9863_v33, %v11628_v17 }
0x2574   :  { %v9865_v41 = vpop.eup %9864 }
0x2575   :  { %v6007_v50 = vmul.f32 %v9865_v41, %v11630_v31  ;;  %v6016_v47 = vmul.f32 %v7893_v0, %v6006_v35 }
0x2576   :  { %v9867_v28 = vpop.eup %9866 }
0x2577   :  { %v6017_v27 = vmul.f32 %v7893_v0, %v6007_v50  ;;  %v11724_v23 = vadd.f32 %v7894_v5, %v6016_v47  ;;  %v6008_v38 = vmul.f32 %v9867_v28, %v11634_v46  ;;  %v9638_v46 = vld [vmem:[%s12076_s14 + $0x140] sm:$0xff]  }
0x2578   :  { %v9869_v3 = vpop.eup %9868  ;;  %8472 = vmatprep.subr.bf16.mxu1 %v9638_v46 }
0x2579   :  { %v6027_v58 = vadd.f32 %v7894_v5, %v6017_v27  ;;  %v6009_v44 = vmul.f32 %v9869_v3, %v11638_v55  ;;  %v6018_v31 = vmul.f32 %v7893_v0, %v6008_v38  ;;  %v9639_v55 = vld [vmem:[%s12076_s14 + $0x1c0] sm:$0xff]  }
0x257a   :  { %8500 = vmatprep.subr.bf16.mxu0 %v9639_v55 }
0x257b   :  { %v6030_v17 = vpack.c.bf16 %v6027_v58, %v11724_v23  ;;  %v6019_v62 = vmul.f32 %v7893_v0, %v6009_v44  ;;  %v11731_v39 = vadd.f32 %v7894_v5, %v6018_v31 }
0x257d   :  { %6281 = vmatmul.mubr.bf16.vlgmr.msra.gmra.mrb[88].mxu1 %v6030_v17  ;;  %6334 = vmatmul.mubr.bf16.vlgmr.msra.gmra.mrb[112].mxu0 %v6030_v17  ;;  %v6029_v8 = vadd.f32 %v7894_v5, %v6019_v62 }
0x257e   :  { %6290 = vmatprep.mubr.bf16.mxu1 %v9942_v48  ;;  %6343 = vmatprep.mubr.bf16.mxu0 %v9942_v48  ;;  %v9641_v48 = vld [vmem:[%s12076_s14 + $0x180] sm:$0xff]  }
0x257f   :  { %v6031_v18 = vpack.c.bf16 %v6029_v8, %v11731_v39  ;;  %8473 = vmatpush3.bf16.msra.mxu1 %v9640_v14  ;;  %8501 = vmatpush3.bf16.msra.mxu0 %v9641_v48 }
0x2580   :  { %8474 = vmatprep.subr.bf16.mxu1 %v9642_v42  ;;  %8502 = vmatprep.subr.bf16.mxu0 %v9643_v13 }
0x2583   :  { %8475 = vmatpush3.bf16.msra.mxu1 %v9644_v37  ;;  %8503 = vmatpush3.bf16.msra.mxu0 %v9645_v43 }
0x2584   :  { %8476 = vmatprep.subr.bf16.mxu1 %v9646_v11  ;;  %8504 = vmatprep.subr.bf16.mxu0 %v9647_v40 }
0x2585   :  { %6291 = vmatmul.mubr.bf16.gmra.mrb[92].mxu1 %v6031_v18  ;;  %6344 = vmatmul.mubr.bf16.gmra.mrb[116].mxu0 %v6031_v18 }
0x2587   :  { %8477 = vmatpush3.bf16.msra.mxu1 %v9648_v57  ;;  %8505 = vmatpush3.bf16.msra.mxu0 %v9649_v53 }
0x2588   :  { %8478 = vmatprep.subr.bf16.mxu1 %v9650_v60  ;;  %8506 = vmatprep.subr.bf16.mxu0 %v9651_v1 }
0x258b   :  { %8479 = vmatpush3.bf16.msra.mxu1 %v9652_v4  ;;  %8507 = vmatpush3.bf16.msra.mxu0 %v9653_v54 }
0x258c   :  { %8480 = vmatprep.subr.bf16.mxu1 %v9654_v24  ;;  %8508 = vmatprep.subr.bf16.mxu0 %v9655_v49 }
0x258f   :  { %8481 = vmatpush3.bf16.msra.mxu1 %v9656_v59  ;;  %8509 = vmatpush3.bf16.msra.mxu0 %v9657_v30 }
0x2590   :  { %8482 = vmatprep.subr.bf16.mxu1 %v9658_v7  ;;  %8510 = vmatprep.subr.bf16.mxu0 %v9659_v32 }
0x2593   :  { %8483 = vmatpush3.bf16.msra.mxu1 %v9660_v15  ;;  %8511 = vmatpush3.bf16.msra.mxu0 %v9661_v19 }
0x2594   :  { %8484 = vmatprep.subr.bf16.mxu1 %v9662_v22  ;;  %8512 = vmatprep.subr.bf16.mxu0 %v9663_v29 }
0x2597   :  { %8485 = vmatpush3.bf16.msra.mxu1 %v9664_v34  ;;  %8513 = vmatpush3.bf16.msra.mxu0 %v9665_v63 }
0x2598   :  { %8486 = vmatprep.subr.bf16.mxu1 %v9666_v25  ;;  %8514 = vmatprep.subr.bf16.mxu0 %v9667_v9 }
0x259b   :  { %8487 = vmatpush3.bf16.msra.mxu1 %v9668_v2  ;;  %8515 = vmatpush3.bf16.msra.mxu0 %v9669_v12 }
0x2650   :  { %v6282_v20 = vpop.f32.mrb[88].mxu1  ;;  %v6335_v45 = vpop.f32.mrb[112].mxu0 }
0x2651   :  { %v6283_v10 = vadd.f32 %v6282_v20, %v11835_v26  ;;  %v6336_v33 = vadd.f32 %v6335_v45, %v11839_v6  ;;  %v6284_v0 = vpop.f32.mrb[89].mxu1  ;;  %v6337_v35 = vpop.f32.mrb[113].mxu0 }
0x2652   :  { %v6286_v41 = vpop.f32.mrb[90].mxu1  ;;  %v6339_v50 = vpop.f32.mrb[114].mxu0  ;;  %v11852_v28 = vadd.f32 %v6284_v0, %v11843_v36  ;;  %v11862_v61 = vadd.f32 %v6337_v35, %v11849_v21 }
0x2653   :  { %v6370_v52 = vmul.f32 0.044715, %v6283_v10  ;;  %v6372_v47 = vmul.f32 0.044715, %v6336_v33  ;;  %v6287_v56 = vadd.f32 %v6286_v41, %v11835_v26  ;;  %v11856_v5 = vadd.f32 %v6339_v50, %v11839_v6  ;;  %v6288_v27 = vpop.f32.mrb[91].mxu1  ;;  %v6341_v3 = vpop.f32.mrb[115].mxu0 }
0x2654   :  { %v11859_v51 = vadd.f32 %v6288_v27, %v11843_v36  ;;  %v11865_v17 = vadd.f32 %v6341_v3, %v11849_v21  ;;  %v11867_v62 = vmul.f32 0.5, %v6283_v10  ;;  %v6371_v46 = vmul.f32 0.044715, %v11852_v28 }
0x2655   :  { %v6386_v58 = vmul.f32 %v6370_v52, %v6283_v10  ;;  %v6388_v38 = vmul.f32 %v6372_v47, %v6336_v33  ;;  %v6374_v44 = vmul.f32 0.044715, %v6287_v56  ;;  %v6376_v18 = vmul.f32 0.044715, %v11856_v5 }
0x2656   :  { %v6375_v14 = vmul.f32 0.044715, %v11859_v51  ;;  %v11872_v37 = vmul.f32 0.5, %v6336_v33  ;;  %v6373_v53 = vmul.f32 0.044715, %v11862_v61  ;;  %v6387_v15 = vmul.f32 %v6371_v46, %v11852_v28 }
0x2657   :  { %v6402_v31 = vmul.f32 %v6386_v58, %v6283_v10  ;;  %v6404_v8 = vmul.f32 %v6388_v38, %v6336_v33  ;;  %v6390_v55 = vmul.f32 %v6374_v44, %v6287_v56  ;;  %v6392_v11 = vmul.f32 %v6376_v18, %v11856_v5 }
0x2658   :  { %v6292_v48 = vpop.f32.mrb[92].mxu1  ;;  %v6345_v42 = vpop.f32.mrb[116].mxu0  ;;  %v6377_v1 = vmul.f32 0.044715, %v11865_v17  ;;  %v6391_v22 = vmul.f32 %v6375_v14, %v11859_v51  ;;  %v6389_v9 = vmul.f32 %v6373_v53, %v11862_v61  ;;  %v6358_v47 = vmul.f32 0.5, %v6287_v56 }
0x2659   :  { %v6418_v13 = vadd.f32 %v6402_v31, %v6283_v10  ;;  %v6420_v43 = vadd.f32 %v6404_v8, %v6336_v33  ;;  %v6294_v40 = vpop.f32.mrb[93].mxu1  ;;  %v6347_v57 = vpop.f32.mrb[117].mxu0  ;;  %v6406_v60 = vmul.f32 %v6390_v55, %v6287_v56  ;;  %v11878_v4 = vadd.f32 %v6292_v48, %v11835_v26 }
0x265a   :  { %v6296_v54 = vpop.f32.mrb[94].mxu1  ;;  %v6349_v24 = vpop.f32.mrb[118].mxu0  ;;  %v6408_v30 = vmul.f32 %v6392_v11, %v11856_v5  ;;  %v11884_v29 = vadd.f32 %v6345_v42, %v11839_v6  ;;  %v11889_v25 = vadd.f32 %v6294_v40, %v11843_v36  ;;  %v6393_v12 = vmul.f32 %v6377_v1, %v11865_v17 }
0x265b   :  { %v6434_v49 = vmul.f32 0.7978846, %v6418_v13  ;;  %v6436_v59 = vmul.f32 0.7978846, %v6420_v43  ;;  %v6298_v7 = vpop.f32.mrb[95].mxu1  ;;  %v6351_v32 = vpop.f32.mrb[119].mxu0  ;;  %v6422_v19 = vadd.f32 %v6406_v60, %v6287_v56  ;;  %v11895_v45 = vadd.f32 %v6347_v57, %v11849_v21 }
0x265c   :  { %v6424_v34 = vadd.f32 %v6408_v30, %v11856_v5  ;;  %v6378_v63 = vmul.f32 0.044715, %v11878_v4  ;;  %v6379_v20 = vmul.f32 0.044715, %v11889_v25  ;;  %v11898_v10 = vadd.f32 %v6296_v54, %v11835_v26 }
0x265d   :  { %9870 = vtanh.f32 %v6434_v49  ;;  %v6438_v2 = vmul.f32 0.7978846, %v6422_v19  ;;  %v6403_v33 = vmul.f32 %v6387_v15, %v11852_v28  ;;  %v6407_v0 = vmul.f32 %v6391_v22, %v11859_v51 }
0x265e   :  { %9872 = vtanh.f32 %v6436_v59  ;;  %v6440_v16 = vmul.f32 0.7978846, %v6424_v34  ;;  %v11903_v35 = vadd.f32 %v6349_v24, %v11839_v6  ;;  %v6394_v41 = vmul.f32 %v6378_v63, %v11878_v4 }
0x265f   :  { %9874 = vtanh.f32 %v6438_v2  ;;  %v6380_v50 = vmul.f32 0.044715, %v11884_v29  ;;  %v6381_v52 = vmul.f32 0.044715, %v11895_v45  ;;  %v6395_v27 = vmul.f32 %v6379_v20, %v11889_v25 }
0x2660   :  { %9876 = vtanh.f32 %v6440_v16  ;;  %v11910_v26 = vadd.f32 %v6298_v7, %v11843_v36  ;;  %v11913_v3 = vadd.f32 %v6351_v32, %v11849_v21  ;;  %v6405_v58 = vmul.f32 %v6389_v9, %v11862_v61 }
0x2661   :  { %v6409_v6 = vmul.f32 %v6393_v12, %v11865_v17  ;;  %v6382_v38 = vmul.f32 0.044715, %v11898_v10  ;;  %v6384_v44 = vmul.f32 0.044715, %v11903_v35  ;;  %v6397_v31 = vmul.f32 %v6381_v52, %v11895_v45 }
0x2662   :  { %v6383_v56 = vmul.f32 0.044715, %v11910_v26  ;;  %v6385_v8 = vmul.f32 0.044715, %v11913_v3  ;;  %v6419_v36 = vadd.f32 %v6403_v33, %v11852_v28  ;;  %v6360_v18 = vmul.f32 0.5, %v11856_v5 }
0x2663   :  { %v6410_v21 = vmul.f32 %v6394_v41, %v11878_v4  ;;  %v6396_v46 = vmul.f32 %v6380_v50, %v11884_v29  ;;  %v6423_v55 = vadd.f32 %v6407_v0, %v11859_v51  ;;  %v6411_v14 = vmul.f32 %v6395_v27, %v11889_v25 }
0x2664   :  { %v6399_v48 = vmul.f32 %v6383_v56, %v11910_v26  ;;  %v6401_v42 = vmul.f32 %v6385_v8, %v11913_v3  ;;  %v6435_v13 = vmul.f32 0.7978846, %v6419_v36  ;;  %v6398_v11 = vmul.f32 %v6382_v38, %v11898_v10 }
0x2665   :  { %v6439_v40 = vmul.f32 0.7978846, %v6423_v55  ;;  %v6421_v57 = vadd.f32 %v6405_v58, %v11862_v61  ;;  %v6425_v5 = vadd.f32 %v6409_v6, %v11865_v17  ;;  %v6413_v60 = vmul.f32 %v6397_v31, %v11895_v45 }
0x2666   :  { %v6400_v1 = vmul.f32 %v6384_v44, %v11903_v35  ;;  %v6415_v54 = vmul.f32 %v6399_v48, %v11910_v26  ;;  %9878 = vtanh.f32 %v6435_v13  ;;  %v6412_v7 = vmul.f32 %v6396_v46, %v11884_v29 }
0x2667   :  { %v9871_v43 = vpop.eup %9870  ;;  %9880 = vtanh.f32 %v6439_v40  ;;  %v6437_v24 = vmul.f32 0.7978846, %v6421_v57  ;;  %v6441_v49 = vmul.f32 0.7978846, %v6425_v5  ;;  %v6417_v32 = vmul.f32 %v6401_v42, %v11913_v3 }
0x2668   :  { %v9873_v53 = vpop.eup %9872  ;;  %v6466_v59 = vadd.f32 1.0, %v9871_v43  ;;  %v6427_v19 = vadd.f32 %v6411_v14, %v11889_v25  ;;  %v6414_v34 = vmul.f32 %v6398_v11, %v11898_v10  ;;  %v6431_v9 = vadd.f32 %v6415_v54, %v11910_v26 }
0x2669   :  { %v9875_v30 = vpop.eup %9874  ;;  %v6468_v15 = vadd.f32 1.0, %v9873_v53  ;;  %9882 = vtanh.f32 %v6437_v24  ;;  %v6416_v2 = vmul.f32 %v6400_v1, %v11903_v35  ;;  %v6429_v41 = vadd.f32 %v6413_v60, %v11895_v45 }
0x266a   :  { %v9877_v22 = vpop.eup %9876  ;;  %v6470_v63 = vadd.f32 1.0, %v9875_v30  ;;  %9884 = vtanh.f32 %v6441_v49  ;;  %v6443_v16 = vmul.f32 0.7978846, %v6427_v19  ;;  %v6482_v20 = vmul.f32 %v6466_v59, %v11867_v62 }
0x266b   :  { %v6472_v12 = vadd.f32 1.0, %v9877_v22  ;;  %v6447_v0 = vmul.f32 0.7978846, %v6431_v9  ;;  %v6484_v50 = vmul.f32 %v6468_v15, %v11872_v37  ;;  %v6433_v27 = vadd.f32 %v6417_v32, %v11913_v3 }
0x266c   :  { %v6486_v33 = vmul.f32 %v6470_v63, %v6358_v47  ;;  %9886 = vtanh.f32 %v6443_v16  ;;  %v6445_v6 = vmul.f32 0.7978846, %v6429_v41  ;;  %v6426_v31 = vadd.f32 %v6410_v21, %v11878_v4 }
0x266d   :  { %v6488_v52 = vmul.f32 %v6472_v12, %v6360_v18  ;;  %9888 = vtanh.f32 %v6447_v0  ;;  %v6449_v44 = vmul.f32 0.7978846, %v6433_v27  ;;  %v6430_v56 = vadd.f32 %v6414_v34, %v11898_v10 }
0x266e   :  { %v6498_v58 = vpack.c.bf16 %v6486_v33, %v6482_v20  ;;  %9890 = vtanh.f32 %v6445_v6  ;;  %v6428_v62 = vadd.f32 %v6412_v7, %v11884_v29  ;;  %v6442_v8 = vmul.f32 0.7978846, %v6426_v31 }
0x266f   :  { %v6500_v38 = vpack.c.bf16 %v6488_v52, %v6484_v50  ;;  %9892 = vtanh.f32 %v6449_v44  ;;  %v6446_v37 = vmul.f32 0.7978846, %v6430_v56  ;;  %v6432_v36 = vadd.f32 %v6416_v2, %v11903_v35 }
0x2670   :  { %v9879_v47 = vpop.eup %9878  ;;  %v6355_v46 = vmul.f32 0.5, %v11852_v28  ;;  %v6444_v14 = vmul.f32 0.7978846, %v6428_v62  ;;  %v6359_v48 = vmul.f32 0.5, %v11859_v51  ;;  %9894 = vtanh.f32 %v6442_v8 }
0x2671   :  { %v9881_v18 = vpop.eup %9880  ;;  %v6467_v55 = vadd.f32 1.0, %v9879_v47  ;;  %v6448_v21 = vmul.f32 0.7978846, %v6432_v36  ;;  %9896 = vtanh.f32 %v6446_v37  ;;  %v6357_v5 = vmul.f32 0.5, %v11862_v61 }
0x2672   :  { %v6471_v42 = vadd.f32 1.0, %v9881_v18  ;;  %9898 = vtanh.f32 %v6444_v14  ;;  %v6361_v53 = vmul.f32 0.5, %v11865_v17  ;;  %v6363_v59 = vmul.f32 0.5, %v11889_v25 }
0x2673   :  { %v9883_v13 = vpop.eup %9882  ;;  %v6483_v11 = vmul.f32 %v6467_v55, %v6355_v46  ;;  %9900 = vtanh.f32 %v6448_v21  ;;  %v6367_v30 = vmul.f32 0.5, %v11910_v26  ;;  %v6365_v34 = vmul.f32 0.5, %v11895_v45 }
0x2674   :  { %v9885_v43 = vpop.eup %9884  ;;  %v6487_v40 = vmul.f32 %v6471_v42, %v6359_v48  ;;  %v6469_v57 = vadd.f32 1.0, %v9883_v13  ;;  %v6369_v63 = vmul.f32 0.5, %v11913_v3  ;;  %v6362_v0 = vmul.f32 0.5, %v11878_v4 }
0x2675   :  { %v6473_v60 = vadd.f32 1.0, %v9885_v43  ;;  %v6366_v41 = vmul.f32 0.5, %v11898_v10  ;;  %v6364_v45 = vmul.f32 0.5, %v11884_v29  ;;  %v8025_v10 = vld [vmem:[%s12077_s15 + $0x1] ss:$0 sm:$0xff] }
0x2676   :  { %v9887_v28 = vpop.eup %9886  ;;  %v6499_v1 = vpack.c.bf16 %v6487_v40, %v6483_v11  ;;  %v6485_v51 = vmul.f32 %v6469_v57, %v6357_v5 }
0x2677   :  { %v9889_v54 = vpop.eup %9888  ;;  %v6489_v24 = vmul.f32 %v6473_v60, %v6361_v53  ;;  %v6475_v49 = vadd.f32 1.0, %v9887_v28 }
0x2678   :  { %6803 = vmatprep.mubr.bf16.mxu1 %v6499_v1  ;;  %v6479_v7 = vadd.f32 1.0, %v9889_v54  ;;  %v9891_v32 = vpop.eup %9890 }
0x2679   :  { %v6501_v15 = vpack.c.bf16 %v6489_v24, %v6485_v51  ;;  %6804 = vmatmul.mubr.bf16.vlgmr.msra.gmra.mrb[96].mxu1 %v6498_v58  ;;  %v9893_v61 = vpop.eup %9892  ;;  %v6491_v19 = vmul.f32 %v6475_v49, %v6363_v59  ;;  %v6477_v22 = vadd.f32 1.0, %v9891_v32 }
0x267a   :  { %v6495_v17 = vmul.f32 %v6479_v7, %v6367_v30  ;;  %v6481_v9 = vadd.f32 1.0, %v9893_v61  ;;  %v9895_v2 = vpop.eup %9894 }
0x267b   :  { %6850 = vmatprep.mubr.bf16.mxu0 %v6501_v15  ;;  %v9897_v25 = vpop.eup %9896  ;;  %v6493_v16 = vmul.f32 %v6477_v22, %v6365_v34  ;;  %v6474_v20 = vadd.f32 1.0, %v9895_v2  ;;  %v9672_v22 = vld [vmem:[%s12080_s18 + $0x10] sm:$0xff]   ;;  %v9673_v34 = vld [vmem:[%s12080_s18 + $0x18] sm:$0xff]  }
0x267c   :  { %6851 = vmatmul.mubr.bf16.vlgmr.msra.gmra.mrb[120].mxu0 %v6500_v38  ;;  %v6503_v12 = vpack.c.bf16 %v6495_v17, %v6491_v19  ;;  %v6497_v26 = vmul.f32 %v6481_v9, %v6369_v63  ;;  %v9899_v33 = vpop.eup %9898  ;;  %v6478_v50 = vadd.f32 1.0, %v9897_v25  ;;  %v6368_v38 = vmul.f32 0.5, %v11903_v35  ;;  %v9670_v19 = vld [vmem:[%s12080_s18] sm:$0xff]   ;;  %v9675_v9 = vld [vmem:[%s12080_s18 + $0x28] sm:$0xff]   ;;  %v9676_v2 = vld [vmem:[%s12080_s18 + $0x30] sm:$0xff]  }
0x267d   :  { %v9901_v52 = vpop.eup %9900  ;;  %v6476_v3 = vadd.f32 1.0, %v9899_v33  ;;  %v6490_v58 = vmul.f32 %v6474_v20, %v6362_v0  ;;  %v9943_v17 = vmov 0.0   ;;  %v9674_v63 = vld [vmem:[%s12080_s18 + $0x20] sm:$0xff]   ;;  %v9679_v25 = vld [vmem:[%s12082_s20 + $0x8] sm:$0xff]   ;;  %v9681_v20 = vld [vmem:[%s12082_s20 + $0x18] sm:$0xff]  }
0x267e   :  { %6810 = vmatprep.mubr.bf16.mxu1 %v6503_v12  ;;  %v6505_v27 = vpack.c.bf16 %v6497_v26, %v6493_v16  ;;  %v6494_v6 = vmul.f32 %v6478_v50, %v6366_v41  ;;  %v6480_v44 = vadd.f32 1.0, %v9901_v52  ;;  %9218 = vmatprep.subr.bf16.mxu1 %v9943_v17  ;;  %v9678_v12 = vld [vmem:[%s12082_s20] sm:$0xff]   ;;  %v9677_v16 = vld [vmem:[%s12080_s18 + $0x38] sm:$0xff]   ;;  %v9680_v26 = vld [vmem:[%s12082_s20 + $0x10] sm:$0xff]  }
0x267f   :  { %v6492_v56 = vmul.f32 %v6476_v3, %v6364_v45  ;;  %9238 = vmatprep.subr.bf16.mxu0 %v9943_v17  ;;  %9219 = vmatpush3.bf16.msra.mxu1 %v9670_v19  ;;  %v9682_v33 = vld [vmem:[%s12082_s20 + $0x20] sm:$0xff]   ;;  %v9683_v0 = vld [vmem:[%s12082_s20 + $0x28] sm:$0xff]  }
0x2680   :  { %6857 = vmatprep.mubr.bf16.mxu0 %v6505_v27  ;;  %v6502_v31 = vpack.c.bf16 %v6494_v6, %v6490_v58  ;;  %v6496_v62 = vmul.f32 %v6480_v44, %v6368_v38  ;;  %9220 = vmatprep.subr.bf16.mxu1 %v9943_v17  ;;  %v8060_v44 = vld [vmem:[%s12078_s16 + $0x1] ss:$0 sm:$0xff] }
0x2681   :  { %9239 = vmatpush3.bf16.msra.mxu0 %v9678_v12 }
0x2682   :  { %6811 = vmatmul.mubr.bf16.gmra.mrb[100].mxu1 %v6502_v31  ;;  %v6504_v47 = vpack.c.bf16 %v6496_v62, %v6492_v56  ;;  %9240 = vmatprep.subr.bf16.mxu0 %v9943_v17 }
0x2683   :  { %9234 = vmatprep.mubr.msk.bf16.mxu1 %vm9944_vm1, %v9943_v17 }
0x2684   :  { %6858 = vmatmul.mubr.bf16.gmra.mrb[124].mxu0 %v6504_v47  ;;  %v8061_v47 = vld [vmem:[%s12079_s17 + $0x1] ss:$0 sm:$0xff] }
0x2685   :  { %9254 = vmatprep.mubr.msk.bf16.mxu0 %vm9944_vm1, %v9943_v17  ;;  %9241 = vmatpush3.bf16.msra.mxu0 %v9679_v25 }
0x2686   :  { %9242 = vmatprep.subr.bf16.mxu0 %v9943_v17 }
0x2689   :  { %9243 = vmatpush3.bf16.msra.mxu0 %v9680_v26 }
0x268a   :  { %9244 = vmatprep.subr.bf16.mxu0 %v9943_v17 }
0x268d   :  { %9245 = vmatpush3.bf16.msra.mxu0 %v9681_v20 }
0x268e   :  { %9246 = vmatprep.subr.bf16.mxu0 %v9943_v17 }
0x2691   :  { %9247 = vmatpush3.bf16.msra.mxu0 %v9682_v33 }
0x2692   :  { %9248 = vmatprep.subr.bf16.mxu0 %v9943_v17 }
0x2695   :  { %9249 = vmatpush3.bf16.msra.mxu0 %v9683_v0 }
0x2696   :  { %9250 = vmatprep.subr.bf16.mxu0 %v9943_v17 }
0x274c   :  { %v8488_v4 = vpop.f32.mrb[96].mxu1 }
0x274d   :  { %v8489_v8 = vpop.f32.mrb[97].mxu1 }
0x274e   :  { %v8490_v29 = vadd.f32 %v8489_v8, %v8488_v4  ;;  %v8491_v37 = vpop.f32.mrb[98].mxu1 }
0x274f   :  { %v8516_v36 = vpop.f32.mrb[120].mxu0  ;;  %v8492_v18 = vpop.f32.mrb[99].mxu1 }
0x2750   :  { %v6806_v46 = vadd.f32 %v8490_v29, %v8025_v10  ;;  %v8517_v35 = vpop.f32.mrb[121].mxu0  ;;  %v9685_v18 = vld [vmem:[%s12082_s20 + $0x38] sm:$0xff]  }
0x2751   :  { %v8518_v55 = vadd.f32 %v8517_v35, %v8516_v36  ;;  %v8519_v14 = vpop.f32.mrb[122].mxu0  ;;  %v9684_v36 = vld [vmem:[%s12082_s20 + $0x30] sm:$0xff]   ;;  %s9945_s20 = smov [#allocation2]  }
0x2752   :  { %v8520_v48 = vpop.f32.mrb[123].mxu0  ;;  %9251 = vmatpush3.bf16.msra.mxu0 %v9684_v36  ;;  %s7146_s2 = sshll.u32 %s9945_s20, 4  ;;  %s7147_s2 = int_to_ptr.vmem [resolvable:$true] %s7146_s2 }
0x2753   :  { %v6853_v42 = vadd.f32 %v8518_v55, %v6806_v46  ;;  %9252 = vmatprep.subr.bf16.mxu0 %v9943_v17  ;;  %v8062_v46 = vld [vmem:[%s12081_s19] ss:$0 sm:$0xff]  ;;  %s9918_s19 = scalar_lea.vmem %s7147_s2, 32  ;;  %p9923_p1 = scmp.lt.s32.totalorder %s7147_s2, %s7147_s2 }
0x2754   :  { %p9919_p0 = scmp.ne.s32.totalorder %s7147_s2, %s9918_s19  ;;  %p9924_p2 = scmp.lt.s32.totalorder %s9918_s19, %s9918_s19 }
0x2755   :  { %v6865_v21 = vadd.f32 %v6853_v42, %v11724_v23  ;;  %v8494_v13 = vpop.f32.mrb[100].mxu1 }
0x2756   :  { %v8495_v43 = vpop.f32.mrb[101].mxu1  ;;  %9253 = vmatpush3.bf16.msra.mxu0 %v9685_v18  ;;  %p9925_p3 = por %p9924_p2, %p9923_p1 }
0x2757   :  { %6871 = vadd.xlane.f32.xlu1 %v6865_v21  ;;  %v8522_v11 = vpop.f32.mrb[124].mxu0  ;;  %v8496_v40 = vadd.f32 %v8495_v43, %v8494_v13  ;;  %v8497_v57 = vpop.f32.mrb[102].mxu1  ;;  %v8071_v43 = vld [vmem:[%s12109_s26] ss:$0 sm:$0xff] }
0x2758   :  { %v8523_v5 = vpop.f32.mrb[125].mxu0  ;;  %v8498_v53 = vpop.f32.mrb[103].mxu1  ;;  %p9926_p4 = pnand %p9925_p3, %p9919_p0 }
0x2759   :  { %v6813_v60 = vadd.f32 %v8496_v40, %v8025_v10  ;;  %v8524_v28 = vadd.f32 %v8523_v5, %v8522_v11  ;;  %v8525_v1 = vpop.f32.mrb[126].mxu0 }
0x275a   :  { %v8526_v54 = vpop.f32.mrb[127].mxu0 }
0x275b   :  { %v6860_v51 = vadd.f32 %v8524_v28, %v6813_v60 }
0x275d   :  { %v6866_v24 = vadd.f32 %v6860_v51, %v11731_v39  ;;  %v9671_v39 = vld [vmem:[%s12080_s18 + $0x8] sm:$0xff]  }
0x275e   :  { %9221 = vmatpush3.bf16.msra.mxu1 %v9671_v39 }
0x275f   :  { %6873 = vadd.xlane.f32.xlu0 %v6866_v24  ;;  %9222 = vmatprep.subr.bf16.mxu1 %v9943_v17 }
0x2762   :  { %9223 = vmatpush3.bf16.msra.mxu1 %v9672_v22 }
0x2763   :  { %9224 = vmatprep.subr.bf16.mxu1 %v9943_v17 }
0x2766   :  { %9225 = vmatpush3.bf16.msra.mxu1 %v9673_v34 }
0x2767   :  { %9226 = vmatprep.subr.bf16.mxu1 %v9943_v17 }
0x276a   :  { %9227 = vmatpush3.bf16.msra.mxu1 %v9674_v63 }
0x276b   :  { %9228 = vmatprep.subr.bf16.mxu1 %v9943_v17 }
0x276e   :  { %9229 = vmatpush3.bf16.msra.mxu1 %v9675_v9 }
0x276f   :  { %9230 = vmatprep.subr.bf16.mxu1 %v9943_v17 }
0x2772   :  { %9231 = vmatpush3.bf16.msra.mxu1 %v9676_v2 }
0x2773   :  { %9232 = vmatprep.subr.bf16.mxu1 %v9943_v17 }
0x2776   :  { %9233 = vmatpush3.bf16.msra.mxu1 %v9677_v16 }
0x27e4   :  { %v6872_v49 = vpop.xlane.xlu1 %6871 }
0x27e5   :  { %v6875_v59 = vmul.f32 0.0078125, %v6872_v49 }
0x27e7   :  { %v11967_v30 = vsub.f32 %v6865_v21, %v6875_v59 }
0x27e9   :  { %v6879_v23 = vmul.f32 %v11967_v30, %v11967_v30 }
0x27eb   :  { %6881 = vadd.xlane.f32.xlu1 %v6879_v23 }
0x27ec   :  { %v6874_v7 = vpop.xlane.xlu0 %6873 }
0x27ed   :  { %v6876_v32 = vmul.f32 0.0078125, %v6874_v7 }
0x27ef   :  { %v6878_v15 = vsub.f32 %v6866_v24, %v6876_v32 }
0x27f1   :  { %v6880_v61 = vmul.f32 %v6878_v15, %v6878_v15 }
0x27f3   :  { %6883 = vadd.xlane.f32.xlu0 %v6880_v61 }
0x2878   :  { %v6882_v41 = vpop.xlane.xlu1 %6881 }
0x2879   :  { %v6885_v50 = vmul.f32 0.0078125, %v6882_v41 }
0x287b   :  { %v6887_v52 = vadd.f32 1e-12, %v6885_v50 }
0x287d   :  { %9902 = vrsqrt.f32 %v6887_v52 }
0x2880   :  { %v6884_v27 = vpop.xlane.xlu0 %6883 }
0x2881   :  { %v6886_v45 = vmul.f32 0.0078125, %v6884_v27 }
0x2883   :  { %v6888_v3 = vadd.f32 1e-12, %v6886_v45 }
0x2885   :  { %9904 = vrsqrt.f32 %v6888_v3 }
0x2887   :  { %v9903_v58 = vpop.eup %9902 }
0x2888   :  { %v6891_v6 = vmul.f32 %v9903_v58, %v11967_v30 }
0x288a   :  { %v6899_v56 = vmul.f32 %v8060_v44, %v6891_v6 }
0x288c   :  { %v6907_v10 = vadd.f32 %v8061_v47, %v6899_v56 }
0x288f   :  { %v9905_v38 = vpop.eup %9904 }
0x2890   :  { %v6892_v31 = vmul.f32 %v9905_v38, %v6878_v15 }
0x2892   :  { %v6900_v62 = vmul.f32 %v8060_v44, %v6892_v31 }
0x2894   :  { %v6908_v4 = vadd.f32 %v8061_v47, %v6900_v62 }
0x2896   :  { %v6910_v8 = vrot.slane %v6908_v4, 7 }
0x2898   :  { %v6913_v29 = vsel %vm6912_vm2, %v6907_v10, %v6910_v8 }
0x2899   :  { %v6914_v37 = vpack.c.bf16 %v6913_v29, %v6913_v29 }
0x289b   :  { %9235 = vmatmul.mubr.bf16.vlgmr.msra.gmra.mrb[104].mxu1 %v6914_v37 }
0x296e   :  { %v7020_v35 = vpop.f32.mrb[104].mxu1 }
0x296f   :  { %v7021_v55 = vadd.f32 %v8062_v46, %v7020_v35  ;;  %v9236_v14 = vpop.f32.mrb[105].mxu1 }
0x2970   :  { %v7023_v48 = vpop.f32.mrb[106].mxu1 }
0x2971   :  { %v7026_v42 = vmax.f32 %v7021_v55, 0.0  ;;  %v9237_v21 = vpop.f32.mrb[107].mxu1 }
0x2973   :  { %v7027_v13 = vpack.c.bf16 %v7026_v42, %v7026_v42 }
0x2975   :  { %9255 = vmatmul.mubr.bf16.vlgmr.msra.gmra.mrb[128].mxu0 %v7027_v13 }
0x2a48   :  { %v7133_v11 = vpop.f32.mrb[128].mxu0 }
0x2a49   :  { %v7134_v40 = vadd.f32 %v8071_v43, %v7133_v11  ;;  %v9256_v57 = vpop.f32.mrb[129].mxu0 }
0x2a4a   :  { %v7136_v5 = vpop.f32.mrb[130].mxu0 }
0x2a4b   :  { %7139 = vst [vmem:[#allocation2] sm:$0x3] %v7134_v40  ;;  %v9257_v53 = vpop.f32.mrb[131].mxu0 }
0x2a4c   :  { %9929 = shalt.err (!%p9926_p4)
}
0x2a4d   :  { %s12110_s3 = sld [smem:[#allocation13_spill]] }
0x2a53   :  { %s9930_s28 = scalar_lea.hbm %s12110_s3, 32 }
0x2a54   :  { %p9931_p5 = scmp.ne.s32.totalorder %s12110_s3, %s9930_s28  ;;  %p9934_p6 = scmp.lt.u32.totalorder %s9930_s28, %s12110_s3 }
0x2a56   :  { %p9936_p7 = pnand %p9934_p6, %p9931_p5 }
0x2a58   :  { %9939 = shalt.err (!%p9936_p7)
}
0x2a59   :  { %7149 = dma.vmem_to_hbm [thread:$0]  %s7147_s2, 32, %s12110_s3, [#allocation3]  }
0x2a5a   :  { %9940 = dma.done.wait [#allocation3], 32  }
0x2a5b   :  { %9941 = vsyncadd [#allocation3], 4294967264 }
0x2a5c   :  { %7153 = vsyncpa [#allocation3], 1 }

</bundles_post_ra>
